<compile_context>
chip_gen: v7x
topology: tpu7x:2x2x1
jax: 0.10.0
libtpu: 0.0.40
codegen_flags: <defaults>
</compile_context>

<pallas_src>
import math

import jax
import jax.numpy as jnp
from jax import lax
from jax.experimental import pallas as pl
from jax.experimental.pallas import tpu as pltpu


def _round_up(x, m):
    return ((x + m - 1) // m) * m


def _pad_rows(x, n_rows):
    pad = n_rows - x.shape[0]
    if pad:
        x = jnp.pad(x, ((0, pad), (0, 0)))
    return x


# ------------------------------- cosine metric -------------------------------

def _cosine_kernel(q_ref, p_ref, o_ref):
    x = q_ref[...]                                   # (tq, D)
    y = p_ref[...]                                   # (tc, D)
    # Contract last dims directly — no explicit transpose of the proto tile.
    dots = lax.dot_general(
        x, y, dimension_numbers=(((1,), (1,)), ((), ())),
        preferred_element_type=jnp.float32)          # (tq, tc)
    xf = x.astype(jnp.float32)
    yf = y.astype(jnp.float32)
    # rsqrt on squared norms (EUP) instead of sqrt + divide (VALU).
    # max(||.||^2, 1e-16) == max(||.||, 1e-8) of torch's F.cosine_similarity eps.
    inv_xn = lax.rsqrt(jnp.maximum(jnp.sum(xf * xf, axis=-1, keepdims=True), 1e-16))  # (tq,1)
    inv_yn = lax.rsqrt(jnp.maximum(jnp.sum(yf * yf, axis=-1), 1e-16))                 # (tc,)
    o_ref[...] = (dots * inv_xn * inv_yn[None, :]).astype(o_ref.dtype)


def cosine_metrics(query, protos, *, tq_max=256, tc_max=256):
    n_query, dim = query.shape
    n_cls, _ = protos.shape

    tq = min(tq_max, _round_up(n_query, 8))
    tc = min(tc_max, _round_up(n_cls, 128))          # lane-dense output tile
    nq_pad = _round_up(n_query, tq)
    nc_pad = _round_up(n_cls, tc)

    qp = _pad_rows(query, nq_pad)
    pp = _pad_rows(protos, nc_pad)

    out = pl.pallas_call(
        _cosine_kernel,
        out_shape=jax.ShapeDtypeStruct((nq_pad, nc_pad), jnp.float32),
        grid=(nq_pad // tq, nc_pad // tc),
        in_specs=[
            pl.BlockSpec((tq, dim), lambda i, j: (i, 0)),
            pl.BlockSpec((tc, dim), lambda i, j: (j, 0)),
        ],
        out_specs=pl.BlockSpec((tq, tc), lambda i, j: (i, j)),
        compiler_params=pltpu.CompilerParams(
            dimension_semantics=("parallel", "parallel"),
            vmem_limit_bytes=48 * 1024 * 1024,
        ),
    )(qp, pp)
    # NOTE: training-time `*5` scaling is omitted (eval semantics).
    return out[:n_query, :n_cls]


# ------------------------------ relation metric -------------------------------

def _relation_kernel(q_ref, p_ref, w1t_ref, b1_ref, w2_ref, b2_ref, o_ref):
    q = q_ref[...]                                   # (tq, D)
    p = p_ref[...]                                   # (tc, D)
    tq, D = q.shape
    tc = p.shape[0]
    H = b1_ref.shape[-1]                             # 4*D

    # --- separable first-layer terms: computed once per tile row/col and broadcast ---
    hq = jnp.dot(q, w1t_ref[0 * D:1 * D, :], preferred_element_type=jnp.float32)  # (tq, H)
    hp = jnp.dot(p, w1t_ref[1 * D:2 * D, :], preferred_element_type=jnp.float32)  # (tc, H)

    # --- pairwise terms over the (tq, tc, D) tile (elementwise math in f32) ---
    qf = q.astype(jnp.float32)[:, None, :]           # (tq, 1, D)
    pf = p.astype(jnp.float32)[None, :, :]           # (1, tc, D)
    diff = jnp.abs(pf - qf)                          # (tq, tc, D)
    prod = qf * pf                                   # (tq, tc, D)
    dt = q.dtype                                     # MXU operands stay in input dtype
    diff2 = diff.astype(dt).reshape(tq * tc, D)
    prod2 = prod.astype(dt).reshape(tq * tc, D)
    # NOTE(v5e): fusing diff/prod into one K=2D operand would fill more MXU contraction
    # depth, but a minor-dim concat of D<128 slabs is avoided here for robust lowering.
    h_pair = (jnp.dot(diff2, w1t_ref[2 * D:3 * D, :], preferred_element_type=jnp.float32)
              + jnp.dot(prod2, w1t_ref[3 * D:4 * D, :], preferred_element_type=jnp.float32))

    h = (h_pair.reshape(tq, tc, H)
         + hq[:, None, :]
         + hp[None, :, :]
         + b1_ref[...].astype(jnp.float32))
    h = jnp.maximum(h, 0.0)                          # relu; dropout is identity in eval

    # --- second layer (out_features=1): VPU multiply + lane reduction, no N=1 matmul ---
    w2 = w2_ref[...].astype(jnp.float32)             # (1, H)
    out = jnp.sum(h * w2, axis=-1) + b2_ref[0, 0]    # (tq, tc), b2 scalar from SMEM
    o_ref[...] = out.astype(o_ref.dtype)


def relation_metrics(query, protos, w1, b1, w2, b2, *, tq_max=128, tc_max=128):
    """w1: [4D,4D], b1: [4D], w2: [1,4D], b2: [1] (already weight-norm folded)."""
    n_query, dim = query.shape
    n_cls, _ = protos.shape
    H = 4 * dim
    assert w1.shape == (H, H) and b1.shape == (H,) and w2.shape == (1, H)

    # Tile budget sized for v7x's 64 MiB VMEM at D=32 (h tile + pairwise slabs ~< 24 MiB).
    tq = min(tq_max, _round_up(n_query, 8))
    tc = min(tc_max, _round_up(n_cls, 128))          # lane-dense output tile
    nq_pad = _round_up(n_query, tq)
    nc_pad = _round_up(n_cls, tc)

    qp = _pad_rows(query, nq_pad)
    pp = _pad_rows(protos, nc_pad)

    out = pl.pallas_call(
        _relation_kernel,
        out_shape=jax.ShapeDtypeStruct((nq_pad, nc_pad), jnp.float32),
        grid=(nq_pad // tq, nc_pad // tc),
        in_specs=[
            pl.BlockSpec((tq, dim), lambda i, j: (i, 0)),     # query tile
            pl.BlockSpec((tc, dim), lambda i, j: (j, 0)),     # proto tile
            pl.BlockSpec((H, H), lambda i, j: (0, 0)),        # W1^T (resident)
            pl.BlockSpec((1, H), lambda i, j: (0, 0)),        # b1
            pl.BlockSpec((1, H), lambda i, j: (0, 0)),        # w2 row
            pl.BlockSpec(memory_space=pltpu.MemorySpace.SMEM),  # b2 scalar
        ],
        out_specs=pl.BlockSpec((tq, tc), lambda i, j: (i, j)),
        compiler_params=pltpu.CompilerParams(
            dimension_semantics=("parallel", "parallel"),
            vmem_limit_bytes=48 * 1024 * 1024,
        ),
    )(qp, pp, w1.T, b1.reshape(1, H), w2, b2.reshape(1, 1))
    return out[:n_query, :n_cls]


# ------------------------- parameter init (synthetic) -------------------------

def _weight_norm_fold(v):
    """Effective weight of nn.utils.weight_norm(linear) right after init: g=||v||_row."""
    row_norm = jnp.sqrt(jnp.sum(v * v, axis=1, keepdims=True))
    g = row_norm
    return g * v / jnp.maximum(row_norm, 1e-12)


def init_relation_params(key, proj_hidden_size):
    H = proj_hidden_size * 4
    k1, k2 = jax.random.split(key)
    # LinearProjection(H, H, activation='relu'): std = sqrt(1/H) * sqrt(2)
    v1 = (math.sqrt(1.0 / H) * math.sqrt(2.0)) * jax.random.normal(k1, (H, H), jnp.float32)
    w1 = _weight_norm_fold(v1)
    b1 = jnp.zeros((H,), jnp.float32)
    # LinearProjection(H, 1, activation='linear'): std = sqrt(1/H)
    v2 = math.sqrt(1.0 / H) * jax.random.normal(k2, (1, H), jnp.float32)
    w2 = _weight_norm_fold(v2)
    b2 = jnp.zeros((1,), jnp.float32)
    return w1, b1, w2, b2


class MetricsLayerPallas:
    def __init__(self, metrics, proj_hidden_size, key):
        assert metrics in ('relation', 'cosine')
        self.metrics = metrics
        if metrics == 'relation':
            self.params = init_relation_params(key, proj_hidden_size)

    @property
    def name(self):
        return self.metrics

    def __call__(self, query, protos):
        if self.metrics == 'cosine':
            return cosine_metrics(query, protos)
        return relation_metrics(query, protos, *self.params)


# ------------------------------ pure-JAX reference ----------------------------

def ref_relation(q, p, w1, b1, w2, b2):
    Nq, D = q.shape
    Nc = p.shape[0]
    qe = jnp.broadcast_to(q[:, None, :], (Nq, Nc, D))
    pe = jnp.broadcast_to(p[None, :, :], (Nq, Nc, D))
    feat = jnp.concatenate([qe, pe, jnp.abs(pe - qe), qe * pe], axis=-1)
    h = jax.nn.relu(feat @ w1.T + b1)
    return (h @ w2.T + b2)[..., 0]


def ref_cosine(q, p):
    xn = jnp.maximum(jnp.linalg.norm(q, axis=-1, keepdims=True), 1e-8)
    yn = jnp.maximum(jnp.linalg.norm(p, axis=-1, keepdims=True), 1e-8)
    return (q @ p.T) / (xn * yn.T)


# ------------------------------------ main -------------------------------------

if __name__ == "__main__":
    proj_hidden_size = 32          # dim (H = 4*dim = 128)
    n_query, n_cls = 8, 4

    key = jax.random.PRNGKey(0)
    kq, kp, kparams = jax.random.split(key, 3)
    query = jax.random.normal(kq, (n_query, proj_hidden_size), jnp.float32)
    protos = jax.random.normal(kp, (n_cls, proj_hidden_size), jnp.float32)

    # relation metric
    rel_layer = MetricsLayerPallas('relation', proj_hidden_size, kparams)
    rel_out = jax.block_until_ready(rel_layer(query, protos))
    rel_ref = ref_relation(query, protos, *rel_layer.params)
    assert rel_out.shape == (n_query, n_cls)
    assert jnp.allclose(rel_out, rel_ref, atol=1e-4, rtol=1e-4), "relation mismatch"

    # cosine metric
    cos_layer = MetricsLayerPallas('cosine', proj_hidden_size, kparams)
    cos_out = jax.block_until_ready(cos_layer(query, protos))
    cos_ref = ref_cosine(query, protos)
    assert cos_out.shape == (n_query, n_cls)
    assert jnp.allclose(cos_out, cos_ref, atol=1e-5, rtol=1e-5), "cosine mismatch"

    print("KERNEL_OK")
</pallas_src>

<mosaic_0001>
module attributes {stable_mosaic.version = 11 : i64} {
  func.func @_relation_kernel(%arg0: i32, %arg1: i32, %arg2: memref<8x32xf32, #tpu.memory_space<vmem>>, %arg3: memref<128x32xf32, #tpu.memory_space<vmem>>, %arg4: memref<128x128xf32, #tpu.memory_space<vmem>>, %arg5: memref<1x128xf32, #tpu.memory_space<vmem>>, %arg6: memref<1x128xf32, #tpu.memory_space<vmem>>, %arg7: memref<1x1xf32, #tpu.memory_space<smem>>, %arg8: memref<8x128xf32, #tpu.memory_space<vmem>>) attributes {dimension_semantics = [#tpu.dimension_semantics<parallel>, #tpu.dimension_semantics<parallel>], iteration_bounds = array<i64: 1, 1>, scalar_prefetch = 0 : i64, scratch_operands = 0 : i64, tpu.core_type = #tpu.core_type<tc>, window_params = [{transform_indices = @transform_0, window_bounds = array<i64: 8, 32>}, {transform_indices = @transform_1, window_bounds = array<i64: 128, 32>}, {pipeline_mode = #tpu.pipeline_mode<synchronous>, transform_indices = @transform_2, window_bounds = array<i64: 128, 128>}, {pipeline_mode = #tpu.pipeline_mode<synchronous>, transform_indices = @transform_3, window_bounds = array<i64: 1, 128>}, {pipeline_mode = #tpu.pipeline_mode<synchronous>, transform_indices = @transform_4, window_bounds = array<i64: 1, 128>}, {transform_indices = @transform_5, window_bounds = array<i64: 1, 1>}, {transform_indices = @transform_6, window_bounds = array<i64: 8, 128>}]} {
    %c0 = arith.constant 0 : index
    %c0_0 = arith.constant 0 : index
    %0 = vector.load %arg2[%c0, %c0_0] : memref<8x32xf32, #tpu.memory_space<vmem>>, vector<8x32xf32>
    %c0_1 = arith.constant 0 : index
    %c0_2 = arith.constant 0 : index
    %1 = vector.load %arg3[%c0_1, %c0_2] : memref<128x32xf32, #tpu.memory_space<vmem>>, vector<128x32xf32>
    %c0_3 = arith.constant 0 : index
    %c0_4 = arith.constant 0 : index
    %2 = vector.load %arg4[%c0_3, %c0_4] : memref<128x128xf32, #tpu.memory_space<vmem>>, vector<32x128xf32>
    %cst = arith.constant dense<0.000000e+00> : vector<8x128xf32>
    %3 = tpu.matmul %0, %2, %cst {dimension_numbers = #tpu.dot_dimension_numbers<[1], [0], [0], [1], [0, 0, 1, 1], [], []>} : vector<8x32xf32>, vector<32x128xf32>, vector<8x128xf32> -> vector<8x128xf32>
    %c32 = arith.constant 32 : index
    %c0_5 = arith.constant 0 : index
    %4 = vector.load %arg4[%c32, %c0_5] : memref<128x128xf32, #tpu.memory_space<vmem>>, vector<32x128xf32>
    %cst_6 = arith.constant dense<0.000000e+00> : vector<128x128xf32>
    %5 = tpu.matmul %1, %4, %cst_6 {dimension_numbers = #tpu.dot_dimension_numbers<[1], [0], [0], [1], [0, 0, 1, 1], [], []>} : vector<128x32xf32>, vector<32x128xf32>, vector<128x128xf32> -> vector<128x128xf32>
    %6 = vector.shape_cast %0 : vector<8x32xf32> to vector<8x1x32xf32>
    %7 = vector.shape_cast %1 : vector<128x32xf32> to vector<1x128x32xf32>
    %8 = vector.broadcast %7 : vector<1x128x32xf32> to vector<8x128x32xf32>
    %9 = vector.broadcast %6 : vector<8x1x32xf32> to vector<8x128x32xf32>
    %10 = arith.subf %8, %9 : vector<8x128x32xf32>
    %11 = math.absf %10 : vector<8x128x32xf32>
    %12 = vector.broadcast %6 : vector<8x1x32xf32> to vector<8x128x32xf32>
    %13 = vector.broadcast %7 : vector<1x128x32xf32> to vector<8x128x32xf32>
    %14 = arith.mulf %12, %13 : vector<8x128x32xf32>
    %15 = vector.shape_cast %11 : vector<8x128x32xf32> to vector<1024x32xf32>
    %16 = vector.shape_cast %14 : vector<8x128x32xf32> to vector<1024x32xf32>
    %c64 = arith.constant 64 : index
    %c0_7 = arith.constant 0 : index
    %17 = vector.load %arg4[%c64, %c0_7] : memref<128x128xf32, #tpu.memory_space<vmem>>, vector<32x128xf32>
    %cst_8 = arith.constant dense<0.000000e+00> : vector<1024x128xf32>
    %18 = tpu.matmul %15, %17, %cst_8 {dimension_numbers = #tpu.dot_dimension_numbers<[1], [0], [0], [1], [0, 0, 1, 1], [], []>} : vector<1024x32xf32>, vector<32x128xf32>, vector<1024x128xf32> -> vector<1024x128xf32>
    %c96 = arith.constant 96 : index
    %c0_9 = arith.constant 0 : index
    %19 = vector.load %arg4[%c96, %c0_9] : memref<128x128xf32, #tpu.memory_space<vmem>>, vector<32x128xf32>
    %cst_10 = arith.constant dense<0.000000e+00> : vector<1024x128xf32>
    %20 = tpu.matmul %16, %19, %cst_10 {dimension_numbers = #tpu.dot_dimension_numbers<[1], [0], [0], [1], [0, 0, 1, 1], [], []>} : vector<1024x32xf32>, vector<32x128xf32>, vector<1024x128xf32> -> vector<1024x128xf32>
    %21 = arith.addf %18, %20 : vector<1024x128xf32>
    %22 = vector.shape_cast %21 : vector<1024x128xf32> to vector<8x128x128xf32>
    %23 = vector.shape_cast %3 : vector<8x128xf32> to vector<8x1x128xf32>
    %24 = vector.broadcast %23 : vector<8x1x128xf32> to vector<8x128x128xf32>
    %25 = arith.addf %22, %24 : vector<8x128x128xf32>
    %26 = vector.shape_cast %5 : vector<128x128xf32> to vector<1x128x128xf32>
    %27 = vector.broadcast %26 : vector<1x128x128xf32> to vector<8x128x128xf32>
    %28 = arith.addf %25, %27 : vector<8x128x128xf32>
    %c0_11 = arith.constant 0 : index
    %c0_12 = arith.constant 0 : index
    %29 = vector.load %arg5[%c0_11, %c0_12] : memref<1x128xf32, #tpu.memory_space<vmem>>, vector<1x128xf32>
    %30 = vector.shape_cast %29 : vector<1x128xf32> to vector<1x1x128xf32>
    %31 = vector.broadcast %30 : vector<1x1x128xf32> to vector<8x128x128xf32>
    %32 = arith.addf %28, %31 : vector<8x128x128xf32>
    %cst_13 = arith.constant 0.000000e+00 : f32
    %33 = vector.broadcast %cst_13 : f32 to vector<8x128x128xf32>
    %34 = arith.maximumf %32, %33 : vector<8x128x128xf32>
    %c0_14 = arith.constant 0 : index
    %c0_15 = arith.constant 0 : index
    %35 = vector.load %arg6[%c0_14, %c0_15] : memref<1x128xf32, #tpu.memory_space<vmem>>, vector<1x128xf32>
    %36 = vector.shape_cast %35 : vector<1x128xf32> to vector<1x1x128xf32>
    %37 = vector.broadcast %36 : vector<1x1x128xf32> to vector<8x128x128xf32>
    %38 = arith.mulf %34, %37 : vector<8x128x128xf32>
    %cst_16 = arith.constant dense<0.000000e+00> : vector<8x128xf32>
    %39 = vector.multi_reduction <add>, %38, %cst_16 [2] : vector<8x128x128xf32> to vector<8x128xf32>
    %c0_17 = arith.constant 0 : index
    %c0_18 = arith.constant 0 : index
    %40 = memref.load %arg7[%c0_17, %c0_18] : memref<1x1xf32, #tpu.memory_space<smem>>
    %41 = vector.broadcast %40 : f32 to vector<8x128xf32>
    %42 = arith.addf %39, %41 : vector<8x128xf32>
    %c0_19 = arith.constant 0 : index
    %c0_20 = arith.constant 0 : index
    %43 = vector.load %arg8[%c0_19, %c0_20] : memref<8x128xf32, #tpu.memory_space<vmem>>, vector<8x128xf32>
    tpu.vector_store %arg8[%c0_19, %c0_20], %42 {strides = array<i32>} : memref<8x128xf32, #tpu.memory_space<vmem>>, vector<8x128xf32>,
    return
  }
  func.func @transform_0(%arg0: i32, %arg1: i32) -> (i32, i32) {
    %c0_i32 = arith.constant 0 : i32
    %c0_i32_0 = arith.constant 0 : i32
    return %arg0, %c0_i32 : i32, i32
  }
  func.func @transform_1(%arg0: i32, %arg1: i32) -> (i32, i32) {
    %c0_i32 = arith.constant 0 : i32
    %c0_i32_0 = arith.constant 0 : i32
    return %arg1, %c0_i32 : i32, i32
  }
  func.func @transform_2(%arg0: i32, %arg1: i32) -> (i32, i32) {
    %c0_i32 = arith.constant 0 : i32
    %c0_i32_0 = arith.constant 0 : i32
    %c0_i32_1 = arith.constant 0 : i32
    return %c0_i32, %c0_i32_0 : i32, i32
  }
  func.func @transform_3(%arg0: i32, %arg1: i32) -> (i32, i32) {
    %c0_i32 = arith.constant 0 : i32
    %c0_i32_0 = arith.constant 0 : i32
    %c0_i32_1 = arith.constant 0 : i32
    return %c0_i32, %c0_i32_0 : i32, i32
  }
  func.func @transform_4(%arg0: i32, %arg1: i32) -> (i32, i32) {
    %c0_i32 = arith.constant 0 : i32
    %c0_i32_0 = arith.constant 0 : i32
    %c0_i32_1 = arith.constant 0 : i32
    return %c0_i32, %c0_i32_0 : i32, i32
  }
  func.func @transform_5(%arg0: i32, %arg1: i32) -> (i32, i32) {
    %c0_i32 = arith.constant 0 : i32
    %c0_i32_0 = arith.constant 0 : i32
    %c0_i32_1 = arith.constant 0 : i32
    return %c0_i32, %c0_i32_0 : i32, i32
  }
  func.func @transform_6(%arg0: i32, %arg1: i32) -> (i32, i32) {
    %c0_i32 = arith.constant 0 : i32
    return %arg0, %arg1 : i32, i32
  }
}

</mosaic_0001>

<bundles_post_ra>
// kernel: tpu_custom_call.1
= control target key start
LH: loop header
LB: loop body
LE: loop exit
PB: predicated region body
PF: predicated region fallthrough
CT: control target
= control target key end

     0   :  { %v8508_v3 = vlaneseq  ;;  %v6147_v4 = vmov 0.0|0.0   ;;  %vm6148_vm0 = vmmov 0   ;;  %v6149_v9 = vmov 0.0   ;;  %s8501_s0 = inlined_call_operand.vmem [shape: f32[8,32], index: 0, kind: input, shape index: {}]   ;;  %s8502_s1 = inlined_call_operand.vmem [shape: f32[128,32], index: 1, kind: input, shape index: {}]   ;;  %s8503_s2 = inlined_call_operand.vmem [shape: f32[128,128], index: 2, kind: input, shape index: {}]   ;;  %s8504_s3 = inlined_call_operand.vmem [shape: f32[1,128], index: 3, kind: input, shape index: {}]   ;;  %s8505_s4 = inlined_call_operand.vmem [shape: f32[1,128], index: 4, kind: input, shape index: {}]   ;;  %s8506_s5 = inlined_call_operand.<no memory space> [shape: f32[1,1], index: 5, kind: input, shape index: {}]   ;;  %s8507_s6 = inlined_call_operand.hbm [shape: f32[8,128], index: 6, kind: output, shape index: {}]  }
   0x1   :  { %v42_v0 = vld [vmem:[%s8503_s2] sm:$0xff]  ;;  %v43_v1 = vld [vmem:[%s8503_s2 + $0x8] sm:$0xff]  ;;  %5935 = vmatprep.subr.bf16.mxu0 %v6147_v4  ;;  %v44_v7 = vld [vmem:[%s8503_s2 + $0x10] sm:$0xff]  ;;  %5500 = vmatprep.mubr.msk.f32.mxu0 %vm6148_vm0, %v6149_v9  ;;  %vm46_vm1 = vcmask 261120   ;;  %v6150_v14 = vmov 1966171168  }
   0x2   :  { %v120_v2 = vld [vmem:[%s8503_s2 + $0x20] sm:$0xff]  ;;  %v5936_v5 = vpack.c.bf16 %v43_v1, %v42_v0  ;;  %v121_v6 = vld [vmem:[%s8503_s2 + $0x28] sm:$0xff]  ;;  %v45_v8 = vld [vmem:[%s8503_s2 + $0x18] sm:$0xff]  ;;  %v319_v15 = vunpack.c.l.s4 %v6150_v14  ;;  %v6217_v16 = vshrl.u32 %v8508_v3, 7 }
   0x3   :  { %v5941_v10 = vpack.c.bf16 %v121_v6, %v120_v2  ;;  %v122_v11 = vld [vmem:[%s8503_s2 + $0x30] sm:$0xff]  ;;  %v123_v12 = vld [vmem:[%s8503_s2 + $0x38] sm:$0xff]  ;;  %v6214_v13 = vld [vmem:[%s8502_s1] sm:$0xff]  ;;  %v5939_v17 = vpack.c.bf16 %v45_v8, %v44_v7 }
   0x4   :  { %8524 = vst [vmem:[#allocation6_spill] sm:$0xff] %v6217_v16  ;;  %5937 = vmatpush3.bf16.msra.mxu0 %v5936_v5  ;;  %v5945_v18 = vpack.c.bf16 %v123_v12, %v122_v11  ;;  %5511 = vmatprep.mubr.msk.f32.mxu1 %vm46_vm1, %v6214_v13  ;;  %v794_v19 = vld [vmem:[%s8503_s2 + $0x60] sm:$0xff]  ;;  %v795_v20 = vld [vmem:[%s8503_s2 + $0x68] sm:$0xff]  ;;  %v320_v22 = vunpack.c.0.s8 %v319_v15  ;;  %v796_v25 = vld [vmem:[%s8503_s2 + $0x70] sm:$0xff]  ;;  %v6246_v28 = vsub.s32 0, %v6217_v16 }
   0x5   :  { %5942 = vmatprep.subr.bf16.mxu1 %v5941_v10  ;;  %5938 = vmatprep.subr.bf16.mxu0 %v6147_v4  ;;  %v5949_v21 = vpack.c.bf16 %v795_v20, %v794_v19  ;;  %v6230_v23 = vld [vmem:[%s8501_s0] sm:$0xff]  ;;  %v797_v26 = vld [vmem:[%s8503_s2 + $0x78] sm:$0xff]  ;;  %v6251_v29 = vld [vmem:[%s8502_s1 + $0x8] sm:$0xff] }
   0x6   :  { %5944 = vmatpush3.bf16.msra.mxu1 %v5941_v10  ;;  %v6233_v24 = vsub.s32 %v320_v22, %v6217_v16  ;;  %v790_v30 = vld [vmem:[%s8503_s2 + $0x40] sm:$0xff]  ;;  %v791_v31 = vld [vmem:[%s8503_s2 + $0x48] sm:$0xff]  ;;  %v6268_v33 = vld [vmem:[%s8502_s1 + $0x10] sm:$0xff]  ;;  %v5953_v34 = vpack.c.bf16 %v797_v26, %v796_v25 }
   0x7   :  { %5946 = vmatprep.subr.bf16.mxu1 %v5945_v18 }
   0x8   :  { %5940 = vmatpush3.bf16.msra.mxu0 %v5939_v17  ;;  %v6243_v27 = vrot.slane %v6230_v23, %v6233_v24 }
   0x9   :  { %5950 = vmatprep.subr.bf16.mxu0 %v5949_v21 }
   0xa   :  { %5948 = vmatpush3.bf16.msra.mxu1 %v5945_v18  ;;  %v6263_v32 = vrot.slane %v6243_v27, %v6233_v24 }
   0xb   :  { %5501 = vmatmul.mubr.msk.f32.vlgmr.msra.gmra.mrb[0].mxu0 %vm46_vm1, %v6230_v23  ;;  %5965 = vmatprep.subr.bf16.mxu1 %v5949_v21 }
   0xc   :  { %5952 = vmatpush3.bf16.msra.mxu0 %v5949_v21 }
   0xd   :  { %12 = vsyncpa [#allocation4], 0  ;;  %5512 = vmatmul.mubr.msk.f32.vlgmr.msra.gmra.mrb[0].mxu1 %vm46_vm1, %v6251_v29  ;;  %v5957_v35 = vpack.c.bf16 %v791_v31, %v790_v30  ;;  %v6274_v36 = vrot.slane %v6263_v32, %v6246_v28  ;;  %v6281_v37 = vld [vmem:[%s8502_s1 + $0x18] sm:$0xff]  ;;  %v792_v38 = vld [vmem:[%s8503_s2 + $0x50] sm:$0xff]  ;;  %5954 = vmatprep.subr.bf16.mxu0 %v5953_v34  ;;  %v332_v17 = vcombine.high %v6243_v27, %v6243_v27  ;;  %vm4245_vm2 = vcmask 130112  }
   0xe   :  { %5967 = vmatpush3.bf16.msra.mxu1 %v5949_v21  ;;  %5514 = vmatprep.mubr.msk.f32.mxu1 %vm46_vm1, %v6268_v33  ;;  %v793_v39 = vld [vmem:[%s8503_s2 + $0x58] sm:$0xff]  ;;  %v6292_v40 = vld [vmem:[%s8502_s1 + $0x20] sm:$0xff]  ;;  %v6308_v45 = vld [vmem:[%s8502_s1 + $0x28] sm:$0xff]  ;;  %vm4252_vm3 = vcmask 195712   ;;  %vm4259_vm4 = vcmask 261312   ;;  %vm4266_vm5 = vcmask 326912  }
   0xf   :  { %v662_v41 = vmul.f32 %v6274_v36, %v6214_v13  ;;  %v663_v42 = vmul.f32 %v6274_v36, %v6251_v29  ;;  %v664_v43 = vmul.f32 %v6274_v36, %v6268_v33  ;;  %v5961_v44 = vpack.c.bf16 %v793_v39, %v792_v38  ;;  %v6314_v46 = vld [vmem:[%s8502_s1 + $0x30] sm:$0xff]  ;;  %5966 = vmatprep.subr.bf16.mxu1 %v5953_v34  ;;  %v6330_v50 = vld [vmem:[%s8502_s1 + $0x38] sm:$0xff]  ;;  %v6336_v51 = vld [vmem:[%s8502_s1 + $0x40] sm:$0xff] }
  0x10   :  { %5956 = vmatpush3.bf16.msra.mxu0 %v5953_v34  ;;  %v665_v47 = vmul.f32 %v6274_v36, %v6281_v37  ;;  %v666_v48 = vmul.f32 %v6274_v36, %v6292_v40  ;;  %v406_v49 = vsub.f32 %v6214_v13, %v6274_v36  ;;  %v667_v52 = vmul.f32 %v6274_v36, %v6308_v45  ;;  %v6352_v56 = vld [vmem:[%s8502_s1 + $0x48] sm:$0xff]  ;;  %v6358_v57 = vld [vmem:[%s8502_s1 + $0x50] sm:$0xff]  ;;  %v6372_v62 = vld [vmem:[%s8502_s1 + $0x58] sm:$0xff] }
  0x11   :  { %5515 = vmatmul.mubr.msk.f32.gmra.mrb[2].mxu1 %vm46_vm1, %v6281_v37  ;;  %5958 = vmatprep.subr.bf16.mxu0 %v5957_v35  ;;  %v407_v53 = vsub.f32 %v6251_v29, %v6274_v36  ;;  %v408_v55 = vsub.f32 %v6268_v33, %v6274_v36  ;;  %v409_v59 = vsub.f32 %v6281_v37, %v6274_v36  ;;  %v6378_v63 = vld [vmem:[%s8502_s1 + $0x60] sm:$0xff]  ;;  %v6392_v5 = vld [vmem:[%s8502_s1 + $0x68] sm:$0xff]  ;;  %v6398_v6 = vld [vmem:[%s8502_s1 + $0x70] sm:$0xff]  ;;  %vm4273_vm6 = vcmask 392512  }
  0x12   :  { %5543 = vmatprep.mubr.msk.f32.mxu0 %vm46_vm1, %v662_v41  ;;  %5517 = vmatprep.mubr.msk.f32.mxu1 %vm46_vm1, %v6292_v40  ;;  %v534_v54 = vand.u32 2147483647, %v406_v49  ;;  %v410_v61 = vsub.f32 %v6292_v40, %v6274_v36  ;;  %v411_v1 = vsub.f32 %v6308_v45, %v6274_v36  ;;  %v412_v4 = vsub.f32 %v6314_v46, %v6274_v36  ;;  %v6412_v11 = vld [vmem:[%s8502_s1 + $0x78] sm:$0xff] }
  0x13   :  { %5544 = vmatmul.mubr.msk.f32.vlgmr.msra.gmra.mrb[2].mxu0 %vm46_vm1, %v663_v42  ;;  %5968 = vmatpush3.bf16.msra.mxu1 %v5953_v34  ;;  %v535_v58 = vand.u32 2147483647, %v407_v53  ;;  %v536_v60 = vand.u32 2147483647, %v408_v55  ;;  %v537_v0 = vand.u32 2147483647, %v409_v59  ;;  %v413_v8 = vsub.f32 %v6330_v50, %v6274_v36 }
  0x14   :  { %5960 = vmatpush3.bf16.msra.mxu0 %v5957_v35  ;;  %5546 = vmatprep.mubr.msk.f32.mxu0 %vm46_vm1, %v664_v43  ;;  %v538_v2 = vand.u32 2147483647, %v410_v61  ;;  %v539_v7 = vand.u32 2147483647, %v411_v1  ;;  %v540_v9 = vand.u32 2147483647, %v412_v4  ;;  %v414_v10 = vsub.f32 %v6336_v51, %v6274_v36 }
  0x15   :  { %5518 = vmatmul.mubr.msk.f32.gmra.mrb[4].mxu1 %vm46_vm1, %v6308_v45  ;;  %5962 = vmatprep.subr.bf16.mxu0 %v5961_v44  ;;  %v668_v12 = vmul.f32 %v6274_v36, %v6314_v46  ;;  %v541_v14 = vand.u32 2147483647, %v413_v8  ;;  %v415_v15 = vsub.f32 %v6352_v56, %v6274_v36  ;;  %v416_v19 = vsub.f32 %v6358_v57, %v6274_v36 }
  0x16   :  { %5520 = vmatprep.mubr.msk.f32.mxu1 %vm46_vm1, %v6314_v46  ;;  %v542_v18 = vand.u32 2147483647, %v414_v10  ;;  %v669_v20 = vmul.f32 %v6274_v36, %v6330_v50  ;;  %v670_v21 = vmul.f32 %v6274_v36, %v6336_v51  ;;  %v417_v25 = vsub.f32 %v6372_v62, %v6274_v36 }
  0x17   :  { %5547 = vmatmul.mubr.msk.f32.gmra.mrb[4].mxu0 %vm46_vm1, %v665_v47  ;;  %v543_v22 = vand.u32 2147483647, %v415_v15  ;;  %v6435_v26 = vrot.slane %v332_v17, %v6233_v24  ;;  %v544_v27 = vand.u32 2147483647, %v416_v19  ;;  %v418_v30 = vsub.f32 %v6378_v63, %v6274_v36 }
  0x18   :  { %5549 = vmatprep.mubr.msk.f32.mxu0 %vm46_vm1, %v666_v48  ;;  %5964 = vmatpush3.bf16.msra.mxu0 %v5961_v44  ;;  %v671_v31 = vmul.f32 %v6274_v36, %v6352_v56  ;;  %v672_v34 = vmul.f32 %v6274_v36, %v6358_v57  ;;  %v545_v35 = vand.u32 2147483647, %v417_v25  ;;  %v419_v38 = vsub.f32 %v6392_v5, %v6274_v36 }
  0x19   :  { %5521 = vmatmul.mubr.msk.f32.gmra.mrb[6].mxu1 %vm46_vm1, %v6330_v50  ;;  %v6451_v39 = vrot.slane %v6435_v26, %v6246_v28  ;;  %v546_v41 = vand.u32 2147483647, %v418_v30  ;;  %v420_v42 = vsub.f32 %v6398_v6, %v6274_v36  ;;  %v673_v43 = vmul.f32 %v6274_v36, %v6372_v62 }
  0x1a   :  { %5523 = vmatprep.mubr.msk.f32.mxu1 %vm46_vm1, %v6336_v51  ;;  %v674_v44 = vmul.f32 %v6274_v36, %v6378_v63  ;;  %v547_v47 = vand.u32 2147483647, %v419_v38  ;;  %v421_v48 = vsub.f32 %v6412_v11, %v6274_v36  ;;  %v675_v53 = vmul.f32 %v6274_v36, %v6392_v5 }
  0x1b   :  { %5550 = vmatmul.mubr.msk.f32.gmra.mrb[6].mxu0 %vm46_vm1, %v667_v52  ;;  %v548_v49 = vand.u32 2147483647, %v420_v42  ;;  %v422_v52 = vsub.f32 %v6214_v13, %v6451_v39  ;;  %v677_v61 = vmul.f32 %v6274_v36, %v6412_v11  ;;  %v680_v8 = vmul.f32 %v6451_v39, %v6268_v33 }
  0x1c   :  { %5743 = vmatprep.mubr.msk.f32.mxu0 %vm46_vm1, %v534_v54  ;;  %v676_v54 = vmul.f32 %v6274_v36, %v6398_v6  ;;  %v549_v55 = vand.u32 2147483647, %v421_v48  ;;  %v679_v36 = vmul.f32 %v6451_v39, %v6251_v29  ;;  %v427_v10 = vsub.f32 %v6308_v45, %v6451_v39 }
  0x1d   :  { %5524 = vmatmul.mubr.msk.f32.gmra.mrb[8].mxu1 %vm46_vm1, %v6352_v56  ;;  %v550_v59 = vand.u32 2147483647, %v422_v52  ;;  %v681_v15 = vmul.f32 %v6451_v39, %v6281_v37  ;;  %v682_v17 = vmul.f32 %v6451_v39, %v6292_v40  ;;  %v429_v19 = vsub.f32 %v6330_v50, %v6451_v39 }
  0x1e   :  { %5526 = vmatprep.mubr.msk.f32.mxu1 %vm46_vm1, %v6358_v57  ;;  %v684_v25 = vmul.f32 %v6451_v39, %v6314_v46  ;;  %v431_v30 = vsub.f32 %v6352_v56, %v6451_v39  ;;  %v686_v38 = vmul.f32 %v6451_v39, %v6336_v51  ;;  %v433_v42 = vsub.f32 %v6372_v62, %v6451_v39 }
  0x1f   :  { %5744 = vmatmul.mubr.msk.f32.vlgmr.msra.gmra.mrb[2].mxu0 %vm46_vm1, %v535_v58  ;;  %v423_v58 = vsub.f32 %v6251_v29, %v6451_v39  ;;  %v687_v48 = vmul.f32 %v6451_v39, %v6352_v56  ;;  %vm4280_vm7 = vcmask 458112   ;;  %vm4287_vm8 = vcmask 523712  }
  0x20   :  { %5746 = vmatprep.mubr.msk.f32.mxu0 %vm46_vm1, %v536_v60  ;;  %v424_v60 = vsub.f32 %v6268_v33, %v6451_v39  ;;  %v561_v52 = vand.u32 2147483647, %v433_v42  ;;  %vm4294_vm9 = vcmask 589312   ;;  %vm4301_vm10 = vcmask 654912  }
  0x21   :  { %5527 = vmatmul.mubr.msk.f32.gmra.mrb[10].mxu1 %vm46_vm1, %v6372_v62  ;;  %v551_v1 = vand.u32 2147483647, %v423_v58  ;;  %v689_v58 = vmul.f32 %v6451_v39, %v6372_v62  ;;  %vm4308_vm11 = vcmask 720512   ;;  %vm4315_vm12 = vcmask 786112  }
  0x22   :  { %5529 = vmatprep.mubr.msk.f32.mxu1 %vm46_vm1, %v6378_v63  ;;  %v552_v4 = vand.u32 2147483647, %v424_v60  ;;  %vm4322_vm13 = vcmask 851712   ;;  %vm4329_vm14 = vcmask 917312   ;;  %vm4336_vm15 = vcmask 982912  }
  0x23   :  { %5747 = vmatmul.mubr.msk.f32.gmra.mrb[4].mxu0 %vm46_vm1, %v537_v0  ;;  %v678_v0 = vmul.f32 %v6451_v39, %v6214_v13  ;;  %vm4343_vm0 = vcmask 1048512  }
  0x24   :  { %5749 = vmatprep.mubr.msk.f32.mxu0 %vm46_vm1, %v538_v2  ;;  %v425_v2 = vsub.f32 %v6281_v37, %v6451_v39 }
  0x25   :  { %5530 = vmatmul.mubr.msk.f32.gmra.mrb[12].mxu1 %vm46_vm1, %v6392_v5 }
  0x26   :  { %5532 = vmatprep.mubr.msk.f32.mxu1 %vm46_vm1, %v6398_v6 }
  0x27   :  { %5750 = vmatmul.mubr.msk.f32.gmra.mrb[6].mxu0 %vm46_vm1, %v539_v7  ;;  %v426_v7 = vsub.f32 %v6292_v40, %v6451_v39 }
  0x28   :  { %5752 = vmatprep.mubr.msk.f32.mxu0 %vm46_vm1, %v540_v9  ;;  %v553_v9 = vand.u32 2147483647, %v425_v2  ;;  %v691_v2 = vmul.f32 %v6451_v39, %v6392_v5 }
  0x29   :  { %5533 = vmatmul.mubr.msk.f32.gmra.mrb[14].mxu1 %vm46_vm1, %v6412_v11 }
  0x2a   :  { %5552 = vmatprep.mubr.msk.f32.mxu1 %vm46_vm1, %v668_v12  ;;  %v554_v12 = vand.u32 2147483647, %v426_v7 }
  0x2b   :  { %5753 = vmatmul.mubr.msk.f32.gmra.mrb[8].mxu0 %vm46_vm1, %v541_v14  ;;  %v428_v14 = vsub.f32 %v6314_v46, %v6451_v39 }
  0x2c   :  { %5755 = vmatprep.mubr.msk.f32.mxu0 %vm46_vm1, %v542_v18  ;;  %v555_v18 = vand.u32 2147483647, %v427_v10  ;;  %v693_v10 = vmul.f32 %v6451_v39, %v6412_v11 }
  0x2d   :  { %5553 = vmatmul.mubr.msk.f32.vlgmr.msra.gmra.mrb[16].mxu1 %vm46_vm1, %v669_v20  ;;  %v556_v20 = vand.u32 2147483647, %v428_v14 }
  0x2e   :  { %5555 = vmatprep.mubr.msk.f32.mxu1 %vm46_vm1, %v670_v21  ;;  %v430_v21 = vsub.f32 %v6336_v51, %v6451_v39 }
  0x2f   :  { %5756 = vmatmul.mubr.msk.f32.gmra.mrb[10].mxu0 %vm46_vm1, %v543_v22  ;;  %v683_v22 = vmul.f32 %v6451_v39, %v6308_v45 }
  0x30   :  { %5758 = vmatprep.mubr.msk.f32.mxu0 %vm46_vm1, %v544_v27  ;;  %v557_v27 = vand.u32 2147483647, %v429_v19 }
  0x31   :  { %5556 = vmatmul.mubr.msk.f32.gmra.mrb[18].mxu1 %vm46_vm1, %v671_v31  ;;  %v558_v31 = vand.u32 2147483647, %v430_v21 }
  0x32   :  { %5558 = vmatprep.mubr.msk.f32.mxu1 %vm46_vm1, %v672_v34  ;;  %v432_v34 = vsub.f32 %v6358_v57, %v6451_v39 }
  0x33   :  { %5759 = vmatmul.mubr.msk.f32.gmra.mrb[12].mxu0 %vm46_vm1, %v545_v35  ;;  %v685_v35 = vmul.f32 %v6451_v39, %v6330_v50 }
  0x34   :  { %5761 = vmatprep.mubr.msk.f32.mxu0 %vm46_vm1, %v546_v41  ;;  %v559_v41 = vand.u32 2147483647, %v431_v30 }
  0x35   :  { %5559 = vmatmul.mubr.msk.f32.gmra.mrb[20].mxu1 %vm46_vm1, %v673_v43  ;;  %v362_v43 = vcombine.high %v6263_v32, %v6263_v32  ;;  %v435_v32 = vsub.f32 %v6392_v5, %v6451_v39 }
  0x36   :  { %5561 = vmatprep.mubr.msk.f32.mxu1 %vm46_vm1, %v674_v44  ;;  %v560_v44 = vand.u32 2147483647, %v432_v34 }
  0x37   :  { %5762 = vmatmul.mubr.msk.f32.gmra.mrb[14].mxu0 %vm46_vm1, %v547_v47  ;;  %v434_v47 = vsub.f32 %v6378_v63, %v6451_v39  ;;  %v563_v60 = vand.u32 2147483647, %v435_v32 }
  0x38   :  { %5764 = vmatprep.mubr.msk.f32.mxu0 %vm46_vm1, %v548_v49  ;;  %v688_v49 = vmul.f32 %v6451_v39, %v6358_v57 }
  0x39   :  { %5562 = vmatmul.mubr.msk.f32.gmra.mrb[22].mxu1 %vm46_vm1, %v675_v53  ;;  %v6552_v53 = vrot.slane %v362_v43, %v6246_v28 }
  0x3a   :  { %5564 = vmatprep.mubr.msk.f32.mxu1 %vm46_vm1, %v676_v54  ;;  %v562_v54 = vand.u32 2147483647, %v434_v47 }
  0x3b   :  { %5765 = vmatmul.mubr.msk.f32.gmra.mrb[16].mxu0 %vm46_vm1, %v549_v55  ;;  %v436_v55 = vsub.f32 %v6398_v6, %v6451_v39  ;;  %v696_v19 = vmul.f32 %v6552_v53, %v6268_v33  ;;  %v443_v21 = vsub.f32 %v6308_v45, %v6552_v53  ;;  %v698_v30 = vmul.f32 %v6552_v53, %v6292_v40 }
  0x3c   :  { %5767 = vmatprep.mubr.msk.f32.mxu0 %vm46_vm1, %v550_v59  ;;  %v690_v59 = vmul.f32 %v6451_v39, %v6378_v63  ;;  %v445_v34 = vsub.f32 %v6330_v50, %v6552_v53  ;;  %v700_v42 = vmul.f32 %v6552_v53, %v6314_v46 }
  0x3d   :  { %5565 = vmatmul.mubr.msk.f32.gmra.mrb[24].mxu1 %vm46_vm1, %v677_v61  ;;  %v437_v61 = vsub.f32 %v6412_v11, %v6451_v39 }
  0x3e   :  { %5567 = vmatprep.mubr.msk.f32.mxu1 %vm46_vm1, %v678_v0  ;;  %v564_v0 = vand.u32 2147483647, %v436_v55  ;;  %v573_v43 = vand.u32 2147483647, %v445_v34  ;;  %v364_v55 = vcombine.high %v6435_v26, %v6435_v26  ;;  %v451_v26 = vsub.f32 %v6392_v5, %v6552_v53 }
  0x3f   :  { %5768 = vmatmul.mubr.msk.f32.gmra.mrb[18].mxu0 %vm46_vm1, %v551_v1  ;;  %v438_v1 = vsub.f32 %v6214_v13, %v6552_v53  ;;  %v565_v7 = vand.u32 2147483647, %v437_v61  ;;  %v704_v61 = vmul.f32 %v6552_v53, %v6358_v57 }
  0x40   :  { %5770 = vmatprep.mubr.msk.f32.mxu0 %vm46_vm1, %v552_v4  ;;  %v692_v4 = vmul.f32 %v6451_v39, %v6398_v6  ;;  %v695_v39 = vmul.f32 %v6552_v53, %v6251_v29 }
  0x41   :  { %5568 = vmatmul.mubr.msk.f32.gmra.mrb[26].mxu1 %vm46_vm1, %v679_v36  ;;  %v439_v36 = vsub.f32 %v6251_v29, %v6552_v53 }
  0x42   :  { %5570 = vmatprep.mubr.msk.f32.mxu1 %vm46_vm1, %v680_v8  ;;  %v566_v8 = vand.u32 2147483647, %v438_v1  ;;  %v6653_v1 = vrot.slane %v364_v55, %v6246_v28 }
  0x43   :  { %5771 = vmatmul.mubr.msk.f32.gmra.mrb[20].mxu0 %vm46_vm1, %v553_v9  ;;  %v440_v9 = vsub.f32 %v6268_v33, %v6552_v53  ;;  %v567_v14 = vand.u32 2147483647, %v439_v36  ;;  %v706_v36 = vmul.f32 %v6552_v53, %v6378_v63 }
  0x44   :  { %5773 = vmatprep.mubr.msk.f32.mxu0 %vm46_vm1, %v554_v12  ;;  %v694_v12 = vmul.f32 %v6552_v53, %v6214_v13 }
  0x45   :  { %5571 = vmatmul.mubr.msk.f32.gmra.mrb[28].mxu1 %vm46_vm1, %v681_v15  ;;  %v441_v15 = vsub.f32 %v6281_v37, %v6552_v53 }
  0x46   :  { %5573 = vmatprep.mubr.msk.f32.mxu1 %vm46_vm1, %v682_v17  ;;  %v568_v17 = vand.u32 2147483647, %v440_v9  ;;  %v453_v9 = vsub.f32 %v6412_v11, %v6552_v53 }
  0x47   :  { %5774 = vmatmul.mubr.msk.f32.gmra.mrb[22].mxu0 %vm46_vm1, %v555_v18  ;;  %v442_v18 = vsub.f32 %v6292_v40, %v6552_v53 }
  0x48   :  { %5776 = vmatprep.mubr.msk.f32.mxu0 %vm46_vm1, %v556_v20  ;;  %v569_v20 = vand.u32 2147483647, %v441_v15  ;;  %v708_v15 = vmul.f32 %v6552_v53, %v6398_v6 }
  0x49   :  { %5574 = vmatmul.mubr.msk.f32.gmra.mrb[30].mxu1 %vm46_vm1, %v683_v22  ;;  %v570_v22 = vand.u32 2147483647, %v442_v18  ;;  %v455_v18 = vsub.f32 %v6251_v29, %v6653_v1 }
  0x4a   :  { %5576 = vmatprep.mubr.msk.f32.mxu1 %vm46_vm1, %v684_v25  ;;  %v444_v25 = vsub.f32 %v6314_v46, %v6552_v53 }
  0x4b   :  { %5777 = vmatmul.mubr.msk.f32.gmra.mrb[24].mxu0 %vm46_vm1, %v557_v27  ;;  %v697_v27 = vmul.f32 %v6552_v53, %v6281_v37 }
  0x4c   :  { %5779 = vmatprep.mubr.msk.f32.mxu0 %vm46_vm1, %v558_v31  ;;  %v571_v31 = vand.u32 2147483647, %v443_v21  ;;  %v710_v21 = vmul.f32 %v6653_v1, %v6214_v13 }
  0x4d   :  { %5577 = vmatmul.mubr.msk.f32.gmra.mrb[32].mxu1 %vm46_vm1, %v685_v35  ;;  %v572_v35 = vand.u32 2147483647, %v444_v25  ;;  %v457_v25 = vsub.f32 %v6281_v37, %v6653_v1 }
  0x4e   :  { %5579 = vmatprep.mubr.msk.f32.mxu1 %vm46_vm1, %v686_v38  ;;  %v446_v38 = vsub.f32 %v6336_v51, %v6552_v53 }
  0x4f   :  { %5780 = vmatmul.mubr.msk.f32.gmra.mrb[26].mxu0 %vm46_vm1, %v559_v41  ;;  %v699_v41 = vmul.f32 %v6552_v53, %v6308_v45  ;;  %v585_v34 = vand.u32 2147483647, %v457_v25  ;;  %v723_v25 = vmul.f32 %v6653_v1, %v6392_v5 }
  0x50   :  { %5782 = vmatprep.mubr.msk.f32.mxu0 %vm46_vm1, %v560_v44  ;;  %v447_v44 = vsub.f32 %v6352_v56, %v6552_v53  ;;  %v574_v47 = vand.u32 2147483647, %v446_v38 }
  0x51   :  { %5580 = vmatmul.mubr.msk.f32.gmra.mrb[34].mxu1 %vm46_vm1, %v687_v48  ;;  %v448_v48 = vsub.f32 %v6358_v57, %v6552_v53 }
  0x52   :  { %5582 = vmatprep.mubr.msk.f32.mxu1 %vm46_vm1, %v688_v49  ;;  %v701_v49 = vmul.f32 %v6552_v53, %v6330_v50  ;;  %v575_v32 = vand.u32 2147483647, %v447_v44 }
  0x53   :  { %5783 = vmatmul.mubr.msk.f32.gmra.mrb[28].mxu0 %vm46_vm1, %v561_v52  ;;  %v702_v52 = vmul.f32 %v6552_v53, %v6336_v51 }
  0x54   :  { %5785 = vmatprep.mubr.msk.f32.mxu0 %vm46_vm1, %v562_v54  ;;  %v449_v54 = vsub.f32 %v6372_v62, %v6552_v53 }
  0x55   :  { %5583 = vmatmul.mubr.msk.f32.gmra.mrb[36].mxu1 %vm46_vm1, %v689_v58  ;;  %v576_v58 = vand.u32 2147483647, %v448_v48  ;;  %v317_v48 = vcombine.high %v6230_v23, %v6230_v23  ;;  %v463_v23 = vsub.f32 %v6352_v56, %v6653_v1 }
  0x56   :  { %5585 = vmatprep.mubr.msk.f32.mxu1 %vm46_vm1, %v690_v59  ;;  %v450_v59 = vsub.f32 %v6378_v63, %v6552_v53 }
  0x57   :  { %5786 = vmatmul.mubr.msk.f32.gmra.mrb[30].mxu0 %vm46_vm1, %v563_v60  ;;  %v703_v60 = vmul.f32 %v6552_v53, %v6352_v56 }
  0x58   :  { %5788 = vmatprep.mubr.msk.f32.mxu0 %vm46_vm1, %v564_v0  ;;  %v577_v0 = vand.u32 2147483647, %v449_v54  ;;  %v716_v54 = vmul.f32 %v6653_v1, %v6314_v46 }
  0x59   :  { %5586 = vmatmul.mubr.msk.f32.gmra.mrb[38].mxu1 %vm46_vm1, %v691_v2  ;;  %v578_v2 = vand.u32 2147483647, %v450_v59 }
  0x5a   :  { %5588 = vmatprep.mubr.msk.f32.mxu1 %vm46_vm1, %v692_v4  ;;  %v452_v4 = vsub.f32 %v6398_v6, %v6552_v53 }
  0x5b   :  { %5789 = vmatmul.mubr.msk.f32.gmra.mrb[32].mxu0 %vm46_vm1, %v565_v7  ;;  %v705_v7 = vmul.f32 %v6552_v53, %v6372_v62 }
  0x5c   :  { %5791 = vmatprep.mubr.msk.f32.mxu0 %vm46_vm1, %v566_v8  ;;  %v579_v8 = vand.u32 2147483647, %v451_v26  ;;  %v591_v26 = vand.u32 2147483647, %v463_v23 }
  0x5d   :  { %5589 = vmatmul.mubr.msk.f32.gmra.mrb[40].mxu1 %vm46_vm1, %v693_v10  ;;  %v580_v10 = vand.u32 2147483647, %v452_v4 }
  0x5e   :  { %5591 = vmatprep.mubr.msk.f32.mxu1 %vm46_vm1, %v694_v12  ;;  %v454_v12 = vsub.f32 %v6214_v13, %v6653_v1 }
  0x5f   :  { %5792 = vmatmul.mubr.msk.f32.gmra.mrb[34].mxu0 %vm46_vm1, %v567_v14  ;;  %v707_v14 = vmul.f32 %v6552_v53, %v6392_v5 }
  0x60   :  { %5794 = vmatprep.mubr.msk.f32.mxu0 %vm46_vm1, %v568_v17  ;;  %v581_v17 = vand.u32 2147483647, %v453_v9  ;;  %v720_v9 = vmul.f32 %v6653_v1, %v6358_v57 }
  0x61   :  { %5592 = vmatmul.mubr.msk.f32.gmra.mrb[42].mxu1 %vm46_vm1, %v695_v39  ;;  %v582_v39 = vand.u32 2147483647, %v454_v12  ;;  %v467_v12 = vsub.f32 %v6392_v5, %v6653_v1 }
  0x62   :  { %5594 = vmatprep.mubr.msk.f32.mxu1 %vm46_vm1, %v696_v19  ;;  %v456_v19 = vsub.f32 %v6268_v33, %v6653_v1 }
  0x63   :  { %5795 = vmatmul.mubr.msk.f32.gmra.mrb[36].mxu0 %vm46_vm1, %v569_v20  ;;  %v709_v20 = vmul.f32 %v6552_v53, %v6412_v11  ;;  %v711_v53 = vmul.f32 %v6653_v1, %v6251_v29 }
  0x64   :  { %5797 = vmatprep.mubr.msk.f32.mxu0 %vm46_vm1, %v570_v22  ;;  %v583_v22 = vand.u32 2147483647, %v455_v18  ;;  %v721_v18 = vmul.f32 %v6653_v1, %v6372_v62 }
  0x65   :  { %5595 = vmatmul.mubr.msk.f32.gmra.mrb[44].mxu1 %vm46_vm1, %v697_v27  ;;  %v584_v27 = vand.u32 2147483647, %v456_v19  ;;  %v595_v19 = vand.u32 2147483647, %v467_v12 }
  0x66   :  { %5597 = vmatprep.mubr.msk.f32.mxu1 %vm46_vm1, %v698_v30  ;;  %v458_v30 = vsub.f32 %v6292_v40, %v6653_v1 }
  0x67   :  { %5798 = vmatmul.mubr.msk.f32.gmra.mrb[38].mxu0 %vm46_vm1, %v571_v31  ;;  %v712_v31 = vmul.f32 %v6653_v1, %v6268_v33 }
  0x68   :  { %5800 = vmatprep.mubr.msk.f32.mxu0 %vm46_vm1, %v572_v35  ;;  %v459_v35 = vsub.f32 %v6308_v45, %v6653_v1  ;;  %v586_v38 = vand.u32 2147483647, %v458_v30 }
  0x69   :  { %5598 = vmatmul.mubr.msk.f32.gmra.mrb[46].mxu1 %vm46_vm1, %v699_v41  ;;  %v460_v41 = vsub.f32 %v6314_v46, %v6653_v1 }
  0x6a   :  { %5600 = vmatprep.mubr.msk.f32.mxu1 %vm46_vm1, %v700_v42  ;;  %v713_v42 = vmul.f32 %v6653_v1, %v6281_v37  ;;  %v587_v44 = vand.u32 2147483647, %v459_v35  ;;  %v725_v35 = vmul.f32 %v6653_v1, %v6412_v11 }
  0x6b   :  { %5801 = vmatmul.mubr.msk.f32.gmra.mrb[40].mxu0 %vm46_vm1, %v573_v43  ;;  %v714_v43 = vmul.f32 %v6653_v1, %v6292_v40 }
  0x6c   :  { %5803 = vmatprep.mubr.msk.f32.mxu0 %vm46_vm1, %v574_v47  ;;  %v461_v47 = vsub.f32 %v6330_v50, %v6653_v1 }
  0x6d   :  { %5601 = vmatmul.mubr.msk.f32.gmra.mrb[48].mxu1 %vm46_vm1, %v701_v49  ;;  %v588_v49 = vand.u32 2147483647, %v460_v41 }
  0x6e   :  { %5603 = vmatprep.mubr.msk.f32.mxu1 %vm46_vm1, %v702_v52  ;;  %v462_v52 = vsub.f32 %v6336_v51, %v6653_v1  ;;  %v589_v55 = vand.u32 2147483647, %v461_v47 }
  0x6f   :  { %5804 = vmatmul.mubr.msk.f32.gmra.mrb[42].mxu0 %vm46_vm1, %v575_v32  ;;  %v715_v32 = vmul.f32 %v6653_v1, %v6308_v45 }
  0x70   :  { %5806 = vmatprep.mubr.msk.f32.mxu0 %vm46_vm1, %v576_v58  ;;  %v6730_v58 = vrot.slane %v317_v48, %v6233_v24  ;;  %v590_v59 = vand.u32 2147483647, %v462_v52 }
  0x71   :  { %5604 = vmatmul.mubr.msk.f32.gmra.mrb[50].mxu1 %vm46_vm1, %v703_v60  ;;  %v464_v60 = vsub.f32 %v6358_v57, %v6653_v1 }
  0x72   :  { %5606 = vmatprep.mubr.msk.f32.mxu1 %vm46_vm1, %v704_v61  ;;  %v717_v61 = vmul.f32 %v6653_v1, %v6330_v50  ;;  %v6746_v4 = vrot.slane %v6730_v58, %v6233_v24 }
  0x73   :  { %5807 = vmatmul.mubr.msk.f32.gmra.mrb[44].mxu0 %vm46_vm1, %v577_v0  ;;  %v718_v0 = vmul.f32 %v6653_v1, %v6336_v51 }
  0x74   :  { %5809 = vmatprep.mubr.msk.f32.mxu0 %vm46_vm1, %v578_v2  ;;  %v465_v2 = vsub.f32 %v6372_v62, %v6653_v1 }
  0x75   :  { %5607 = vmatmul.mubr.msk.f32.gmra.mrb[52].mxu1 %vm46_vm1, %v705_v7  ;;  %v592_v7 = vand.u32 2147483647, %v464_v60 }
  0x76   :  { %5609 = vmatprep.mubr.msk.f32.mxu1 %vm46_vm1, %v706_v36  ;;  %v466_v36 = vsub.f32 %v6378_v63, %v6653_v1 }
  0x77   :  { %5810 = vmatmul.mubr.msk.f32.gmra.mrb[46].mxu0 %vm46_vm1, %v579_v8  ;;  %v719_v8 = vmul.f32 %v6653_v1, %v6352_v56 }
  0x78   :  { %5812 = vmatprep.mubr.msk.f32.mxu0 %vm46_vm1, %v580_v10  ;;  %v593_v10 = vand.u32 2147483647, %v465_v2 }
  0x79   :  { %5610 = vmatmul.mubr.msk.f32.gmra.mrb[54].mxu1 %vm46_vm1, %v707_v14  ;;  %v6762_v14 = vrot.slane %v6746_v4, %v6246_v28 }
  0x7a   :  { %5612 = vmatprep.mubr.msk.f32.mxu1 %vm46_vm1, %v708_v15  ;;  %v594_v15 = vand.u32 2147483647, %v466_v36  ;;  %v333_v36 = vcombine.high %v6730_v58, %v6730_v58 }
  0x7b   :  { %5813 = vmatmul.mubr.msk.f32.gmra.mrb[48].mxu0 %vm46_vm1, %v581_v17  ;;  %v468_v17 = vsub.f32 %v6398_v6, %v6653_v1  ;;  %v728_v47 = vmul.f32 %v6762_v14, %v6268_v33  ;;  %v734_v12 = vmul.f32 %v6762_v14, %v6336_v51  ;;  %v481_v58 = vsub.f32 %v6372_v62, %v6762_v14 }
  0x7c   :  { %5815 = vmatprep.mubr.msk.f32.mxu0 %vm46_vm1, %v582_v39  ;;  %v722_v39 = vmul.f32 %v6653_v1, %v6378_v63 }
  0x7d   :  { %5613 = vmatmul.mubr.msk.f32.gmra.mrb[56].mxu1 %vm46_vm1, %v709_v20  ;;  %v469_v20 = vsub.f32 %v6412_v11, %v6653_v1 }
  0x7e   :  { %5615 = vmatprep.mubr.msk.f32.mxu1 %vm46_vm1, %v710_v21  ;;  %v596_v21 = vand.u32 2147483647, %v468_v17  ;;  %v6851_v17 = vrot.slane %v333_v36, %v6233_v24 }
  0x7f   :  { %5816 = vmatmul.mubr.msk.f32.gmra.mrb[50].mxu0 %vm46_vm1, %v583_v22  ;;  %v470_v22 = vsub.f32 %v6214_v13, %v6762_v14  ;;  %v597_v30 = vand.u32 2147483647, %v469_v20  ;;  %v736_v20 = vmul.f32 %v6762_v14, %v6358_v57 }
  0x80   :  { %5818 = vmatprep.mubr.msk.f32.mxu0 %vm46_vm1, %v584_v27  ;;  %v724_v27 = vmul.f32 %v6653_v1, %v6398_v6  ;;  %v727_v1 = vmul.f32 %v6762_v14, %v6251_v29 }
  0x81   :  { %5616 = vmatmul.mubr.msk.f32.gmra.mrb[58].mxu1 %vm46_vm1, %v711_v53  ;;  %v471_v53 = vsub.f32 %v6251_v29, %v6762_v14 }
  0x82   :  { %5618 = vmatprep.mubr.msk.f32.mxu1 %vm46_vm1, %v712_v31  ;;  %v598_v31 = vand.u32 2147483647, %v470_v22  ;;  %v483_v22 = vsub.f32 %v6392_v5, %v6762_v14 }
  0x83   :  { %5819 = vmatmul.mubr.msk.f32.gmra.mrb[52].mxu0 %vm46_vm1, %v585_v34  ;;  %v472_v34 = vsub.f32 %v6268_v33, %v6762_v14  ;;  %v599_v41 = vand.u32 2147483647, %v471_v53  ;;  %v737_v53 = vmul.f32 %v6762_v14, %v6372_v62 }
  0x84   :  { %5821 = vmatprep.mubr.msk.f32.mxu0 %vm46_vm1, %v586_v38  ;;  %v726_v38 = vmul.f32 %v6762_v14, %v6214_v13 }
  0x85   :  { %5619 = vmatmul.mubr.msk.f32.gmra.mrb[60].mxu1 %vm46_vm1, %v713_v42  ;;  %v473_v42 = vsub.f32 %v6281_v37, %v6762_v14 }
  0x86   :  { %5621 = vmatprep.mubr.msk.f32.mxu1 %vm46_vm1, %v714_v43  ;;  %v600_v43 = vand.u32 2147483647, %v472_v34  ;;  %v611_v34 = vand.u32 2147483647, %v483_v22 }
  0x87   :  { %5822 = vmatmul.mubr.msk.f32.gmra.mrb[54].mxu0 %vm46_vm1, %v587_v44  ;;  %v474_v44 = vsub.f32 %v6292_v40, %v6762_v14  ;;  %v601_v48 = vand.u32 2147483647, %v473_v42  ;;  %v739_v42 = vmul.f32 %v6762_v14, %v6392_v5 }
  0x88   :  { %5824 = vmatprep.mubr.msk.f32.mxu0 %vm46_vm1, %v588_v49  ;;  %v475_v49 = vsub.f32 %v6308_v45, %v6762_v14 }
  0x89   :  { %5622 = vmatmul.mubr.msk.f32.gmra.mrb[62].mxu1 %vm46_vm1, %v715_v32  ;;  %v602_v52 = vand.u32 2147483647, %v474_v44  ;;  %v476_v32 = vsub.f32 %v6314_v46, %v6762_v14 }
  0x8a   :  { %5624 = vmatprep.mubr.msk.f32.mxu1 %vm46_vm1, %v716_v54  ;;  %v729_v54 = vmul.f32 %v6762_v14, %v6281_v37  ;;  %v603_v23 = vand.u32 2147483647, %v475_v49  ;;  %v741_v49 = vmul.f32 %v6762_v14, %v6412_v11 }
  0x8b   :  { %5825 = vmatmul.mubr.msk.f32.gmra.mrb[56].mxu0 %vm46_vm1, %v589_v55  ;;  %v730_v55 = vmul.f32 %v6762_v14, %v6292_v40  ;;  %v604_v60 = vand.u32 2147483647, %v476_v32 }
  0x8c   :  { %5827 = vmatprep.mubr.msk.f32.mxu0 %vm46_vm1, %v590_v59  ;;  %v477_v59 = vsub.f32 %v6330_v50, %v6762_v14 }
  0x8d   :  { %5625 = vmatmul.mubr.msk.f32.gmra.mrb[64].mxu1 %vm46_vm1, %v717_v61  ;;  %v478_v61 = vsub.f32 %v6336_v51, %v6762_v14 }
  0x8e   :  { %5627 = vmatprep.mubr.msk.f32.mxu1 %vm46_vm1, %v718_v0  ;;  %v731_v0 = vmul.f32 %v6762_v14, %v6308_v45  ;;  %v605_v2 = vand.u32 2147483647, %v477_v59 }
  0x8f   :  { %5828 = vmatmul.mubr.msk.f32.gmra.mrb[58].mxu0 %vm46_vm1, %v591_v26  ;;  %v732_v26 = vmul.f32 %v6762_v14, %v6314_v46 }
  0x90   :  { %5830 = vmatprep.mubr.msk.f32.mxu0 %vm46_vm1, %v592_v7  ;;  %v479_v7 = vsub.f32 %v6352_v56, %v6762_v14 }
  0x91   :  { %5628 = vmatmul.mubr.msk.f32.gmra.mrb[66].mxu1 %vm46_vm1, %v719_v8  ;;  %v606_v8 = vand.u32 2147483647, %v478_v61 }
  0x92   :  { %5630 = vmatprep.mubr.msk.f32.mxu1 %vm46_vm1, %v720_v9  ;;  %v480_v9 = vsub.f32 %v6358_v57, %v6762_v14 }
  0x93   :  { %5831 = vmatmul.mubr.msk.f32.gmra.mrb[60].mxu0 %vm46_vm1, %v593_v10  ;;  %v733_v10 = vmul.f32 %v6762_v14, %v6330_v50 }
  0x94   :  { %5833 = vmatprep.mubr.msk.f32.mxu0 %vm46_vm1, %v594_v15  ;;  %v607_v15 = vand.u32 2147483647, %v479_v7 }
  0x95   :  { %5631 = vmatmul.mubr.msk.f32.gmra.mrb[68].mxu1 %vm46_vm1, %v721_v18  ;;  %v608_v18 = vand.u32 2147483647, %v480_v9 }
  0x96   :  { %5633 = vmatprep.mubr.msk.f32.mxu1 %vm46_vm1, %v722_v39  ;;  %v482_v39 = vsub.f32 %v6378_v63, %v6762_v14 }
  0x97   :  { %5834 = vmatmul.mubr.msk.f32.gmra.mrb[62].mxu0 %vm46_vm1, %v595_v19  ;;  %v735_v19 = vmul.f32 %v6762_v14, %v6352_v56 }
  0x98   :  { %5836 = vmatprep.mubr.msk.f32.mxu0 %vm46_vm1, %v596_v21  ;;  %v609_v21 = vand.u32 2147483647, %v481_v58 }
  0x99   :  { %5634 = vmatmul.mubr.msk.f32.gmra.mrb[70].mxu1 %vm46_vm1, %v723_v25  ;;  %v6867_v25 = vrot.slane %v6851_v17, %v6246_v28 }
  0x9a   :  { %5636 = vmatprep.mubr.msk.f32.mxu1 %vm46_vm1, %v724_v27  ;;  %v610_v27 = vand.u32 2147483647, %v482_v39 }
  0x9b   :  { %5837 = vmatmul.mubr.msk.f32.gmra.mrb[64].mxu0 %vm46_vm1, %v597_v30  ;;  %v484_v30 = vsub.f32 %v6398_v6, %v6762_v14  ;;  %v494_v36 = vsub.f32 %v6336_v51, %v6867_v25  ;;  %v495_v9 = vsub.f32 %v6352_v56, %v6867_v25  ;;  %v497_v58 = vsub.f32 %v6372_v62, %v6867_v25 }
  0x9c   :  { %5839 = vmatprep.mubr.msk.f32.mxu0 %vm46_vm1, %v598_v31  ;;  %v738_v31 = vmul.f32 %v6762_v14, %v6378_v63 }
  0x9d   :  { %5637 = vmatmul.mubr.msk.f32.gmra.mrb[72].mxu1 %vm46_vm1, %v725_v35  ;;  %v485_v35 = vsub.f32 %v6412_v11, %v6762_v14 }
  0x9e   :  { %5639 = vmatprep.mubr.msk.f32.mxu1 %vm46_vm1, %v726_v38  ;;  %v612_v38 = vand.u32 2147483647, %v484_v30 }
  0x9f   :  { %5840 = vmatmul.mubr.msk.f32.gmra.mrb[66].mxu0 %vm46_vm1, %v599_v41  ;;  %v486_v41 = vsub.f32 %v6214_v13, %v6867_v25  ;;  %v613_v44 = vand.u32 2147483647, %v485_v35  ;;  %v756_v35 = vmul.f32 %v6867_v25, %v6398_v6 }
  0xa0   :  { %5842 = vmatprep.mubr.msk.f32.mxu0 %vm46_vm1, %v600_v43  ;;  %v740_v43 = vmul.f32 %v6762_v14, %v6398_v6  ;;  %v743_v14 = vmul.f32 %v6867_v25, %v6251_v29 }
  0xa1   :  { %5640 = vmatmul.mubr.msk.f32.gmra.mrb[74].mxu1 %vm46_vm1, %v727_v1  ;;  %v487_v1 = vsub.f32 %v6251_v29, %v6867_v25  ;;  %v745_v29 = vmul.f32 %v6867_v25, %v6281_v37 }
  0xa2   :  { %5642 = vmatprep.mubr.msk.f32.mxu1 %vm46_vm1, %v728_v47  ;;  %v614_v47 = vand.u32 2147483647, %v486_v41  ;;  %v7000_v41 = vld [vmem:[%s8502_s1 + $0x8] sm:$0xff] }
  0xa3   :  { %5843 = vmatmul.mubr.msk.f32.gmra.mrb[68].mxu0 %vm46_vm1, %v601_v48  ;;  %v488_v48 = vsub.f32 %v6268_v33, %v6867_v25  ;;  %v615_v32 = vand.u32 2147483647, %v487_v1 }
  0xa4   :  { %5845 = vmatprep.mubr.msk.f32.mxu0 %vm46_vm1, %v602_v52  ;;  %v742_v52 = vmul.f32 %v6867_v25, %v6214_v13  ;;  %v744_v13 = vmul.f32 %v6867_v25, %v6268_v33  ;;  %v746_v33 = vmul.f32 %v6867_v25, %v6292_v40 }
  0xa5   :  { %5643 = vmatmul.mubr.msk.f32.gmra.mrb[76].mxu1 %vm46_vm1, %v729_v54  ;;  %v489_v54 = vsub.f32 %v6281_v37, %v6867_v25  ;;  %v747_v37 = vmul.f32 %v6867_v25, %v6308_v45 }
  0xa6   :  { %5645 = vmatprep.mubr.msk.f32.mxu1 %vm46_vm1, %v730_v55  ;;  %v616_v55 = vand.u32 2147483647, %v488_v48  ;;  %v7022_v48 = vld [vmem:[%s8502_s1 + $0x18] sm:$0xff] }
  0xa7   :  { %5846 = vmatmul.mubr.msk.f32.gmra.mrb[70].mxu0 %vm46_vm1, %v603_v23  ;;  %v490_v23 = vsub.f32 %v6292_v40, %v6867_v25  ;;  %v617_v59 = vand.u32 2147483647, %v489_v54  ;;  %v748_v40 = vmul.f32 %v6867_v25, %v6314_v46 }
  0xa8   :  { %5848 = vmatprep.mubr.msk.f32.mxu0 %vm46_vm1, %v604_v60  ;;  %v491_v60 = vsub.f32 %v6308_v45, %v6867_v25  ;;  %v749_v45 = vmul.f32 %v6867_v25, %v6330_v50 }
  0xa9   :  { %5646 = vmatmul.mubr.msk.f32.gmra.mrb[78].mxu1 %vm46_vm1, %v731_v0  ;;  %v618_v61 = vand.u32 2147483647, %v490_v23  ;;  %v492_v0 = vsub.f32 %v6314_v46, %v6867_v25  ;;  %v750_v46 = vmul.f32 %v6867_v25, %v6336_v51  ;;  %v751_v51 = vmul.f32 %v6867_v25, %v6352_v56 }
  0xaa   :  { %5648 = vmatprep.mubr.msk.f32.mxu1 %vm46_vm1, %v732_v26  ;;  %v619_v26 = vand.u32 2147483647, %v491_v60  ;;  %v500_v56 = vsub.f32 %v6398_v6, %v6867_v25 }
  0xab   :  { %5849 = vmatmul.mubr.msk.f32.gmra.mrb[72].mxu0 %vm46_vm1, %v605_v2  ;;  %v493_v2 = vsub.f32 %v6330_v50, %v6867_v25  ;;  %v620_v7 = vand.u32 2147483647, %v492_v0  ;;  %v498_v50 = vsub.f32 %v6378_v63, %v6867_v25  ;;  %v7056_v0 = vld [vmem:[%s8502_s1 + $0x30] sm:$0xff] }
  0xac   :  { %5851 = vmatprep.mubr.msk.f32.mxu0 %vm46_vm1, %v606_v8 }
  0xad   :  { %5649 = vmatmul.mubr.msk.f32.gmra.mrb[80].mxu1 %vm46_vm1, %v733_v10  ;;  %v621_v8 = vand.u32 2147483647, %v493_v2  ;;  %v622_v10 = vand.u32 2147483647, %v494_v36  ;;  %v626_v22 = vand.u32 2147483647, %v498_v50 }
  0xae   :  { %5651 = vmatprep.mubr.msk.f32.mxu1 %vm46_vm1, %v734_v12  ;;  %v496_v12 = vsub.f32 %v6358_v57, %v6867_v25  ;;  %v7072_v36 = vld [vmem:[%s8502_s1 + $0x38] sm:$0xff] }
  0xaf   :  { %5852 = vmatmul.mubr.msk.f32.gmra.mrb[74].mxu0 %vm46_vm1, %v607_v15  ;;  %v623_v15 = vand.u32 2147483647, %v495_v9  ;;  %v7082_v9 = vld [vmem:[%s8502_s1 + $0x40] sm:$0xff] }
  0xb0   :  { %5854 = vmatprep.mubr.msk.f32.mxu0 %vm46_vm1, %v608_v18  ;;  %v363_v18 = vcombine.high %v6746_v4, %v6746_v4  ;;  %v624_v39 = vand.u32 2147483647, %v496_v12  ;;  %v499_v4 = vsub.f32 %v6392_v5, %v6867_v25 }
  0xb1   :  { %5652 = vmatmul.mubr.msk.f32.gmra.mrb[82].mxu1 %vm46_vm1, %v735_v19  ;;  %v752_v19 = vmul.f32 %v6867_v25, %v6358_v57  ;;  %v753_v57 = vmul.f32 %v6867_v25, %v6372_v62 }
  0xb2   :  { %5654 = vmatprep.mubr.msk.f32.mxu1 %vm46_vm1, %v736_v20  ;;  %v625_v20 = vand.u32 2147483647, %v497_v58  ;;  %v627_v30 = vand.u32 2147483647, %v499_v4  ;;  %v7098_v58 = vld [vmem:[%s8502_s1 + $0x48] sm:$0xff] }
  0xb3   :  { %5855 = vmatmul.mubr.msk.f32.gmra.mrb[76].mxu0 %vm46_vm1, %v609_v21  ;;  %v6968_v21 = vrot.slane %v363_v18, %v6246_v28 }
  0xb4   :  { %5857 = vmatprep.mubr.msk.f32.mxu0 %vm46_vm1, %v610_v27  ;;  %v754_v27 = vmul.f32 %v6867_v25, %v6378_v63  ;;  %v755_v63 = vmul.f32 %v6867_v25, %v6392_v5  ;;  %v7008_v5 = vld [vmem:[%s8502_s1 + $0x10] sm:$0xff] }
  0xb5   :  { %5655 = vmatmul.mubr.msk.f32.gmra.mrb[84].mxu1 %vm46_vm1, %v737_v53  ;;  %v501_v53 = vsub.f32 %v6412_v11, %v6867_v25  ;;  %v504_v6 = vsub.f32 %v7008_v5, %v6968_v21  ;;  %v511_v18 = vsub.f32 %v7098_v58, %v6968_v21 }
  0xb6   :  { %5657 = vmatprep.mubr.msk.f32.mxu1 %vm46_vm1, %v738_v31  ;;  %v628_v31 = vand.u32 2147483647, %v500_v56  ;;  %v766_v56 = vmul.f32 %v7082_v9, %v6968_v21 }
  0xb7   :  { %5858 = vmatmul.mubr.msk.f32.gmra.mrb[78].mxu0 %vm46_vm1, %v611_v34  ;;  %v6986_v34 = vld [vmem:[%s8502_s1] sm:$0xff] }
  0xb8   :  { %5860 = vmatprep.mubr.msk.f32.mxu0 %vm46_vm1, %v612_v38  ;;  %v502_v62 = vsub.f32 %v6986_v34, %v6968_v21  ;;  %v629_v38 = vand.u32 2147483647, %v501_v53  ;;  %v758_v1 = vmul.f32 %v6986_v34, %v6968_v21  ;;  %v365_v53 = vcombine.high %v6851_v17, %v6851_v17 }
  0xb9   :  { %5658 = vmatmul.mubr.msk.f32.gmra.mrb[86].mxu1 %vm46_vm1, %v739_v42  ;;  %v503_v42 = vsub.f32 %v7000_v41, %v6968_v21  ;;  %v767_v17 = vmul.f32 %v7098_v58, %v6968_v21 }
  0xba   :  { %5660 = vmatprep.mubr.msk.f32.mxu1 %vm46_vm1, %v740_v43  ;;  %v630_v43 = vand.u32 2147483647, %v502_v62 }
  0xbb   :  { %5861 = vmatmul.mubr.msk.f32.gmra.mrb[80].mxu0 %vm46_vm1, %v613_v44  ;;  %v757_v44 = vmul.f32 %v6867_v25, %v6412_v11  ;;  %v7030_v11 = vld [vmem:[%s8502_s1 + $0x20] sm:$0xff] }
  0xbc   :  { %5863 = vmatprep.mubr.msk.f32.mxu0 %vm46_vm1, %v614_v47  ;;  %v631_v47 = vand.u32 2147483647, %v503_v42  ;;  %v506_v25 = vsub.f32 %v7030_v11, %v6968_v21  ;;  %v762_v2 = vmul.f32 %v7030_v11, %v6968_v21 }
  0xbd   :  { %5661 = vmatmul.mubr.msk.f32.gmra.mrb[88].mxu1 %vm46_vm1, %v741_v49  ;;  %v505_v49 = vsub.f32 %v7022_v48, %v6968_v21 }
  0xbe   :  { %5663 = vmatprep.mubr.msk.f32.mxu1 %vm46_vm1, %v742_v52  ;;  %v632_v52 = vand.u32 2147483647, %v504_v6 }
  0xbf   :  { %5864 = vmatmul.mubr.msk.f32.gmra.mrb[82].mxu0 %vm46_vm1, %v615_v32  ;;  %v759_v32 = vmul.f32 %v7000_v41, %v6968_v21 }
  0xc0   :  { %5866 = vmatprep.mubr.msk.f32.mxu0 %vm46_vm1, %v616_v55  ;;  %v760_v55 = vmul.f32 %v7008_v5, %v6968_v21 }
  0xc1   :  { %5664 = vmatmul.mubr.msk.f32.gmra.mrb[90].mxu1 %vm46_vm1, %v743_v14  ;;  %v633_v14 = vand.u32 2147483647, %v505_v49 }
  0xc2   :  { %5666 = vmatprep.mubr.msk.f32.mxu1 %vm46_vm1, %v744_v13  ;;  %v7046_v13 = vld [vmem:[%s8502_s1 + $0x28] sm:$0xff] }
  0xc3   :  { %5867 = vmatmul.mubr.msk.f32.gmra.mrb[84].mxu0 %vm46_vm1, %v617_v59  ;;  %v507_v59 = vsub.f32 %v7046_v13, %v6968_v21 }
  0xc4   :  { %5869 = vmatprep.mubr.msk.f32.mxu0 %vm46_vm1, %v618_v61  ;;  %v634_v61 = vand.u32 2147483647, %v506_v25  ;;  %v7173_v25 = vld [vmem:[%s8502_s1 + $0x70] sm:$0xff] }
  0xc5   :  { %5667 = vmatmul.mubr.msk.f32.gmra.mrb[92].mxu1 %vm46_vm1, %v745_v29  ;;  %v508_v29 = vsub.f32 %v7056_v0, %v6968_v21 }
  0xc6   :  { %5669 = vmatprep.mubr.msk.f32.mxu1 %vm46_vm1, %v746_v33 }
  0xc7   :  { %5870 = vmatmul.mubr.msk.f32.gmra.mrb[86].mxu0 %vm46_vm1, %v619_v26  ;;  %v761_v26 = vmul.f32 %v7022_v48, %v6968_v21 }
  0xc8   :  { %5872 = vmatprep.mubr.msk.f32.mxu0 %vm46_vm1, %v620_v7  ;;  %v635_v7 = vand.u32 2147483647, %v507_v59 }
  0xc9   :  { %5670 = vmatmul.mubr.msk.f32.gmra.mrb[94].mxu1 %vm46_vm1, %v747_v37  ;;  %v509_v37 = vsub.f32 %v7072_v36, %v6968_v21 }
  0xca   :  { %5672 = vmatprep.mubr.msk.f32.mxu1 %vm46_vm1, %v748_v40 }
  0xcb   :  { %5873 = vmatmul.mubr.msk.f32.gmra.mrb[88].mxu0 %vm46_vm1, %v621_v8  ;;  %v636_v8 = vand.u32 2147483647, %v508_v29 }
  0xcc   :  { %5875 = vmatprep.mubr.msk.f32.mxu0 %vm46_vm1, %v622_v10  ;;  %v510_v10 = vsub.f32 %v7082_v9, %v6968_v21 }
  0xcd   :  { %5673 = vmatmul.mubr.msk.f32.gmra.mrb[96].mxu1 %vm46_vm1, %v749_v45  ;;  %v763_v45 = vmul.f32 %v7046_v13, %v6968_v21 }
  0xce   :  { %5675 = vmatprep.mubr.msk.f32.mxu1 %vm46_vm1, %v750_v46  ;;  %v764_v46 = vmul.f32 %v7056_v0, %v6968_v21  ;;  %v638_v50 = vand.u32 2147483647, %v510_v10 }
  0xcf   :  { %5876 = vmatmul.mubr.msk.f32.gmra.mrb[90].mxu0 %vm46_vm1, %v623_v15  ;;  %v637_v15 = vand.u32 2147483647, %v509_v37 }
  0xd0   :  { %5878 = vmatprep.mubr.msk.f32.mxu0 %vm46_vm1, %v624_v39 }
  0xd1   :  { %5676 = vmatmul.mubr.msk.f32.gmra.mrb[98].mxu1 %vm46_vm1, %v751_v51  ;;  %v7108_v51 = vld [vmem:[%s8502_s1 + $0x50] sm:$0xff] }
  0xd2   :  { %5678 = vmatprep.mubr.msk.f32.mxu1 %vm46_vm1, %v752_v19  ;;  %v512_v19 = vsub.f32 %v7108_v51, %v6968_v21 }
  0xd3   :  { %5879 = vmatmul.mubr.msk.f32.gmra.mrb[92].mxu0 %vm46_vm1, %v625_v20 }
  0xd4   :  { %5881 = vmatprep.mubr.msk.f32.mxu0 %vm46_vm1, %v626_v22  ;;  %v765_v22 = vmul.f32 %v7072_v36, %v6968_v21  ;;  %v640_v62 = vand.u32 2147483647, %v512_v19 }
  0xd5   :  { %5679 = vmatmul.mubr.msk.f32.gmra.mrb[100].mxu1 %vm46_vm1, %v753_v57  ;;  %v639_v57 = vand.u32 2147483647, %v511_v18 }
  0xd6   :  { %5681 = vmatprep.mubr.msk.f32.mxu1 %vm46_vm1, %v754_v27  ;;  %v7128_v27 = vld [vmem:[%s8502_s1 + $0x58] sm:$0xff] }
  0xd7   :  { %5882 = vmatmul.mubr.msk.f32.gmra.mrb[94].mxu0 %vm46_vm1, %v627_v30  ;;  %v513_v30 = vsub.f32 %v7128_v27, %v6968_v21 }
  0xd8   :  { %5884 = vmatprep.mubr.msk.f32.mxu0 %vm46_vm1, %v628_v31 }
  0xd9   :  { %5682 = vmatmul.mubr.msk.f32.gmra.mrb[102].mxu1 %vm46_vm1, %v755_v63  ;;  %v7140_v63 = vld [vmem:[%s8502_s1 + $0x60] sm:$0xff]  ;;  %v641_v6 = vand.u32 2147483647, %v513_v30  ;;  %v772_v30 = vmul.f32 %v7173_v25, %v6968_v21 }
  0xda   :  { %5684 = vmatprep.mubr.msk.f32.mxu1 %vm46_vm1, %v756_v35  ;;  %v514_v35 = vsub.f32 %v7140_v63, %v6968_v21 }
  0xdb   :  { %5885 = vmatmul.mubr.msk.f32.gmra.mrb[96].mxu0 %vm46_vm1, %v629_v38 }
  0xdc   :  { %5887 = vmatprep.mubr.msk.f32.mxu0 %vm46_vm1, %v630_v43  ;;  %v768_v43 = vmul.f32 %v7108_v51, %v6968_v21 }
  0xdd   :  { %5685 = vmatmul.mubr.msk.f32.gmra.mrb[104].mxu1 %vm46_vm1, %v757_v44  ;;  %v7160_v44 = vld [vmem:[%s8502_s1 + $0x68] sm:$0xff] }
  0xde   :  { %v7037_v54 = vpop.f32.mrb[0].mxu0  ;;  %5687 = vmatprep.mubr.msk.f32.mxu1 %vm46_vm1, %v758_v1  ;;  %v515_v1 = vsub.f32 %v7160_v44, %v6968_v21  ;;  %v771_v19 = vmul.f32 %v7160_v44, %v6968_v21 }
  0xdf   :  { %v5502_v23 = vpop.f32.mrb[1].mxu0  ;;  %5888 = vmatmul.mubr.msk.f32.gmra.mrb[98].mxu0 %vm46_vm1, %v631_v47  ;;  %v7114_v20 = vrot.slane %v7037_v54, %v6233_v24  ;;  %v7165_v47 = vrot.slane %v365_v53, %v6246_v28 }
  0xe0   :  { %v7050_v60 = vpop.f32.mrb[0].mxu1  ;;  %5890 = vmatprep.mubr.msk.f32.mxu0 %vm46_vm1, %v632_v52  ;;  %v642_v52 = vand.u32 2147483647, %v514_v35 }
  0xe1   :  { %8525 = vst [vmem:[#allocation7_spill] sm:$0xff] %v7050_v60  ;;  %v7060_v33 = vpop.f32.mrb[1].mxu1  ;;  %5688 = vmatmul.mubr.msk.f32.gmra.mrb[106].mxu1 %vm46_vm1, %v759_v32  ;;  %v7146_v38 = vrot.slane %v7114_v20, %v6233_v24  ;;  %v516_v32 = vsub.f32 %v7173_v25, %v6968_v21  ;;  %v526_v3 = vsub.f32 %v7082_v9, %v7165_v47 }
  0xe2   :  { %5690 = vmatprep.mubr.msk.f32.mxu1 %vm46_vm1, %v760_v55 }
  0xe3   :  { %5891 = vmatmul.mubr.msk.f32.gmra.mrb[100].mxu0 %vm46_vm1, %v633_v14  ;;  %v7179_v55 = vrot.slane %v7146_v38, %v6246_v28  ;;  %v769_v14 = vmul.f32 %v7128_v27, %v6968_v21 }
  0xe4   :  { %v7076_v40 = vpop.f32.mrb[2].mxu1  ;;  %5893 = vmatprep.mubr.msk.f32.mxu0 %vm46_vm1, %v634_v61  ;;  %v770_v61 = vmul.f32 %v7140_v63, %v6968_v21 }
  0xe5   :  { %v7086_v12 = vpop.f32.mrb[3].mxu1  ;;  %5691 = vmatmul.mubr.msk.f32.gmra.mrb[108].mxu1 %vm46_vm1, %v761_v26 }
  0xe6   :  { %5693 = vmatprep.mubr.msk.f32.mxu1 %vm46_vm1, %v762_v2  ;;  %v643_v2 = vand.u32 2147483647, %v515_v1 }
  0xe7   :  { %5894 = vmatmul.mubr.msk.f32.gmra.mrb[102].mxu0 %vm46_vm1, %v635_v7  ;;  %v7194_v7 = vld [vmem:[%s8502_s1 + $0x78] sm:$0xff] }
  0xe8   :  { %v7102_v39 = vpop.f32.mrb[4].mxu1  ;;  %5896 = vmatprep.mubr.msk.f32.mxu0 %vm46_vm1, %v636_v8  ;;  %v517_v37 = vsub.f32 %v7194_v7, %v6968_v21  ;;  %v773_v53 = vmul.f32 %v7194_v7, %v6968_v21  ;;  %v7235_v21 = vld [vmem:[%s8505_s4] ss:$0 sm:$0xff] }
  0xe9   :  { %8526 = vst [vmem:[#allocation8_spill] sm:$0xff] %v7102_v39  ;;  %v7116_v4 = vpop.f32.mrb[5].mxu1  ;;  %5694 = vmatmul.mubr.msk.f32.gmra.mrb[110].mxu1 %vm46_vm1, %v763_v45  ;;  %v644_v45 = vand.u32 2147483647, %v516_v32 }
  0xea   :  { %5696 = vmatprep.mubr.msk.f32.mxu1 %vm46_vm1, %v764_v46  ;;  %v7205_v46 = vld [vmem:[%s8504_s3] ss:$0 sm:$0xff] }
  0xeb   :  { %5897 = vmatmul.mubr.msk.f32.gmra.mrb[104].mxu0 %vm46_vm1, %v637_v15  ;;  %v518_v15 = vsub.f32 %v6986_v34, %v7165_v47 }
  0xec   :  { %v7134_v31 = vpop.f32.mrb[6].mxu1  ;;  %5899 = vmatprep.mubr.msk.f32.mxu0 %vm46_vm1, %v638_v50 }
  0xed   :  { %v7148_v42 = vpop.f32.mrb[7].mxu1  ;;  %5697 = vmatmul.mubr.msk.f32.gmra.mrb[112].mxu1 %vm46_vm1, %v765_v22  ;;  %v519_v22 = vsub.f32 %v7000_v41, %v7165_v47  ;;  %v646_v32 = vand.u32 2147483647, %v518_v15  ;;  %v521_v15 = vsub.f32 %v7022_v48, %v7165_v47 }
  0xee   :  { %5699 = vmatprep.mubr.msk.f32.mxu1 %vm46_vm1, %v766_v56 }
  0xef   :  { %5900 = vmatmul.mubr.msk.f32.gmra.mrb[106].mxu0 %vm46_vm1, %v639_v57 }
  0xf0   :  { %v7167_v49 = vpop.f32.mrb[8].mxu1  ;;  %5902 = vmatprep.mubr.msk.f32.mxu0 %vm46_vm1, %v640_v62 }
  0xf1   :  { %v7181_v23 = vpop.f32.mrb[9].mxu1  ;;  %5700 = vmatmul.mubr.msk.f32.gmra.mrb[114].mxu1 %vm46_vm1, %v767_v17  ;;  %v645_v17 = vand.u32 2147483647, %v517_v37 }
  0xf2   :  { %8527 = vst [vmem:[#allocation9_spill] sm:$0xff] %v7181_v23  ;;  %v5745_v59 = vpop.f32.mrb[2].mxu0  ;;  %5702 = vmatprep.mubr.msk.f32.mxu1 %vm46_vm1, %v768_v43 }
  0xf3   :  { %v3067_v29 = vadd.f32 %v5745_v59, %v7179_v55  ;;  %v2337_v26 = vpop.f32.mrb[3].mxu0  ;;  %5903 = vmatmul.mubr.msk.f32.gmra.mrb[108].mxu0 %vm46_vm1, %v641_v6  ;;  %v774_v6 = vmul.f32 %v6986_v34, %v7165_v47  ;;  %v520_v59 = vsub.f32 %v7008_v5, %v7165_v47 }
  0xf4   :  { %v7198_v8 = vpop.f32.mrb[10].mxu1  ;;  %v3066_v10 = vadd.f32 %v7179_v55, %v2337_v26  ;;  %5905 = vmatprep.mubr.msk.f32.mxu0 %vm46_vm1, %v642_v52  ;;  %v775_v26 = vmul.f32 %v7000_v41, %v7165_v47 }
  0xf5   :  { %8528 = vst [vmem:[#allocation10_spill] sm:$0xff] %v7198_v8  ;;  %v3195_v18 = vadd.f32 %v7050_v60, %v3067_v29  ;;  %v7210_v50 = vpop.f32.mrb[11].mxu1  ;;  %5703 = vmatmul.mubr.msk.f32.gmra.mrb[116].mxu1 %vm46_vm1, %v769_v14 }
  0xf6   :  { %v3194_v56 = vadd.f32 %v3066_v10, %v7060_v33  ;;  %v5748_v57 = vpop.f32.mrb[4].mxu0  ;;  %5705 = vmatprep.mubr.msk.f32.mxu1 %vm46_vm1, %v770_v61 }
  0xf7   :  { %v3069_v62 = vadd.f32 %v5748_v57, %v7179_v55  ;;  %v2347_v35 = vpop.f32.mrb[5].mxu0  ;;  %5906 = vmatmul.mubr.msk.f32.gmra.mrb[110].mxu0 %vm46_vm1, %v643_v2  ;;  %v3330_v43 = vadd.f32 %v7205_v46, %v3195_v18  ;;  %v647_v2 = vand.u32 2147483647, %v519_v22  ;;  %v522_v18 = vsub.f32 %v7030_v11, %v7165_v47 }
  0xf8   :  { %v7228_v1 = vpop.f32.mrb[12].mxu1  ;;  %v3068_v52 = vadd.f32 %v7179_v55, %v2347_v35  ;;  %5908 = vmatprep.mubr.msk.f32.mxu0 %vm46_vm1, %v644_v45  ;;  %v3329_v14 = vadd.f32 %v7205_v46, %v3194_v56  ;;  %v776_v45 = vmul.f32 %v7008_v5, %v7165_v47 }
  0xf9   :  { %v3197_v61 = vadd.f32 %v7076_v40, %v3069_v62  ;;  %v7241_v34 = vpop.f32.mrb[13].mxu1  ;;  %5706 = vmatmul.mubr.msk.f32.gmra.mrb[118].mxu1 %vm46_vm1, %v771_v19  ;;  %v3458_v29 = vmax.f32 %v3330_v43, 0.0  ;;  %v648_v62 = vand.u32 2147483647, %v520_v59  ;;  %v523_v43 = vsub.f32 %v7046_v13, %v7165_v47 }
  0xfa   :  { %v3196_v37 = vadd.f32 %v3068_v52, %v7086_v12  ;;  %v5751_v10 = vpop.f32.mrb[6].mxu0  ;;  %5708 = vmatprep.mubr.msk.f32.mxu1 %vm46_vm1, %v772_v30  ;;  %v3457_v22 = vmax.f32 %v3329_v14, 0.0 }
  0xfb   :  { %v3071_v19 = vadd.f32 %v5751_v10, %v7179_v55  ;;  %v2357_v56 = vpop.f32.mrb[7].mxu0  ;;  %5909 = vmatmul.mubr.msk.f32.gmra.mrb[112].mxu0 %vm46_vm1, %v645_v17  ;;  %v3593_v41 = vmul.f32 %v7235_v21, %v3458_v29  ;;  %v3332_v57 = vadd.f32 %v7205_v46, %v3197_v61  ;;  %v777_v61 = vmul.f32 %v7022_v48, %v7165_v47 }
  0xfc   :  { %v7258_v30 = vpop.f32.mrb[14].mxu1  ;;  %v3070_v5 = vadd.f32 %v7179_v55, %v2357_v56  ;;  %5911 = vmatprep.mubr.msk.f32.mxu0 %vm46_vm1, %v646_v32  ;;  %v3331_v35 = vadd.f32 %v7205_v46, %v3196_v37  ;;  %v524_v32 = vsub.f32 %v7056_v0, %v7165_v47  ;;  %v649_v37 = vand.u32 2147483647, %v521_v15 }
  0xfd   :  { %v3199_v52 = vadd.f32 %v7102_v39, %v3071_v19  ;;  %v7266_v17 = vpop.f32.mrb[15].mxu1  ;;  %5709 = vmatmul.mubr.msk.f32.gmra.mrb[120].mxu1 %vm46_vm1, %v773_v53  ;;  %3722 = vadd.xlane.f32.xlu0 %v3593_v41  ;;  %v3460_v14 = vmax.f32 %v3332_v57, 0.0  ;;  %v778_v10 = vmul.f32 %v7030_v11, %v7165_v47  ;;  %v650_v19 = vand.u32 2147483647, %v522_v18 }
  0xfe   :  { %8529 = vst [vmem:[#allocation11_spill] sm:$0xff] %v7266_v17  ;;  %v3198_v59 = vadd.f32 %v3070_v5, %v7116_v4  ;;  %5711 = vmatprep.mubr.msk.f32.mxu1 %vm46_vm1, %v774_v6  ;;  %v5754_v29 = vpop.f32.mrb[8].mxu0  ;;  %v3592_v53 = vmul.f32 %v7235_v21, %v3457_v22  ;;  %v7282_v41 = vmul.f32 %v7046_v13, %v7165_v47  ;;  %v3459_v15 = vmax.f32 %v3331_v35, 0.0 }
  0xff   :  { %v2367_v56 = vpop.f32.mrb[9].mxu0  ;;  %5912 = vmatmul.mubr.msk.f32.gmra.mrb[114].mxu0 %vm46_vm1, %v647_v2  ;;  %v3595_v48 = vmul.f32 %v7235_v21, %v3460_v14  ;;  %v525_v6 = vsub.f32 %v7072_v36, %v7165_v47  ;;  %v651_v18 = vand.u32 2147483647, %v523_v43  ;;  %v3334_v2 = vadd.f32 %v7205_v46, %v3199_v52 }
 0x100   :  { %v5554_v57 = vpop.f32.mrb[16].mxu1  ;;  %5914 = vmatprep.mubr.msk.f32.mxu0 %vm46_vm1, %v648_v62  ;;  %v3333_v11 = vadd.f32 %v7205_v46, %v3198_v59  ;;  %v780_v13 = vmul.f32 %v7056_v0, %v7165_v47  ;;  %v652_v14 = vand.u32 2147483647, %v524_v32  ;;  %v7297_v43 = vmul.f32 %v7072_v36, %v7165_v47 }
 0x101   :  { %v2373_v5 = vadd.f32 %v5754_v29, %v5554_v57  ;;  %v1278_v22 = vpop.f32.mrb[17].mxu1  ;;  %5712 = vmatmul.mubr.msk.f32.gmra.mrb[122].mxu1 %vm46_vm1, %v775_v26  ;;  %3720 = vadd.xlane.f32.xlu0 %v3592_v53  ;;  %v527_v26 = vsub.f32 %v7098_v58, %v7165_v47  ;;  %v653_v32 = vand.u32 2147483647, %v525_v6  ;;  %v7305_v59 = vmul.f32 %v7082_v9, %v7165_v47 }
 0x102   :  { %v2368_v16 = vadd.f32 %v2367_v56, %v1278_v22  ;;  %3726 = vadd.xlane.f32.xlu1 %v3595_v48  ;;  %5714 = vmatprep.mubr.msk.f32.mxu1 %vm46_vm1, %v776_v45  ;;  %v5757_v62 = vpop.f32.mrb[10].mxu0  ;;  %v3461_v35 = vmax.f32 %v3333_v11, 0.0  ;;  %v528_v45 = vsub.f32 %v7108_v51, %v7165_v47  ;;  %v3594_v56 = vmul.f32 %v7235_v21, %v3459_v15 }
 0x103   :  { %v3073_v52 = vadd.f32 %v7179_v55, %v2373_v5  ;;  %v2377_v0 = vpop.f32.mrb[11].mxu0  ;;  %5915 = vmatmul.mubr.msk.f32.gmra.mrb[116].mxu0 %vm46_vm1, %v649_v37  ;;  %v3462_v48 = vmax.f32 %v3334_v2, 0.0  ;;  %v654_v9 = vand.u32 2147483647, %v526_v3  ;;  %v529_v11 = vsub.f32 %v7128_v27, %v7165_v47 }
 0x104   :  { %v3072_v29 = vadd.f32 %v7179_v55, %v2368_v16  ;;  %v5557_v36 = vpop.f32.mrb[18].mxu1  ;;  %v3596_v53 = vmul.f32 %v7235_v21, %v3461_v35  ;;  %5917 = vmatprep.mubr.msk.f32.mxu0 %vm46_vm1, %v650_v19  ;;  %v7320_v19 = vmul.f32 %v7098_v58, %v7165_v47  ;;  %v655_v2 = vand.u32 2147483647, %v527_v26 }
 0x105   :  { %v3201_v37 = vadd.f32 %v7134_v31, %v3073_v52  ;;  %v2383_v6 = vadd.f32 %v5757_v62, %v5557_v36  ;;  %v1288_v57 = vpop.f32.mrb[19].mxu1  ;;  %5715 = vmatmul.mubr.msk.f32.gmra.mrb[124].mxu1 %vm46_vm1, %v777_v61  ;;  %v7328_v62 = vmul.f32 %v7108_v51, %v7165_v47  ;;  %v656_v35 = vand.u32 2147483647, %v528_v45 }
 0x106   :  { %v3200_v16 = vadd.f32 %v3072_v29, %v7148_v42  ;;  %v2378_v5 = vadd.f32 %v2377_v0, %v1288_v57  ;;  %3724 = vadd.xlane.f32.xlu1 %v3594_v56  ;;  %3728 = vadd.xlane.f32.xlu0 %v3596_v53  ;;  %v5760_v15 = vpop.f32.mrb[12].mxu0  ;;  %v3597_v58 = vmul.f32 %v7235_v21, %v3462_v48  ;;  %v657_v45 = vand.u32 2147483647, %v529_v11 }
 0x107   :  { %v3075_v22 = vadd.f32 %v7179_v55, %v2383_v6  ;;  %5717 = vmatprep.mubr.msk.f32.mxu1 %vm46_vm1, %v778_v10  ;;  %v2387_v61 = vpop.f32.mrb[13].mxu0  ;;  %5918 = vmatmul.mubr.msk.f32.gmra.mrb[118].mxu0 %vm46_vm1, %v651_v18  ;;  %v3336_v3 = vadd.f32 %v7205_v46, %v3201_v37  ;;  %v7336_v10 = vmul.f32 %v7128_v27, %v7165_v47 }
 0x108   :  { %v3074_v52 = vadd.f32 %v7179_v55, %v2378_v5  ;;  %v5560_v0 = vpop.f32.mrb[20].mxu1  ;;  %5920 = vmatprep.mubr.msk.f32.mxu0 %vm46_vm1, %v652_v14  ;;  %v3335_v26 = vadd.f32 %v7205_v46, %v3200_v16  ;;  %v530_v27 = vsub.f32 %v7140_v63, %v7165_v47  ;;  %v531_v11 = vsub.f32 %v7160_v44, %v7165_v47 }
 0x109   :  { %v3203_v18 = vadd.f32 %v7167_v49, %v3075_v22  ;;  %v2393_v29 = vadd.f32 %v5760_v15, %v5560_v0  ;;  %v1298_v36 = vpop.f32.mrb[21].mxu1  ;;  %5718 = vmatmul.mubr.msk.f32.gmra.mrb[126].mxu1 %vm46_vm1, %v7282_v41  ;;  %v3464_v51 = vmax.f32 %v3336_v3, 0.0  ;;  %v7357_v22 = vmul.f32 %v7140_v63, %v7165_v47 }
 0x10a   :  { %v3202_v56 = vadd.f32 %v3074_v52, %v7181_v23  ;;  %v2388_v53 = vadd.f32 %v2387_v61, %v1298_v36  ;;  %3730 = vadd.xlane.f32.xlu1 %v3597_v58  ;;  %5720 = vmatprep.mubr.msk.f32.mxu1 %vm46_vm1, %v780_v13  ;;  %v5763_v14 = vpop.f32.mrb[14].mxu0  ;;  %v3463_v48 = vmax.f32 %v3335_v26, 0.0  ;;  %v7367_v63 = vmul.f32 %v7160_v44, %v7165_v47 }
 0x10b   :  { %v3077_v37 = vadd.f32 %v7179_v55, %v2393_v29  ;;  %v2397_v6 = vpop.f32.mrb[15].mxu0  ;;  %5921 = vmatmul.mubr.msk.f32.gmra.mrb[120].mxu0 %vm46_vm1, %v653_v32  ;;  %v3599_v41 = vmul.f32 %v7235_v21, %v3464_v51  ;;  %v3338_v57 = vadd.f32 %v7205_v46, %v3203_v18  ;;  %v2992_v32 = vcombine.high %v7114_v20, %v7114_v20 }
 0x10c   :  { %v3076_v16 = vadd.f32 %v7179_v55, %v2388_v53  ;;  %v5563_v13 = vpop.f32.mrb[22].mxu1  ;;  %v3598_v5 = vmul.f32 %v7235_v21, %v3463_v48  ;;  %5923 = vmatprep.mubr.msk.f32.mxu0 %vm46_vm1, %v654_v9  ;;  %v3337_v15 = vadd.f32 %v7205_v46, %v3202_v56  ;;  %v658_v51 = vand.u32 2147483647, %v530_v27 }
 0x10d   :  { %v3205_v61 = vadd.f32 %v7198_v8, %v3077_v37  ;;  %v2403_v3 = vadd.f32 %v5763_v14, %v5563_v13  ;;  %v1308_v52 = vpop.f32.mrb[23].mxu1  ;;  %5721 = vmatmul.mubr.msk.f32.gmra.mrb[128].mxu1 %vm46_vm1, %v7297_v43  ;;  %v3466_v0 = vmax.f32 %v3338_v57, 0.0  ;;  %v7382_v48 = vrot.slane %v2992_v32, %v6233_v24 }
 0x10e   :  { %v3204_v58 = vadd.f32 %v3076_v16, %v7210_v50  ;;  %v2398_v9 = vadd.f32 %v2397_v6, %v1308_v52  ;;  %3734 = vadd.xlane.f32.xlu1 %v3599_v41  ;;  %3732 = vadd.xlane.f32.xlu0 %v3598_v5  ;;  %v5766_v26 = vpop.f32.mrb[16].mxu0  ;;  %v3465_v18 = vmax.f32 %v3337_v15, 0.0  ;;  %v533_v13 = vsub.f32 %v7194_v7, %v7165_v47 }
 0x10f   :  { %v3079_v20 = vadd.f32 %v7179_v55, %v2403_v3  ;;  %5723 = vmatprep.mubr.msk.f32.mxu1 %vm46_vm1, %v7305_v59  ;;  %v2407_v29 = vpop.f32.mrb[17].mxu0  ;;  %5924 = vmatmul.mubr.msk.f32.gmra.mrb[122].mxu0 %vm46_vm1, %v655_v2  ;;  %v3601_v43 = vmul.f32 %v7235_v21, %v3466_v0  ;;  %v3340_v36 = vadd.f32 %v7205_v46, %v3205_v61  ;;  %v659_v32 = vand.u32 2147483647, %v531_v11 }
 0x110   :  { %v3078_v56 = vadd.f32 %v7179_v55, %v2398_v9  ;;  %v5566_v53 = vpop.f32.mrb[24].mxu1  ;;  %v3600_v14 = vmul.f32 %v7235_v21, %v3465_v18  ;;  %5926 = vmatprep.mubr.msk.f32.mxu0 %vm46_vm1, %v656_v35  ;;  %v3339_v44 = vadd.f32 %v7205_v46, %v3204_v58  ;;  %v532_v59 = vsub.f32 %v7173_v25, %v7165_v47 }
 0x111   :  { %v3207_v2 = vadd.f32 %v7228_v1, %v3079_v20  ;;  %v2413_v37 = vadd.f32 %v5766_v26, %v5566_v53  ;;  %v1318_v6 = vpop.f32.mrb[25].mxu1  ;;  %5724 = vmatmul.mubr.msk.f32.gmra.mrb[130].mxu1 %vm46_vm1, %v7320_v19  ;;  %v3468_v27 = vmax.f32 %v3340_v36, 0.0  ;;  %v788_v36 = vmul.f32 %v7173_v25, %v7165_v47 }
 0x112   :  { %v3206_v41 = vadd.f32 %v3078_v56, %v7241_v34  ;;  %v2408_v57 = vadd.f32 %v2407_v29, %v1318_v6  ;;  %3738 = vadd.xlane.f32.xlu1 %v3601_v43  ;;  %3736 = vadd.xlane.f32.xlu0 %v3600_v14  ;;  %v5769_v35 = vpop.f32.mrb[18].mxu0  ;;  %v3467_v16 = vmax.f32 %v3339_v44, 0.0  ;;  %v660_v9 = vand.u32 2147483647, %v532_v59 }
 0x113   :  { %v3081_v5 = vadd.f32 %v7179_v55, %v2413_v37  ;;  %5726 = vmatprep.mubr.msk.f32.mxu1 %vm46_vm1, %v7328_v62  ;;  %v2417_v15 = vpop.f32.mrb[19].mxu0  ;;  %5927 = vmatmul.mubr.msk.f32.gmra.mrb[124].mxu0 %vm46_vm1, %v657_v45  ;;  %v3603_v19 = vmul.f32 %v7235_v21, %v3468_v27  ;;  %v3342_v61 = vadd.f32 %v7205_v46, %v3207_v2  ;;  %v661_v53 = vand.u32 2147483647, %v533_v13 }
 0x114   :  { %v3080_v3 = vadd.f32 %v7179_v55, %v2408_v57  ;;  %v5569_v52 = vpop.f32.mrb[26].mxu1  ;;  %v3602_v0 = vmul.f32 %v7235_v21, %v3467_v16  ;;  %5929 = vmatprep.mubr.msk.f32.mxu0 %vm46_vm1, %v658_v51  ;;  %v3341_v58 = vadd.f32 %v7205_v46, %v3206_v41  ;;  %v7402_v62 = vrot.slane %v7382_v48, %v6246_v28 }
 0x115   :  { %v3209_v45 = vadd.f32 %v7258_v30, %v3081_v5  ;;  %v2423_v26 = vadd.f32 %v5769_v35, %v5569_v52  ;;  %v1328_v11 = vpop.f32.mrb[27].mxu1  ;;  %5727 = vmatmul.mubr.msk.f32.gmra.mrb[132].mxu1 %vm46_vm1, %v7336_v10  ;;  %v3470_v55 = vmax.f32 %v3342_v61, 0.0  ;;  %v789_v27 = vmul.f32 %v7194_v7, %v7165_v47 }
 0x116   :  { %v3208_v18 = vadd.f32 %v3080_v3, %v7266_v17  ;;  %v2418_v20 = vadd.f32 %v2417_v15, %v1328_v11  ;;  %3742 = vadd.xlane.f32.xlu1 %v3603_v19  ;;  %3740 = vadd.xlane.f32.xlu0 %v3602_v0  ;;  %v5772_v29 = vpop.f32.mrb[20].mxu0  ;;  %v3469_v43 = vmax.f32 %v3341_v58, 0.0 }
 0x117   :  { %v3083_v51 = vadd.f32 %v7402_v62, %v2423_v26  ;;  %5729 = vmatprep.mubr.msk.f32.mxu1 %vm46_vm1, %v7357_v22  ;;  %v2427_v56 = vpop.f32.mrb[21].mxu0  ;;  %5930 = vmatmul.mubr.msk.f32.gmra.mrb[126].mxu0 %vm46_vm1, %v659_v32  ;;  %v3605_v10 = vmul.f32 %v7235_v21, %v3470_v55  ;;  %v3344_v14 = vadd.f32 %v7205_v46, %v3209_v45 }
 0x118   :  { %v3082_v44 = vadd.f32 %v7402_v62, %v2418_v20  ;;  %v5572_v59 = vpop.f32.mrb[28].mxu1  ;;  %v3604_v2 = vmul.f32 %v7235_v21, %v3469_v43  ;;  %5932 = vmatprep.mubr.msk.f32.mxu0 %vm46_vm1, %v660_v9  ;;  %v3343_v25 = vadd.f32 %v7205_v46, %v3208_v18 }
 0x119   :  { %v3211_v37 = vadd.f32 %v7050_v60, %v3083_v51  ;;  %v2433_v22 = vadd.f32 %v5772_v29, %v5572_v59  ;;  %v1338_v6 = vpop.f32.mrb[29].mxu1  ;;  %5730 = vmatmul.mubr.msk.f32.gmra.mrb[134].mxu1 %vm46_vm1, %v7367_v63  ;;  %v3472_v41 = vmax.f32 %v3344_v14, 0.0 }
 0x11a   :  { %v3210_v57 = vadd.f32 %v3082_v44, %v7060_v33  ;;  %v2428_v35 = vadd.f32 %v2427_v56, %v1338_v6  ;;  %3746 = vadd.xlane.f32.xlu1 %v3605_v10  ;;  %3744 = vadd.xlane.f32.xlu0 %v3604_v2  ;;  %v5775_v16 = vpop.f32.mrb[22].mxu0  ;;  %v3471_v13 = vmax.f32 %v3343_v25, 0.0 }
 0x11b   :  { %v3085_v5 = vadd.f32 %v7402_v62, %v2433_v22  ;;  %5732 = vmatprep.mubr.msk.f32.mxu1 %vm46_vm1, %v788_v36  ;;  %v2437_v15 = vpop.f32.mrb[23].mxu0  ;;  %5933 = vmatmul.mubr.msk.f32.gmra.mrb[128].mxu0 %vm46_vm1, %v661_v53  ;;  %v3607_v63 = vmul.f32 %v7235_v21, %v3472_v41  ;;  %v3346_v19 = vadd.f32 %v7205_v46, %v3211_v37 }
 0x11c   :  { %v3084_v47 = vadd.f32 %v7402_v62, %v2428_v35  ;;  %v5575_v7 = vpop.f32.mrb[30].mxu1  ;;  %v3606_v32 = vmul.f32 %v7235_v21, %v3471_v13  ;;  %v3345_v61 = vadd.f32 %v7205_v46, %v3210_v57 }
 0x11d   :  { %v3213_v3 = vadd.f32 %v7076_v40, %v3085_v5  ;;  %v2443_v52 = vadd.f32 %v5775_v16, %v5575_v7  ;;  %v1348_v0 = vpop.f32.mrb[31].mxu1  ;;  %5733 = vmatmul.mubr.msk.f32.gmra.mrb[136].mxu1 %vm46_vm1, %v789_v27  ;;  %v3474_v58 = vmax.f32 %v3346_v19, 0.0  ;;  %vm4898_vm1 = vcmask 1041409  }
 0x11e   :  { %v3212_v9 = vadd.f32 %v3084_v47, %v7086_v12  ;;  %v2438_v45 = vadd.f32 %v2437_v15, %v1348_v0  ;;  %3750 = vadd.xlane.f32.xlu1 %v3607_v63  ;;  %3748 = vadd.xlane.f32.xlu0 %v3606_v32  ;;  %v5778_v26 = vpop.f32.mrb[24].mxu0  ;;  %v3473_v11 = vmax.f32 %v3345_v61, 0.0 }
 0x11f   :  { %v3087_v55 = vadd.f32 %v7402_v62, %v2443_v52  ;;  %v2447_v18 = vpop.f32.mrb[25].mxu0  ;;  %v3609_v20 = vmul.f32 %v7235_v21, %v3474_v58  ;;  %v3348_v29 = vadd.f32 %v7205_v46, %v3213_v3 }
 0x120   :  { %v3086_v43 = vadd.f32 %v7402_v62, %v2438_v45  ;;  %v5578_v36 = vpop.f32.mrb[32].mxu1  ;;  %v3608_v51 = vmul.f32 %v7235_v21, %v3473_v11  ;;  %v3347_v56 = vadd.f32 %v7205_v46, %v3212_v9 }
 0x121   :  { %v3215_v10 = vadd.f32 %v7102_v39, %v3087_v55  ;;  %v2453_v53 = vadd.f32 %v5778_v26, %v5578_v36  ;;  %v1358_v14 = vpop.f32.mrb[33].mxu1  ;;  %v3476_v44 = vmax.f32 %v3348_v29, 0.0 }
 0x122   :  { %v3214_v59 = vadd.f32 %v3086_v43, %v7116_v4  ;;  %v2448_v2 = vadd.f32 %v2447_v18, %v1358_v14  ;;  %3754 = vadd.xlane.f32.xlu1 %v3609_v20  ;;  %3752 = vadd.xlane.f32.xlu0 %v3608_v51  ;;  %v5781_v25 = vpop.f32.mrb[26].mxu0  ;;  %v3475_v37 = vmax.f32 %v3347_v56, 0.0 }
 0x123   :  { %v3089_v22 = vadd.f32 %v7402_v62, %v2453_v53  ;;  %v2457_v6 = vpop.f32.mrb[27].mxu0  ;;  %v3611_v27 = vmul.f32 %v7235_v21, %v3476_v44  ;;  %v3350_v41 = vadd.f32 %v7205_v46, %v3215_v10 }
 0x124   :  { %v3088_v57 = vadd.f32 %v7402_v62, %v2448_v2  ;;  %v5581_v35 = vpop.f32.mrb[34].mxu1  ;;  %v3610_v16 = vmul.f32 %v7235_v21, %v3475_v37  ;;  %v3349_v13 = vadd.f32 %v7205_v46, %v3214_v59 }
 0x125   :  { %v3217_v5 = vadd.f32 %v7134_v31, %v3089_v22  ;;  %v2463_v15 = vadd.f32 %v5781_v25, %v5581_v35  ;;  %v1368_v63 = vpop.f32.mrb[35].mxu1  ;;  %v3478_v19 = vmax.f32 %v3350_v41, 0.0 }
 0x126   :  { %v3216_v47 = vadd.f32 %v3088_v57, %v7148_v42  ;;  %v2458_v7 = vadd.f32 %v2457_v6, %v1368_v63  ;;  %3758 = vadd.xlane.f32.xlu1 %v3611_v27  ;;  %3756 = vadd.xlane.f32.xlu0 %v3610_v16  ;;  %v5784_v32 = vpop.f32.mrb[28].mxu0  ;;  %v3477_v61 = vmax.f32 %v3349_v13, 0.0 }
 0x127   :  { %v3091_v3 = vadd.f32 %v7402_v62, %v2463_v15  ;;  %v2467_v52 = vpop.f32.mrb[29].mxu0  ;;  %v3613_v0 = vmul.f32 %v7235_v21, %v3478_v19  ;;  %v3352_v58 = vadd.f32 %v7205_v46, %v3217_v5 }
 0x128   :  { %v3090_v9 = vadd.f32 %v7402_v62, %v2458_v7  ;;  %v5584_v45 = vpop.f32.mrb[36].mxu1  ;;  %v3612_v26 = vmul.f32 %v7235_v21, %v3477_v61  ;;  %v3351_v11 = vadd.f32 %v7205_v46, %v3216_v47 }
 0x129   :  { %v3219_v55 = vadd.f32 %v7167_v49, %v3091_v3  ;;  %v2473_v18 = vadd.f32 %v5784_v32, %v5584_v45  ;;  %v1378_v20 = vpop.f32.mrb[37].mxu1  ;;  %v3480_v29 = vmax.f32 %v3352_v58, 0.0  ;;  %v3022_v3 = vcombine.high %v7146_v38, %v7146_v38 }
 0x12a   :  { %v3218_v43 = vadd.f32 %v3090_v9, %v7181_v23  ;;  %v2468_v36 = vadd.f32 %v2467_v52, %v1378_v20  ;;  %3762 = vadd.xlane.f32.xlu1 %v3613_v0  ;;  %3760 = vadd.xlane.f32.xlu0 %v3612_v26  ;;  %v5787_v51 = vpop.f32.mrb[30].mxu0  ;;  %v3479_v56 = vmax.f32 %v3351_v11, 0.0 }
 0x12b   :  { %v3093_v10 = vadd.f32 %v7402_v62, %v2473_v18  ;;  %v2477_v53 = vpop.f32.mrb[31].mxu0  ;;  %v3615_v14 = vmul.f32 %v7235_v21, %v3480_v29  ;;  %v3354_v44 = vadd.f32 %v7205_v46, %v3219_v55 }
 0x12c   :  { %v3092_v59 = vadd.f32 %v7402_v62, %v2468_v36  ;;  %v5587_v2 = vpop.f32.mrb[38].mxu1  ;;  %v3614_v25 = vmul.f32 %v7235_v21, %v3479_v56  ;;  %v3353_v37 = vadd.f32 %v7205_v46, %v3218_v43 }
 0x12d   :  { %v3221_v22 = vadd.f32 %v7198_v8, %v3093_v10  ;;  %v2483_v6 = vadd.f32 %v5787_v51, %v5587_v2  ;;  %v1388_v27 = vpop.f32.mrb[39].mxu1  ;;  %v3482_v41 = vmax.f32 %v3354_v44, 0.0  ;;  %v7486_v10 = vrot.slane %v3022_v3, %v6246_v28 }
 0x12e   :  { %v3220_v57 = vadd.f32 %v3092_v59, %v7210_v50  ;;  %v2478_v35 = vadd.f32 %v2477_v53, %v1388_v27  ;;  %3766 = vadd.xlane.f32.xlu1 %v3615_v14  ;;  %3764 = vadd.xlane.f32.xlu0 %v3614_v25  ;;  %v5790_v16 = vpop.f32.mrb[32].mxu0  ;;  %v3481_v13 = vmax.f32 %v3353_v37, 0.0 }
 0x12f   :  { %v3095_v5 = vadd.f32 %v7402_v62, %v2483_v6  ;;  %v2487_v15 = vpop.f32.mrb[33].mxu0  ;;  %v3617_v63 = vmul.f32 %v7235_v21, %v3482_v41  ;;  %v3356_v19 = vadd.f32 %v7205_v46, %v3221_v22 }
 0x130   :  { %v3094_v47 = vadd.f32 %v7402_v62, %v2478_v35  ;;  %v5590_v7 = vpop.f32.mrb[40].mxu1  ;;  %v3616_v32 = vmul.f32 %v7235_v21, %v3481_v13  ;;  %v3355_v61 = vadd.f32 %v7205_v46, %v3220_v57 }
 0x131   :  { %v3223_v52 = vadd.f32 %v7228_v1, %v3095_v5  ;;  %v2493_v0 = vadd.f32 %v5790_v16, %v5590_v7  ;;  %v1398_v58 = vpop.f32.mrb[41].mxu1  ;;  %v3484_v9 = vmax.f32 %v3356_v19, 0.0 }
 0x132   :  { %v3222_v45 = vadd.f32 %v3094_v47, %v7241_v34  ;;  %v2488_v26 = vadd.f32 %v2487_v15, %v1398_v58  ;;  %3770 = vadd.xlane.f32.xlu1 %v3617_v63  ;;  %3768 = vadd.xlane.f32.xlu0 %v3616_v32  ;;  %v5793_v11 = vpop.f32.mrb[34].mxu0  ;;  %v3483_v55 = vmax.f32 %v3355_v61, 0.0 }
 0x133   :  { %v3097_v18 = vadd.f32 %v7402_v62, %v2493_v0  ;;  %v2497_v20 = vpop.f32.mrb[35].mxu0  ;;  %v3619_v29 = vmul.f32 %v7235_v21, %v3484_v9  ;;  %v3358_v43 = vadd.f32 %v7205_v46, %v3223_v52 }
 0x134   :  { %v3096_v38 = vadd.f32 %v7402_v62, %v2488_v26  ;;  %v5593_v36 = vpop.f32.mrb[42].mxu1  ;;  %v3618_v51 = vmul.f32 %v7235_v21, %v3483_v55  ;;  %v3357_v56 = vadd.f32 %v7205_v46, %v3222_v45 }
 0x135   :  { %v3225_v53 = vadd.f32 %v7258_v30, %v3097_v18  ;;  %v2503_v14 = vadd.f32 %v5793_v11, %v5593_v36  ;;  %v1408_v44 = vpop.f32.mrb[43].mxu1  ;;  %v3486_v59 = vmax.f32 %v3358_v43, 0.0 }
 0x136   :  { %v3224_v2 = vadd.f32 %v3096_v38, %v7266_v17  ;;  %v2498_v25 = vadd.f32 %v2497_v20, %v1408_v44  ;;  %3774 = vadd.xlane.f32.xlu1 %v3619_v29  ;;  %3772 = vadd.xlane.f32.xlu0 %v3618_v51  ;;  %v5796_v37 = vpop.f32.mrb[36].mxu0  ;;  %v3485_v62 = vmax.f32 %v3357_v56, 0.0 }
 0x137   :  { %v3099_v22 = vadd.f32 %v7486_v10, %v2503_v14  ;;  %v2507_v6 = vpop.f32.mrb[37].mxu0  ;;  %v3621_v27 = vmul.f32 %v7235_v21, %v3486_v59  ;;  %v3360_v41 = vadd.f32 %v7205_v46, %v3225_v53 }
 0x138   :  { %v3098_v57 = vadd.f32 %v7486_v10, %v2498_v25  ;;  %v5596_v35 = vpop.f32.mrb[44].mxu1  ;;  %v3620_v16 = vmul.f32 %v7235_v21, %v3485_v62  ;;  %v3359_v13 = vadd.f32 %v7205_v46, %v3224_v2 }
 0x139   :  { %v3227_v5 = vadd.f32 %v7050_v60, %v3099_v22  ;;  %v2513_v15 = vadd.f32 %v5796_v37, %v5596_v35  ;;  %v1418_v63 = vpop.f32.mrb[45].mxu1  ;;  %v3488_v19 = vmax.f32 %v3360_v41, 0.0 }
 0x13a   :  { %v3226_v47 = vadd.f32 %v3098_v57, %v7060_v33  ;;  %v2508_v7 = vadd.f32 %v2507_v6, %v1418_v63  ;;  %3778 = vadd.xlane.f32.xlu1 %v3621_v27  ;;  %3776 = vadd.xlane.f32.xlu0 %v3620_v16  ;;  %v5799_v32 = vpop.f32.mrb[38].mxu0  ;;  %v3487_v61 = vmax.f32 %v3359_v13, 0.0 }
 0x13b   :  { %v3101_v3 = vadd.f32 %v7486_v10, %v2513_v15  ;;  %v2517_v52 = vpop.f32.mrb[39].mxu0  ;;  %v3623_v0 = vmul.f32 %v7235_v21, %v3488_v19  ;;  %v3362_v58 = vadd.f32 %v7205_v46, %v3227_v5 }
 0x13c   :  { %v3100_v9 = vadd.f32 %v7486_v10, %v2508_v7  ;;  %v5599_v45 = vpop.f32.mrb[46].mxu1  ;;  %v3622_v26 = vmul.f32 %v7235_v21, %v3487_v61  ;;  %v3361_v11 = vadd.f32 %v7205_v46, %v3226_v47 }
 0x13d   :  { %v3229_v55 = vadd.f32 %v7076_v40, %v3101_v3  ;;  %v2523_v18 = vadd.f32 %v5799_v32, %v5599_v45  ;;  %v1428_v20 = vpop.f32.mrb[47].mxu1  ;;  %v3490_v29 = vmax.f32 %v3362_v58, 0.0 }
 0x13e   :  { %v3228_v43 = vadd.f32 %v3100_v9, %v7086_v12  ;;  %v2518_v38 = vadd.f32 %v2517_v52, %v1428_v20  ;;  %3782 = vadd.xlane.f32.xlu1 %v3623_v0  ;;  %3780 = vadd.xlane.f32.xlu0 %v3622_v26  ;;  %v5802_v36 = vpop.f32.mrb[40].mxu0  ;;  %v3489_v51 = vmax.f32 %v3361_v11, 0.0 }
 0x13f   :  { %v3103_v56 = vadd.f32 %v7486_v10, %v2523_v18  ;;  %v2527_v53 = vpop.f32.mrb[41].mxu0  ;;  %v3625_v14 = vmul.f32 %v7235_v21, %v3490_v29  ;;  %v3364_v44 = vadd.f32 %v7205_v46, %v3229_v55 }
 0x140   :  { %v3102_v59 = vadd.f32 %v7486_v10, %v2518_v38  ;;  %v5602_v2 = vpop.f32.mrb[48].mxu1  ;;  %v3624_v25 = vmul.f32 %v7235_v21, %v3489_v51  ;;  %v3363_v37 = vadd.f32 %v7205_v46, %v3228_v43 }
 0x141   :  { %v3231_v62 = vadd.f32 %v7102_v39, %v3103_v56  ;;  %v2533_v22 = vadd.f32 %v5802_v36, %v5602_v2  ;;  %v1438_v6 = vpop.f32.mrb[49].mxu1  ;;  %v3492_v27 = vmax.f32 %v3364_v44, 0.0 }
 0x142   :  { %v3230_v41 = vadd.f32 %v3102_v59, %v7116_v4  ;;  %v2528_v57 = vadd.f32 %v2527_v53, %v1438_v6  ;;  %3786 = vadd.xlane.f32.xlu1 %v3625_v14  ;;  %3784 = vadd.xlane.f32.xlu0 %v3624_v25  ;;  %v5805_v35 = vpop.f32.mrb[42].mxu0  ;;  %v3491_v16 = vmax.f32 %v3363_v37, 0.0 }
 0x143   :  { %v3105_v13 = vadd.f32 %v7486_v10, %v2533_v22  ;;  %v2537_v5 = vpop.f32.mrb[43].mxu0  ;;  %v3627_v15 = vmul.f32 %v7235_v21, %v3492_v27  ;;  %v3366_v63 = vadd.f32 %v7205_v46, %v3231_v62 }
 0x144   :  { %v3104_v19 = vadd.f32 %v7486_v10, %v2528_v57  ;;  %v5605_v47 = vpop.f32.mrb[50].mxu1  ;;  %v3626_v7 = vmul.f32 %v7235_v21, %v3491_v16  ;;  %v3365_v32 = vadd.f32 %v7205_v46, %v3230_v41 }
 0x145   :  { %v3233_v61 = vadd.f32 %v7134_v31, %v3105_v13  ;;  %v2543_v3 = vadd.f32 %v5805_v35, %v5605_v47  ;;  %v1448_v52 = vpop.f32.mrb[51].mxu1  ;;  %v3494_v0 = vmax.f32 %v3366_v63, 0.0 }
 0x146   :  { %v3232_v58 = vadd.f32 %v3104_v19, %v7148_v42  ;;  %v2538_v9 = vadd.f32 %v2537_v5, %v1448_v52  ;;  %3790 = vadd.xlane.f32.xlu1 %v3627_v15  ;;  %3788 = vadd.xlane.f32.xlu0 %v3626_v7  ;;  %v5808_v45 = vpop.f32.mrb[44].mxu0  ;;  %v3493_v26 = vmax.f32 %v3365_v32, 0.0 }
 0x147   :  { %v3107_v11 = vadd.f32 %v7486_v10, %v2543_v3  ;;  %v2547_v55 = vpop.f32.mrb[45].mxu0  ;;  %v3629_v18 = vmul.f32 %v7235_v21, %v3494_v0  ;;  %v3368_v20 = vadd.f32 %v7205_v46, %v3233_v61 }
 0x148   :  { %v3106_v29 = vadd.f32 %v7486_v10, %v2538_v9  ;;  %v5608_v43 = vpop.f32.mrb[52].mxu1  ;;  %v3628_v38 = vmul.f32 %v7235_v21, %v3493_v26  ;;  %v3367_v36 = vadd.f32 %v7205_v46, %v3232_v58  ;;  %v3024_v26 = vcombine.high %v7382_v48, %v7382_v48 }
 0x149   :  { %v3235_v51 = vadd.f32 %v7167_v49, %v3107_v11  ;;  %v2553_v56 = vadd.f32 %v5808_v45, %v5608_v43  ;;  %v1458_v53 = vpop.f32.mrb[53].mxu1  ;;  %v3496_v14 = vmax.f32 %v3368_v20, 0.0 }
 0x14a   :  { %v3234_v44 = vadd.f32 %v3106_v29, %v7181_v23  ;;  %v2548_v59 = vadd.f32 %v2547_v55, %v1458_v53  ;;  %3794 = vadd.xlane.f32.xlu1 %v3629_v18  ;;  %3792 = vadd.xlane.f32.xlu0 %v3628_v38  ;;  %v5811_v2 = vpop.f32.mrb[46].mxu0  ;;  %v3495_v25 = vmax.f32 %v3367_v36, 0.0 }
 0x14b   :  { %v3109_v37 = vadd.f32 %v7486_v10, %v2553_v56  ;;  %v2557_v62 = vpop.f32.mrb[47].mxu0  ;;  %v3631_v22 = vmul.f32 %v7235_v21, %v3496_v14  ;;  %v3370_v6 = vadd.f32 %v7205_v46, %v3235_v51 }
 0x14c   :  { %v3108_v27 = vadd.f32 %v7486_v10, %v2548_v59  ;;  %v5611_v41 = vpop.f32.mrb[54].mxu1  ;;  %v3630_v57 = vmul.f32 %v7235_v21, %v3495_v25  ;;  %v3369_v35 = vadd.f32 %v7205_v46, %v3234_v44  ;;  %v7555_v25 = vrot.slane %v3024_v26, %v6246_v28 }
 0x14d   :  { %v3237_v16 = vadd.f32 %v7198_v8, %v3109_v37  ;;  %v2563_v13 = vadd.f32 %v5811_v2, %v5611_v41  ;;  %v1468_v5 = vpop.f32.mrb[55].mxu1  ;;  %v3498_v15 = vmax.f32 %v3370_v6, 0.0 }
 0x14e   :  { %v3236_v63 = vadd.f32 %v3108_v27, %v7210_v50  ;;  %v2558_v19 = vadd.f32 %v2557_v62, %v1468_v5  ;;  %3798 = vadd.xlane.f32.xlu1 %v3631_v22  ;;  %3796 = vadd.xlane.f32.xlu0 %v3630_v57  ;;  %v5814_v47 = vpop.f32.mrb[48].mxu0  ;;  %v3497_v7 = vmax.f32 %v3369_v35, 0.0 }
 0x14f   :  { %v3111_v32 = vadd.f32 %v7486_v10, %v2563_v13  ;;  %v2567_v61 = vpop.f32.mrb[49].mxu0  ;;  %v3633_v3 = vmul.f32 %v7235_v21, %v3498_v15  ;;  %v3372_v52 = vadd.f32 %v7205_v46, %v3237_v16  ;;  %v7564_v13 = vld [vmem:[%s8504_s3] ss:$0 sm:$0xff] }
 0x150   :  { %v3110_v0 = vadd.f32 %v7486_v10, %v2558_v19  ;;  %v5614_v58 = vpop.f32.mrb[56].mxu1  ;;  %v3632_v9 = vmul.f32 %v7235_v21, %v3497_v7  ;;  %v3371_v45 = vadd.f32 %v7205_v46, %v3236_v63  ;;  %v2977_v7 = vcombine.high %v7037_v54, %v7037_v54 }
 0x151   :  { %v3239_v11 = vadd.f32 %v7228_v1, %v3111_v32  ;;  %v2573_v55 = vadd.f32 %v5814_v47, %v5614_v58  ;;  %v1478_v18 = vpop.f32.mrb[57].mxu1  ;;  %v3500_v20 = vmax.f32 %v3372_v52, 0.0 }
 0x152   :  { %v3238_v29 = vadd.f32 %v3110_v0, %v7241_v34  ;;  %v2568_v43 = vadd.f32 %v2567_v61, %v1478_v18  ;;  %3802 = vadd.xlane.f32.xlu1 %v3633_v3  ;;  %3800 = vadd.xlane.f32.xlu0 %v3632_v9  ;;  %v5817_v38 = vpop.f32.mrb[50].mxu0  ;;  %v3499_v36 = vmax.f32 %v3371_v45, 0.0 }
 0x153   :  { %v3113_v51 = vadd.f32 %v7486_v10, %v2573_v55  ;;  %v2577_v56 = vpop.f32.mrb[51].mxu0  ;;  %v3635_v53 = vmul.f32 %v7235_v21, %v3500_v20  ;;  %v3374_v14 = vadd.f32 %v7205_v46, %v3239_v11  ;;  %v7578_v11 = vld [vmem:[%s8505_s4] ss:$0 sm:$0xff] }
 0x154   :  { %v3112_v48 = vadd.f32 %v7486_v10, %v2568_v43  ;;  %v5617_v44 = vpop.f32.mrb[58].mxu1  ;;  %v3634_v59 = vmul.f32 %v7235_v21, %v3499_v36  ;;  %v3373_v2 = vadd.f32 %v7205_v46, %v3238_v29 }
 0x155   :  { %v3241_v37 = vadd.f32 %v7258_v30, %v3113_v51  ;;  %v2583_v62 = vadd.f32 %v5817_v38, %v5617_v44  ;;  %v1488_v22 = vpop.f32.mrb[59].mxu1  ;;  %v3502_v6 = vmax.f32 %v3374_v14, 0.0  ;;  %v2991_v38 = vrot.slane %v2977_v7, %v6233_v24 }
 0x156   :  { %v3240_v27 = vadd.f32 %v3112_v48, %v7266_v17  ;;  %v2578_v41 = vadd.f32 %v2577_v56, %v1488_v22  ;;  %3806 = vadd.xlane.f32.xlu1 %v3635_v53  ;;  %3804 = vadd.xlane.f32.xlu0 %v3634_v59  ;;  %v5820_v57 = vpop.f32.mrb[52].mxu0  ;;  %v3501_v10 = vmax.f32 %v3373_v2, 0.0 }
 0x157   :  { %v3115_v35 = vadd.f32 %v7555_v25, %v2583_v62  ;;  %v2587_v16 = vpop.f32.mrb[53].mxu0  ;;  %v3637_v46 = vmul.f32 %v7235_v21, %v3502_v6  ;;  %v3376_v5 = vadd.f32 %v7564_v13, %v3241_v37 }
 0x158   :  { %v3114_v15 = vadd.f32 %v7555_v25, %v2578_v41  ;;  %v5620_v63 = vpop.f32.mrb[60].mxu1  ;;  %v3636_v19 = vmul.f32 %v7235_v21, %v3501_v10  ;;  %v3375_v47 = vadd.f32 %v7564_v13, %v3240_v27  ;;  %v2993_v10 = vcombine.high %v2991_v38, %v2991_v38 }
 0x159   :  { %v3243_v32 = vadd.f32 %v7050_v60, %v3115_v35  ;;  %v2593_v61 = vadd.f32 %v5820_v57, %v5620_v63  ;;  %v1498_v3 = vpop.f32.mrb[61].mxu1  ;;  %v3504_v52 = vmax.f32 %v3376_v5, 0.0 }
 0x15a   :  { %v3242_v0 = vadd.f32 %v3114_v15, %v7060_v33  ;;  %v2588_v58 = vadd.f32 %v2587_v16, %v1498_v3  ;;  %3810 = vadd.xlane.f32.xlu1 %v3637_v46  ;;  %3808 = vadd.xlane.f32.xlu0 %v3636_v19  ;;  %v5823_v9 = vpop.f32.mrb[54].mxu0  ;;  %v3503_v45 = vmax.f32 %v3375_v47, 0.0  ;;  %v3007_v15 = vrot.slane %v2991_v38, %v6233_v24 }
 0x15b   :  { %v3117_v26 = vadd.f32 %v7555_v25, %v2593_v61  ;;  %v2597_v21 = vpop.f32.mrb[55].mxu0  ;;  %v3639_v54 = vmul.f32 %v7578_v11, %v3504_v52  ;;  %v3378_v55 = vadd.f32 %v7564_v13, %v3243_v32 }
 0x15c   :  { %v3116_v18 = vadd.f32 %v7555_v25, %v2588_v58  ;;  %v5623_v20 = vpop.f32.mrb[62].mxu1  ;;  %v3638_v29 = vmul.f32 %v7578_v11, %v3503_v45  ;;  %v3377_v43 = vadd.f32 %v7564_v13, %v3242_v0 }
 0x15d   :  { %v3245_v36 = vadd.f32 %v7076_v40, %v3117_v26  ;;  %v2603_v51 = vadd.f32 %v5823_v9, %v5623_v20  ;;  %v1508_v56 = vpop.f32.mrb[63].mxu1  ;;  %v3506_v53 = vmax.f32 %v3378_v55, 0.0  ;;  %v3021_v26 = vrot.slane %v2993_v10, %v6233_v24 }
 0x15e   :  { %v3244_v14 = vadd.f32 %v3116_v18, %v7086_v12  ;;  %v2598_v48 = vadd.f32 %v2597_v21, %v1508_v56  ;;  %3814 = vadd.xlane.f32.xlu1 %v3639_v54  ;;  %3812 = vadd.xlane.f32.xlu0 %v3638_v29  ;;  %v5826_v44 = vpop.f32.mrb[56].mxu0  ;;  %v3505_v59 = vmax.f32 %v3377_v43, 0.0  ;;  %v3023_v20 = vcombine.high %v3007_v15, %v3007_v15 }
 0x15f   :  { %v3119_v2 = vadd.f32 %v7555_v25, %v2603_v51  ;;  %v2607_v37 = vpop.f32.mrb[57].mxu0  ;;  %v3641_v62 = vmul.f32 %v7578_v11, %v3506_v53  ;;  %v3380_v22 = vadd.f32 %v7564_v13, %v3245_v36  ;;  %v7620_v10 = vrot.slane %v3021_v26, %v6246_v28 }
 0x160   :  { %v3118_v6 = vadd.f32 %v7555_v25, %v2598_v48  ;;  %v5626_v27 = vpop.f32.mrb[64].mxu1  ;;  %v3640_v41 = vmul.f32 %v7578_v11, %v3505_v59  ;;  %v3379_v57 = vadd.f32 %v7564_v13, %v3244_v14  ;;  %v8530_v14 = vlaneseq }
 0x161   :  { %v3247_v35 = vadd.f32 %v7102_v39, %v3119_v2  ;;  %v2613_v16 = vadd.f32 %v5826_v44, %v5626_v27  ;;  %v1518_v46 = vpop.f32.mrb[65].mxu1  ;;  %v3508_v5 = vmax.f32 %v3380_v22, 0.0  ;;  %v7613_v44 = vrot.slane %v3007_v15, %v6246_v28 }
 0x162   :  { %v3246_v63 = vadd.f32 %v3118_v6, %v7116_v4  ;;  %v2608_v19 = vadd.f32 %v2607_v37, %v1518_v46  ;;  %3818 = vadd.xlane.f32.xlu1 %v3641_v62  ;;  %3816 = vadd.xlane.f32.xlu0 %v3640_v41  ;;  %v5829_v47 = vpop.f32.mrb[58].mxu0  ;;  %v3507_v7 = vmax.f32 %v3379_v57, 0.0  ;;  %v7610_v48 = vand.u32 127, %v8530_v14 }
 0x163   :  { %v3121_v32 = vadd.f32 %v7555_v25, %v2613_v16  ;;  %v2617_v61 = vpop.f32.mrb[59].mxu0  ;;  %v3643_v3 = vmul.f32 %v7578_v11, %v3508_v5  ;;  %v3382_v52 = vadd.f32 %v7564_v13, %v3247_v35  ;;  %v3025_v22 = vcombine.high %v3021_v26, %v3021_v26 }
 0x164   :  { %v3120_v0 = vadd.f32 %v7555_v25, %v2608_v19  ;;  %v5629_v58 = vpop.f32.mrb[66].mxu1  ;;  %v3642_v9 = vmul.f32 %v7578_v11, %v3507_v7  ;;  %v3381_v45 = vadd.f32 %v7564_v13, %v3246_v63  ;;  %v4240_v7 = vadd.s32 4294967288, %v7610_v48 }
 0x165   :  { %v3249_v21 = vadd.f32 %v7134_v31, %v3121_v32  ;;  %v2623_v54 = vadd.f32 %v5829_v47, %v5629_v58  ;;  %v1528_v55 = vpop.f32.mrb[67].mxu1  ;;  %v3510_v18 = vmax.f32 %v3382_v52, 0.0  ;;  %v7628_v32 = vrot.slane %v3023_v20, %v6246_v28 }
 0x166   :  { %v3248_v29 = vadd.f32 %v3120_v0, %v7148_v42  ;;  %v2618_v43 = vadd.f32 %v2617_v61, %v1528_v55  ;;  %3822 = vadd.xlane.f32.xlu1 %v3643_v3  ;;  %3820 = vadd.xlane.f32.xlu0 %v3642_v9  ;;  %v5832_v38 = vpop.f32.mrb[60].mxu0  ;;  %v3509_v36 = vmax.f32 %v3381_v45, 0.0  ;;  %v7634_v58 = vrot.slane %v3025_v22, %v6246_v28 }
 0x167   :  { %v3123_v51 = vadd.f32 %v7555_v25, %v2623_v54  ;;  %v2627_v56 = vpop.f32.mrb[61].mxu0  ;;  %v3645_v53 = vmul.f32 %v7578_v11, %v3510_v18  ;;  %v3384_v24 = vadd.f32 %v7564_v13, %v3249_v21 }
 0x168   :  { %v3122_v59 = vadd.f32 %v7555_v25, %v2618_v43  ;;  %v5632_v2 = vpop.f32.mrb[68].mxu1  ;;  %v3644_v37 = vmul.f32 %v7578_v11, %v3509_v36  ;;  %v3383_v62 = vadd.f32 %v7564_v13, %v3248_v29  ;;  %8531 = vst [vmem:[#allocation12_spill] sm:$0xff] %v7634_v58  ;;  %v7641_v29 = vstv %s8506_s5 }
 0x169   :  { %v3251_v6 = vadd.f32 %v7167_v49, %v3123_v51  ;;  %v2633_v27 = vadd.f32 %v5832_v38, %v5632_v2  ;;  %v1538_v41 = vpop.f32.mrb[69].mxu1  ;;  %v3512_v57 = vmax.f32 %v3384_v24, 0.0  ;;  %v8532_v51 = vld [vmem:[#allocation6_spill] sm:$0xff]  ;;  %v4254_v2 = vadd.s32 4294967272, %v7610_v48 }
 0x16a   :  { %v3250_v35 = vadd.f32 %v3122_v59, %v7181_v23  ;;  %v2628_v16 = vadd.f32 %v2627_v56, %v1538_v41  ;;  %3826 = vadd.xlane.f32.xlu1 %v3645_v53  ;;  %3824 = vadd.xlane.f32.xlu0 %v3644_v37  ;;  %v5835_v46 = vpop.f32.mrb[62].mxu0  ;;  %v3511_v5 = vmax.f32 %v3383_v62, 0.0  ;;  %v7647_v56 = vsub.s32 %v4240_v7, %v8532_v51 }
 0x16b   :  { %v3125_v15 = vadd.f32 %v7555_v25, %v2633_v27  ;;  %v2637_v63 = vpop.f32.mrb[63].mxu0  ;;  %v3647_v19 = vmul.f32 %v7578_v11, %v3512_v57  ;;  %v3386_v47 = vadd.f32 %v7564_v13, %v3251_v6  ;;  %v4247_v27 = vadd.s32 4294967280, %v7610_v48 }
 0x16c   :  { %v3124_v61 = vadd.f32 %v7555_v25, %v2628_v16  ;;  %v5635_v3 = vpop.f32.mrb[70].mxu1  ;;  %v3646_v52 = vmul.f32 %v7578_v11, %v3511_v5  ;;  %v3385_v0 = vadd.f32 %v7564_v13, %v3250_v35 }
 0x16d   :  { %v3253_v9 = vadd.f32 %v7198_v8, %v3125_v15  ;;  %v2643_v45 = vadd.f32 %v5835_v46, %v5635_v3  ;;  %v1548_v26 = vpop.f32.mrb[71].mxu1  ;;  %v3514_v21 = vmax.f32 %v3386_v47, 0.0  ;;  %v7658_v46 = vsub.s32 %v7610_v48, %v8532_v51 }
 0x16e   :  { %v3252_v54 = vadd.f32 %v3124_v61, %v7210_v50  ;;  %v2638_v55 = vadd.f32 %v2637_v63, %v1548_v26  ;;  %3830 = vadd.xlane.f32.xlu1 %v3647_v19  ;;  %3828 = vadd.xlane.f32.xlu0 %v3646_v52  ;;  %v5838_v18 = vpop.f32.mrb[64].mxu0  ;;  %v3513_v20 = vmax.f32 %v3385_v0, 0.0  ;;  %v4261_v47 = vadd.s32 4294967264, %v7610_v48 }
 0x16f   :  { %v3127_v28 = vadd.f32 %v7555_v25, %v2643_v45  ;;  %v2647_v43 = vpop.f32.mrb[65].mxu0  ;;  %v3649_v38 = vmul.f32 %v7578_v11, %v3514_v21  ;;  %v3388_v36 = vadd.f32 %v7564_v13, %v3253_v9  ;;  %8533 = vst [vmem:[#allocation6_spill] sm:$0xff] %v7658_v46  ;;  %v7668_v0 = vsub.s32 %v4254_v2, %v8532_v51 }
 0x170   :  { %v3126_v53 = vadd.f32 %v7555_v25, %v2638_v55  ;;  %v5638_v24 = vpop.f32.mrb[72].mxu1  ;;  %v3648_v14 = vmul.f32 %v7578_v11, %v3513_v20  ;;  %v3387_v59 = vadd.f32 %v7564_v13, %v3252_v54  ;;  %v7672_v54 = vsub.s32 %v4247_v27, %v8532_v51 }
 0x171   :  { %v3255_v37 = vadd.f32 %v7228_v1, %v3127_v28  ;;  %v2653_v62 = vadd.f32 %v5838_v18, %v5638_v24  ;;  %v1558_v22 = vpop.f32.mrb[73].mxu1  ;;  %v3516_v6 = vmax.f32 %v3388_v36, 0.0  ;;  %v4268_v28 = vadd.s32 4294967256, %v7610_v48 }
 0x172   :  { %v3254_v41 = vadd.f32 %v3126_v53, %v7241_v34  ;;  %v2648_v57 = vadd.f32 %v2647_v43, %v1558_v22  ;;  %3834 = vadd.xlane.f32.xlu1 %v3649_v38  ;;  %3832 = vadd.xlane.f32.xlu0 %v3648_v14  ;;  %v5841_v35 = vpop.f32.mrb[66].mxu0  ;;  %v3515_v16 = vmax.f32 %v3387_v59, 0.0  ;;  %v7680_v24 = vsub.s32 %v4261_v47, %v8532_v51 }
 0x173   :  { %v3129_v5 = vadd.f32 %v7555_v25, %v2653_v62  ;;  %v2657_v15 = vpop.f32.mrb[67].mxu0  ;;  %v3651_v63 = vmul.f32 %v7578_v11, %v3516_v6  ;;  %v3390_v19 = vadd.f32 %v7564_v13, %v3255_v37  ;;  %v4282_v62 = vadd.s32 4294967240, %v7610_v48 }
 0x174   :  { %v3128_v7 = vadd.f32 %v7555_v25, %v2648_v57  ;;  %v5641_v61 = vpop.f32.mrb[74].mxu1  ;;  %v3650_v3 = vmul.f32 %v7578_v11, %v3515_v16  ;;  %v3389_v52 = vadd.f32 %v7564_v13, %v3254_v41  ;;  %v4275_v57 = vadd.s32 4294967248, %v7610_v48 }
 0x175   :  { %v3257_v9 = vadd.f32 %v7258_v30, %v3129_v5  ;;  %v2663_v45 = vadd.f32 %v5841_v35, %v5641_v61  ;;  %v1568_v26 = vpop.f32.mrb[75].mxu1  ;;  %v3518_v21 = vmax.f32 %v3390_v19, 0.0 }
 0x176   :  { %v3256_v55 = vadd.f32 %v3128_v7, %v7266_v17  ;;  %v2658_v18 = vadd.f32 %v2657_v15, %v1568_v26  ;;  %3838 = vadd.xlane.f32.xlu1 %v3651_v63  ;;  %3836 = vadd.xlane.f32.xlu0 %v3650_v3  ;;  %v5844_v25 = vpop.f32.mrb[68].mxu0  ;;  %v3517_v20 = vmax.f32 %v3389_v52, 0.0  ;;  %v7690_v63 = vsub.s32 %v4268_v28, %v8532_v51 }
 0x177   :  { %v3131_v43 = vadd.f32 %v7613_v44, %v2663_v45  ;;  %v2667_v38 = vpop.f32.mrb[69].mxu0  ;;  %v3653_v36 = vmul.f32 %v7578_v11, %v3518_v21  ;;  %v3392_v53 = vadd.f32 %v7564_v13, %v3257_v9  ;;  %v4296_v3 = vadd.s32 4294967224, %v7610_v48 }
 0x178   :  { %v3130_v14 = vadd.f32 %v7613_v44, %v2658_v18  ;;  %v5644_v59 = vpop.f32.mrb[76].mxu1  ;;  %v3652_v2 = vmul.f32 %v7578_v11, %v3517_v20  ;;  %v3391_v37 = vadd.f32 %v7564_v13, %v3256_v55  ;;  %v7700_v21 = vsub.s32 %v4282_v62, %v8532_v51 }
 0x179   :  { %v3259_v22 = vadd.f32 %v7050_v60, %v3131_v43  ;;  %v2673_v6 = vadd.f32 %v5844_v25, %v5644_v59  ;;  %v1578_v27 = vpop.f32.mrb[77].mxu1  ;;  %v3520_v41 = vmax.f32 %v3392_v53, 0.0  ;;  %v7704_v28 = vsub.s32 %v4275_v57, %v8532_v51 }
 0x17a   :  { %v3258_v35 = vadd.f32 %v3130_v14, %v7060_v33  ;;  %v2668_v16 = vadd.f32 %v2667_v38, %v1578_v27  ;;  %3842 = vadd.xlane.f32.xlu1 %v3653_v36  ;;  %3840 = vadd.xlane.f32.xlu0 %v3652_v2  ;;  %v5847_v5 = vpop.f32.mrb[70].mxu0  ;;  %v3519_v15 = vmax.f32 %v3391_v37, 0.0  ;;  %v4289_v14 = vadd.s32 4294967232, %v7610_v48 }
 0x17b   :  { %v3133_v19 = vadd.f32 %v7613_v44, %v2673_v6  ;;  %v2677_v47 = vpop.f32.mrb[71].mxu0  ;;  %v3655_v7 = vmul.f32 %v7578_v11, %v3520_v41  ;;  %v3394_v61 = vadd.f32 %v7564_v13, %v3259_v22  ;;  %8534 = vst [vmem:[#allocation13_spill] sm:$0xff] %v7704_v28  ;;  %v7712_v22 = vsub.s32 %v4296_v3, %v8532_v51 }
 0x17c   :  { %v3132_v52 = vadd.f32 %v7613_v44, %v2668_v16  ;;  %v5647_v9 = vpop.f32.mrb[78].mxu1  ;;  %v3654_v45 = vmul.f32 %v7578_v11, %v3519_v15  ;;  %v3393_v26 = vadd.f32 %v7564_v13, %v3258_v35  ;;  %v4310_v35 = vadd.s32 4294967208, %v7610_v48 }
 0x17d   :  { %v3261_v55 = vadd.f32 %v7076_v40, %v3133_v19  ;;  %v2683_v18 = vadd.f32 %v5847_v5, %v5647_v9  ;;  %v1588_v25 = vpop.f32.mrb[79].mxu1  ;;  %v3522_v20 = vmax.f32 %v3394_v61, 0.0  ;;  %v7722_v9 = vsub.s32 %v4289_v14, %v8532_v51 }
 0x17e   :  { %v3260_v43 = vadd.f32 %v3132_v52, %v7086_v12  ;;  %v2678_v38 = vadd.f32 %v2677_v47, %v1588_v25  ;;  %3846 = vadd.xlane.f32.xlu1 %v3655_v7  ;;  %3844 = vadd.xlane.f32.xlu0 %v3654_v45  ;;  %v5850_v36 = vpop.f32.mrb[72].mxu0  ;;  %v3521_v53 = vmax.f32 %v3393_v26, 0.0  ;;  %v4303_v47 = vadd.s32 4294967216, %v7610_v48 }
 0x17f   :  { %v3135_v59 = vadd.f32 %v7613_v44, %v2683_v18  ;;  %v2687_v2 = vpop.f32.mrb[73].mxu0  ;;  %v3657_v37 = vmul.f32 %v7578_v11, %v3522_v20  ;;  %v3396_v62 = vadd.f32 %v7564_v13, %v3261_v55  ;;  %v4324_v25 = vadd.s32 4294967192, %v7610_v48 }
 0x180   :  { %v3134_v6 = vadd.f32 %v7613_v44, %v2678_v38  ;;  %v5650_v27 = vpop.f32.mrb[80].mxu1  ;;  %v3656_v41 = vmul.f32 %v7578_v11, %v3521_v53  ;;  %v3395_v57 = vadd.f32 %v7564_v13, %v3260_v43  ;;  %v7732_v53 = vsub.s32 %v4310_v35, %v8532_v51 }
 0x181   :  { %v3263_v16 = vadd.f32 %v7102_v39, %v3135_v59  ;;  %v2693_v5 = vadd.f32 %v5850_v36, %v5650_v27  ;;  %v1598_v15 = vpop.f32.mrb[81].mxu1  ;;  %v3524_v19 = vmax.f32 %v3396_v62, 0.0  ;;  %v7736_v62 = vsub.s32 %v4303_v47, %v8532_v51 }
 0x182   :  { %v3262_v7 = vadd.f32 %v3134_v6, %v7116_v4  ;;  %v2688_v61 = vadd.f32 %v2687_v2, %v1598_v15  ;;  %3850 = vadd.xlane.f32.xlu1 %v3657_v37  ;;  %3848 = vadd.xlane.f32.xlu0 %v3656_v41  ;;  %v5853_v3 = vpop.f32.mrb[74].mxu0  ;;  %v3523_v52 = vmax.f32 %v3395_v57, 0.0 }
 0x183   :  { %v3137_v45 = vadd.f32 %v7613_v44, %v2693_v5  ;;  %v2697_v26 = vpop.f32.mrb[75].mxu0  ;;  %v3659_v55 = vmul.f32 %v7578_v11, %v3524_v19  ;;  %v3398_v18 = vadd.f32 %v7564_v13, %v3263_v16  ;;  %v4317_v16 = vadd.s32 4294967200, %v7610_v48 }
 0x184   :  { %v3136_v20 = vadd.f32 %v7613_v44, %v2688_v61  ;;  %v5653_v43 = vpop.f32.mrb[82].mxu1  ;;  %v3658_v38 = vmul.f32 %v7578_v11, %v3523_v52  ;;  %v3397_v36 = vadd.f32 %v7564_v13, %v3262_v7  ;;  %v7744_v7 = vsub.s32 %v4324_v25, %v8532_v51 }
 0x185   :  { %v3265_v14 = vadd.f32 %v7134_v31, %v3137_v45  ;;  %v2703_v59 = vadd.f32 %v5853_v3, %v5653_v43  ;;  %v1608_v2 = vpop.f32.mrb[83].mxu1  ;;  %v3526_v37 = vmax.f32 %v3398_v18, 0.0  ;;  %v4338_v45 = vadd.s32 4294967176, %v7610_v48 }
 0x186   :  { %v3264_v6 = vadd.f32 %v3136_v20, %v7148_v42  ;;  %v2698_v27 = vadd.f32 %v2697_v26, %v1608_v2  ;;  %3854 = vadd.xlane.f32.xlu1 %v3659_v55  ;;  %3852 = vadd.xlane.f32.xlu0 %v3658_v38  ;;  %v5856_v41 = vpop.f32.mrb[76].mxu0  ;;  %v3525_v57 = vmax.f32 %v3397_v36, 0.0  ;;  %v4331_v43 = vadd.s32 4294967184, %v7610_v48 }
 0x187   :  { %v3139_v35 = vadd.f32 %v7613_v44, %v2703_v59  ;;  %v2707_v5 = vpop.f32.mrb[77].mxu0  ;;  %v3661_v15 = vmul.f32 %v7578_v11, %v3526_v37  ;;  %v3400_v19 = vadd.f32 %v7564_v13, %v3265_v14  ;;  %v7754_v2 = vsub.s32 %v4317_v16, %v8532_v51 }
 0x188   :  { %v3138_v47 = vadd.f32 %v7613_v44, %v2698_v27  ;;  %v5656_v61 = vpop.f32.mrb[84].mxu1  ;;  %v3660_v3 = vmul.f32 %v7578_v11, %v3525_v57  ;;  %v3399_v52 = vadd.f32 %v7564_v13, %v3264_v6 }
 0x189   :  { %v3267_v26 = vadd.f32 %v7167_v49, %v3139_v35  ;;  %v2713_v55 = vadd.f32 %v5856_v41, %v5656_v61  ;;  %v1618_v18 = vpop.f32.mrb[85].mxu1  ;;  %v3528_v20 = vmax.f32 %v3400_v19, 0.0  ;;  %8535 = vst [vmem:[#allocation14_spill] sm:$0xff] %v7754_v2  ;;  %v7764_v19 = vsub.s32 %v4338_v45, %v8532_v51 }
 0x18a   :  { %v3266_v25 = vadd.f32 %v3138_v47, %v7181_v23  ;;  %v2708_v38 = vadd.f32 %v2707_v5, %v1618_v18  ;;  %3858 = vadd.xlane.f32.xlu1 %v3661_v15  ;;  %3856 = vadd.xlane.f32.xlu0 %v3660_v3  ;;  %v3723_v36 = vpop.xlane.xlu0 %3722  ;;  %v5859_v14 = vpop.f32.mrb[78].mxu0  ;;  %v3527_v59 = vmax.f32 %v3399_v52, 0.0  ;;  %v7768_v52 = vsub.s32 %v4331_v43, %v8532_v51 }
 0x18b   :  { %v3141_v37 = vadd.f32 %v7613_v44, %v2713_v55  ;;  %v3979_v6 = vadd.f32 %v7641_v29, %v3723_v36  ;;  %v2717_v27 = vpop.f32.mrb[79].mxu0  ;;  %v3663_v41 = vmul.f32 %v7578_v11, %v3528_v20  ;;  %v3402_v48 = vadd.f32 %v7564_v13, %v3267_v26 }
 0x18c   :  { %v3140_v57 = vadd.f32 %v7613_v44, %v2708_v38  ;;  %v5659_v35 = vpop.f32.mrb[86].mxu1  ;;  %v3662_v5 = vmul.f32 %v7578_v11, %v3527_v59  ;;  %v3401_v15 = vadd.f32 %v7564_v13, %v3266_v25 }
 0x18d   :  { %v3269_v16 = vadd.f32 %v7198_v8, %v3141_v37  ;;  %v2723_v47 = vadd.f32 %v5859_v14, %v5659_v35  ;;  %v1628_v61 = vpop.f32.mrb[87].mxu1  ;;  %v3530_v3 = vmax.f32 %v3402_v48, 0.0  ;;  %v4244_v55 = vrot.slane %v3979_v6, %v7647_v56 }
 0x18e   :  { %v3268_v26 = vadd.f32 %v3140_v57, %v7210_v50  ;;  %v2718_v18 = vadd.f32 %v2717_v27, %v1628_v61  ;;  %3862 = vadd.xlane.f32.xlu1 %v3663_v41  ;;  %3860 = vadd.xlane.f32.xlu0 %v3662_v5  ;;  %v3721_v20 = vpop.xlane.xlu0 %3720  ;;  %v5862_v25 = vpop.f32.mrb[80].mxu0  ;;  %v3529_v45 = vmax.f32 %v3401_v15, 0.0 }
 0x18f   :  { %v3143_v38 = vadd.f32 %v7613_v44, %v2723_v47  ;;  %v3978_v36 = vadd.f32 %v7641_v29, %v3721_v20  ;;  %v3727_v14 = vpop.xlane.xlu1 %3726  ;;  %v2727_v59 = vpop.f32.mrb[81].mxu0  ;;  %v3665_v51 = vmul.f32 %v7578_v11, %v3530_v3  ;;  %v3404_v43 = vadd.f32 %v7564_v13, %v3269_v16 }
 0x190   :  { %v3142_v37 = vadd.f32 %v7613_v44, %v2718_v18  ;;  %v3981_v6 = vadd.f32 %v7641_v29, %v3727_v14  ;;  %v5662_v27 = vpop.f32.mrb[88].mxu1  ;;  %v3664_v41 = vmul.f32 %v7578_v11, %v3529_v45  ;;  %v3403_v48 = vadd.f32 %v7564_v13, %v3268_v26 }
 0x191   :  { %v3271_v57 = vadd.f32 %v7228_v1, %v3143_v38  ;;  %v4239_v35 = vrot.slane %v3978_v36, %v7658_v46  ;;  %v2733_v5 = vadd.f32 %v5862_v25, %v5662_v27  ;;  %v1638_v15 = vpop.f32.mrb[89].mxu1  ;;  %v3532_v47 = vmax.f32 %v3404_v43, 0.0 }
 0x192   :  { %v3270_v61 = vadd.f32 %v3142_v37, %v7241_v34  ;;  %v4258_v16 = vrot.slane %v3981_v6, %v7668_v0  ;;  %v2728_v3 = vadd.f32 %v2727_v59, %v1638_v15  ;;  %3866 = vadd.xlane.f32.xlu1 %v3665_v51  ;;  %3864 = vadd.xlane.f32.xlu0 %v3664_v41  ;;  %v5865_v18 = vpop.f32.mrb[82].mxu0  ;;  %v3531_v20 = vmax.f32 %v3403_v48, 0.0 }
 0x193   :  { %v4246_v45 = vsel %vm4245_vm2, %v4244_v55, %v4239_v35  ;;  %v3145_v26 = vadd.f32 %v7613_v44, %v2733_v5  ;;  %v3725_v38 = vpop.xlane.xlu1 %3724  ;;  %v3729_v14 = vpop.xlane.xlu0 %3728  ;;  %v3667_v25 = vmul.f32 %v7578_v11, %v3532_v47  ;;  %v3406_v36 = vadd.f32 %v7564_v13, %v3271_v57 }
 0x194   :  { %v3144_v43 = vadd.f32 %v7613_v44, %v2728_v3  ;;  %v3980_v37 = vadd.f32 %v7641_v29, %v3725_v38  ;;  %v5665_v6 = vpop.f32.mrb[90].mxu1  ;;  %v3982_v59 = vadd.f32 %v7641_v29, %v3729_v14  ;;  %v2737_v51 = vpop.f32.mrb[83].mxu0  ;;  %v3666_v27 = vmul.f32 %v7578_v11, %v3531_v20 }
 0x195   :  { %v3273_v55 = vadd.f32 %v7258_v30, %v3145_v26  ;;  %v2743_v41 = vadd.f32 %v5865_v18, %v5665_v6  ;;  %v1648_v48 = vpop.f32.mrb[91].mxu1  ;;  %v3534_v35 = vmax.f32 %v3406_v36, 0.0  ;;  %v3405_v5 = vadd.f32 %v7564_v13, %v3270_v61 }
 0x196   :  { %v3272_v57 = vadd.f32 %v3144_v43, %v7266_v17  ;;  %v4251_v44 = vrot.slane %v3980_v37, %v7672_v54  ;;  %v4265_v15 = vrot.slane %v3982_v59, %v7680_v24  ;;  %v2738_v47 = vadd.f32 %v2737_v51, %v1648_v48  ;;  %3870 = vadd.xlane.f32.xlu1 %v3667_v25  ;;  %v5868_v3 = vpop.f32.mrb[84].mxu0 }
 0x197   :  { %v3147_v20 = vadd.f32 %v7620_v10, %v2743_v41  ;;  %3868 = vadd.xlane.f32.xlu0 %v3666_v27  ;;  %v3731_v26 = vpop.xlane.xlu1 %3730  ;;  %v2747_v18 = vpop.f32.mrb[85].mxu0  ;;  %v3669_v38 = vmul.f32 %v7578_v11, %v3534_v35  ;;  %v3533_v14 = vmax.f32 %v3405_v5, 0.0  ;;  %v3408_v61 = vadd.f32 %v7564_v13, %v3273_v55 }
 0x198   :  { %v4253_v36 = vsel %vm4252_vm3, %v4251_v44, %v4246_v45  ;;  %v3146_v43 = vadd.f32 %v7620_v10, %v2738_v47  ;;  %v3983_v37 = vadd.f32 %v7641_v29, %v3731_v26  ;;  %v5668_v6 = vpop.f32.mrb[92].mxu1  ;;  %v3407_v25 = vadd.f32 %v7564_v13, %v3272_v57 }
 0x199   :  { %v4260_v59 = vsel %vm4259_vm4, %v4258_v16, %v4253_v36  ;;  %v3275_v51 = vadd.f32 %v7050_v60, %v3147_v20  ;;  %v2753_v27 = vadd.f32 %v5868_v3, %v5668_v6  ;;  %v1658_v41 = vpop.f32.mrb[93].mxu1  ;;  %v3668_v48 = vmul.f32 %v7578_v11, %v3533_v14 }
 0x19a   :  { %v4267_v55 = vsel %vm4266_vm5, %v4265_v15, %v4260_v59  ;;  %v3274_v45 = vadd.f32 %v3146_v43, %v7060_v33  ;;  %v4272_v35 = vrot.slane %v3983_v37, %v7690_v63  ;;  %v2748_v5 = vadd.f32 %v2747_v18, %v1658_v41  ;;  %3874 = vadd.xlane.f32.xlu1 %v3669_v38  ;;  %v5871_v44 = vpop.f32.mrb[86].mxu0 }
 0x19b   :  { %v3149_v57 = vadd.f32 %v7620_v10, %v2753_v27  ;;  %3872 = vadd.xlane.f32.xlu0 %v3668_v48  ;;  %v3735_v16 = vpop.xlane.xlu1 %3734  ;;  %v3733_v47 = vpop.xlane.xlu0 %3732  ;;  %v3536_v3 = vmax.f32 %v3408_v61, 0.0  ;;  %v3535_v20 = vmax.f32 %v3407_v25, 0.0  ;;  %v3410_v26 = vadd.f32 %v7564_v13, %v3275_v51 }
 0x19c   :  { %v4274_v14 = vsel %vm4273_vm6, %v4272_v35, %v4267_v55  ;;  %v3148_v15 = vadd.f32 %v7620_v10, %v2748_v5  ;;  %v3985_v36 = vadd.f32 %v7641_v29, %v3735_v16  ;;  %v3984_v18 = vadd.f32 %v7641_v29, %v3733_v47  ;;  %v5671_v38 = vpop.f32.mrb[94].mxu1  ;;  %v2757_v43 = vpop.f32.mrb[87].mxu0 }
 0x19d   :  { %v3277_v37 = vadd.f32 %v7076_v40, %v3149_v57  ;;  %v2763_v6 = vadd.f32 %v5871_v44, %v5671_v38  ;;  %v1668_v59 = vpop.f32.mrb[95].mxu1  ;;  %v3671_v27 = vmul.f32 %v7578_v11, %v3536_v3  ;;  %v3670_v61 = vmul.f32 %v7578_v11, %v3535_v20 }
 0x19e   :  { %v3276_v25 = vadd.f32 %v3148_v15, %v7086_v12  ;;  %v4286_v51 = vrot.slane %v3985_v36, %v7700_v21  ;;  %v4279_v41 = vrot.slane %v3984_v18, %v7704_v28  ;;  %v2758_v48 = vadd.f32 %v2757_v43, %v1668_v59  ;;  %v5874_v55 = vpop.f32.mrb[88].mxu0 }
 0x19f   :  { %v3151_v35 = vadd.f32 %v7620_v10, %v2763_v6  ;;  %3878 = vadd.xlane.f32.xlu1 %v3671_v27  ;;  %3876 = vadd.xlane.f32.xlu0 %v3670_v61  ;;  %v3739_v5 = vpop.xlane.xlu1 %3738  ;;  %v3737_v44 = vpop.xlane.xlu0 %3736  ;;  %v3538_v57 = vmax.f32 %v3410_v26, 0.0  ;;  %v3409_v16 = vadd.f32 %v7564_v13, %v3274_v45  ;;  %v3412_v47 = vadd.f32 %v7564_v13, %v3277_v37 }
 0x1a0   :  { %v4281_v3 = vsel %vm4280_vm7, %v4279_v41, %v4274_v14  ;;  %v3150_v20 = vadd.f32 %v7620_v10, %v2758_v48  ;;  %v3987_v15 = vadd.f32 %v7641_v29, %v3739_v5  ;;  %v3986_v36 = vadd.f32 %v7641_v29, %v3737_v44  ;;  %v5674_v18 = vpop.f32.mrb[96].mxu1  ;;  %v2767_v38 = vpop.f32.mrb[89].mxu0 }
 0x1a1   :  { %v7830_v43 = vadd.f32 %v7102_v39, %v3151_v35  ;;  %v4288_v6 = vsel %vm4287_vm8, %v4286_v51, %v4281_v3  ;;  %v2773_v26 = vadd.f32 %v5874_v55, %v5674_v18  ;;  %v1678_v59 = vpop.f32.mrb[97].mxu1  ;;  %v3673_v45 = vmul.f32 %v7578_v11, %v3538_v57 }
 0x1a2   :  { %v3278_v14 = vadd.f32 %v3150_v20, %v7116_v4  ;;  %v4300_v37 = vrot.slane %v3987_v15, %v7712_v22  ;;  %v4293_v27 = vrot.slane %v3986_v36, %v7722_v9  ;;  %v2768_v61 = vadd.f32 %v2767_v38, %v1678_v59  ;;  %v5877_v41 = vpop.f32.mrb[90].mxu0 }
 0x1a3   :  { %v3153_v48 = vadd.f32 %v7620_v10, %v2773_v26  ;;  %3882 = vadd.xlane.f32.xlu1 %v3673_v45  ;;  %v3537_v35 = vmax.f32 %v3409_v16, 0.0  ;;  %v3743_v5 = vpop.xlane.xlu1 %3742  ;;  %v3741_v51 = vpop.xlane.xlu0 %3740  ;;  %v3540_v55 = vmax.f32 %v3412_v47, 0.0  ;;  %v3411_v44 = vadd.f32 %v7564_v13, %v3276_v25 }
 0x1a4   :  { %v4295_v57 = vsel %vm4294_vm9, %v4293_v27, %v4288_v6  ;;  %v3152_v3 = vadd.f32 %v7620_v10, %v2768_v61  ;;  %v3989_v20 = vadd.f32 %v7641_v29, %v3743_v5  ;;  %v3988_v15 = vadd.f32 %v7641_v29, %v3741_v51  ;;  %v5677_v36 = vpop.f32.mrb[98].mxu1  ;;  %v2777_v18 = vpop.f32.mrb[91].mxu0 }
 0x1a5   :  { %v7844_v38 = vadd.f32 %v7134_v31, %v3153_v48  ;;  %v3672_v16 = vmul.f32 %v7578_v11, %v3537_v35  ;;  %v4302_v26 = vsel %vm4301_vm10, %v4300_v37, %v4295_v57  ;;  %v2783_v47 = vadd.f32 %v5877_v41, %v5677_v36  ;;  %v1688_v59 = vpop.f32.mrb[99].mxu1 }
 0x1a6   :  { %v3280_v25 = vadd.f32 %v3152_v3, %v7148_v42  ;;  %v4314_v6 = vrot.slane %v3989_v20, %v7732_v53  ;;  %v4307_v45 = vrot.slane %v3988_v15, %v7736_v62  ;;  %v2778_v27 = vadd.f32 %v2777_v18, %v1688_v59  ;;  %v5880_v61 = vpop.f32.mrb[92].mxu0 }
 0x1a7   :  { %3880 = vadd.xlane.f32.xlu0 %v3672_v16  ;;  %v3155_v48 = vadd.f32 %v7620_v10, %v2783_v47  ;;  %v3675_v5 = vmul.f32 %v7578_v11, %v3540_v55  ;;  %v3539_v35 = vmax.f32 %v3411_v44, 0.0  ;;  %v3747_v51 = vpop.xlane.xlu1 %3746  ;;  %v3745_v37 = vpop.xlane.xlu0 %3744  ;;  %v3413_v41 = vadd.f32 %v7564_v13, %v3278_v14 }
 0x1a8   :  { %v4309_v57 = vsel %vm4308_vm11, %v4307_v45, %v4302_v26  ;;  %v3154_v3 = vadd.f32 %v7620_v10, %v2778_v27  ;;  %v3991_v20 = vadd.f32 %v7641_v29, %v3747_v51  ;;  %v3990_v15 = vadd.f32 %v7641_v29, %v3745_v37  ;;  %v5680_v36 = vpop.f32.mrb[100].mxu1  ;;  %v2787_v18 = vpop.f32.mrb[93].mxu0 }
 0x1a9   :  { %v7859_v16 = vadd.f32 %v7167_v49, %v3155_v48  ;;  %3886 = vadd.xlane.f32.xlu1 %v3675_v5  ;;  %v3674_v55 = vmul.f32 %v7578_v11, %v3539_v35  ;;  %v4316_v44 = vsel %vm4315_vm12, %v4314_v6, %v4309_v57  ;;  %v2793_v47 = vadd.f32 %v5880_v61, %v5680_v36  ;;  %v1698_v14 = vpop.f32.mrb[101].mxu1 }
 0x1aa   :  { %v3282_v26 = vadd.f32 %v3154_v3, %v7181_v23  ;;  %v4328_v59 = vrot.slane %v3991_v20, %v7744_v7  ;;  %v4321_v45 = vrot.slane %v3990_v15, %v7754_v2  ;;  %v2788_v27 = vadd.f32 %v2787_v18, %v1698_v14  ;;  %v5883_v51 = vpop.f32.mrb[94].mxu0 }
 0x1ab   :  { %3884 = vadd.xlane.f32.xlu0 %v3674_v55  ;;  %v3157_v37 = vadd.f32 %v7620_v10, %v2793_v47  ;;  %v3541_v48 = vmax.f32 %v3413_v41, 0.0  ;;  %v3414_v5 = vadd.f32 %v7564_v13, %v7830_v43  ;;  %v3751_v35 = vpop.xlane.xlu1 %3750  ;;  %v3749_v58 = vpop.xlane.xlu0 %3748  ;;  %v3415_v6 = vadd.f32 %v7564_v13, %v3280_v25 }
 0x1ac   :  { %v4323_v61 = vsel %vm4322_vm13, %v4321_v45, %v4316_v44  ;;  %v3156_v57 = vadd.f32 %v7620_v10, %v2788_v27  ;;  %v3993_v3 = vadd.f32 %v7641_v29, %v3751_v35  ;;  %v3992_v20 = vadd.f32 %v7641_v29, %v3749_v58  ;;  %v5683_v15 = vpop.f32.mrb[102].mxu1  ;;  %v2797_v36 = vpop.f32.mrb[95].mxu0 }
 0x1ad   :  { %v7875_v18 = vadd.f32 %v7198_v8, %v3157_v37  ;;  %v3676_v41 = vmul.f32 %v7578_v11, %v3541_v48  ;;  %v3542_v43 = vmax.f32 %v3414_v5, 0.0  ;;  %v4330_v55 = vsel %vm4329_vm14, %v4328_v59, %v4323_v61  ;;  %v1708_v47 = vpop.f32.mrb[103].mxu1 }
 0x1ae   :  { %v7880_v25 = vadd.f32 %v3156_v57, %v7210_v50  ;;  %v4342_v44 = vrot.slane %v3993_v3, %v7764_v19  ;;  %v4335_v14 = vrot.slane %v3992_v20, %v7768_v52  ;;  %v2803_v45 = vadd.f32 %v5883_v51, %v5683_v15  ;;  %v5886_v58 = vpop.f32.mrb[96].mxu0 }
 0x1af   :  { %3888 = vadd.xlane.f32.xlu1 %v3676_v41  ;;  %v3677_v27 = vmul.f32 %v7578_v11, %v3542_v43  ;;  %v2798_v37 = vadd.f32 %v2797_v36, %v1708_v47  ;;  %v3543_v35 = vmax.f32 %v3415_v6, 0.0  ;;  %v3416_v48 = vadd.f32 %v7564_v13, %v7844_v38  ;;  %v3755_v5 = vpop.xlane.xlu1 %3754  ;;  %v3753_v59 = vpop.xlane.xlu0 %3752 }
 0x1b0   :  { %v4337_v61 = vsel %vm4336_vm15, %v4335_v14, %v4330_v55  ;;  %v3159_v57 = vadd.f32 %v7620_v10, %v2803_v45  ;;  %v3995_v3 = vadd.f32 %v7641_v29, %v3755_v5  ;;  %v3994_v20 = vadd.f32 %v7641_v29, %v3753_v59  ;;  %v5686_v51 = vpop.f32.mrb[104].mxu1  ;;  %v2807_v15 = vpop.f32.mrb[97].mxu0 }
 0x1b1   :  { %3890 = vadd.xlane.f32.xlu0 %v3677_v27  ;;  %v7892_v41 = vsel %vm4343_vm0, %v4342_v44, %v4337_v61  ;;  %v3158_v6 = vadd.f32 %v7620_v10, %v2798_v37  ;;  %v3678_v13 = vmul.f32 %v7578_v11, %v3543_v35  ;;  %v3544_v38 = vmax.f32 %v3416_v48, 0.0  ;;  %v1718_v36 = vpop.f32.mrb[105].mxu1  ;;  %v7906_v37 = vld [vmem:[%s8504_s3] ss:$0 sm:$0xff] }
 0x1b2   :  { %v7897_v43 = vadd.f32 %v7228_v1, %v3159_v57  ;;  %v4352_v55 = vrot.slane %v3995_v3, %v7647_v56  ;;  %v4348_v47 = vrot.slane %v3994_v20, %v7658_v46  ;;  %v2813_v14 = vadd.f32 %v5886_v58, %v5686_v51  ;;  %v5889_v45 = vpop.f32.mrb[98].mxu0 }
 0x1b3   :  { %v3286_v27 = vadd.f32 %v3158_v6, %v7241_v34  ;;  %3892 = vadd.xlane.f32.xlu1 %v3678_v13  ;;  %v3679_v44 = vmul.f32 %v7578_v11, %v3544_v38  ;;  %v2808_v5 = vadd.f32 %v2807_v15, %v1718_v36  ;;  %v3417_v35 = vadd.f32 %v7906_v37, %v3282_v26  ;;  %v3759_v48 = vpop.xlane.xlu1 %3758  ;;  %v3757_v59 = vpop.xlane.xlu0 %3756 }
 0x1b4   :  { %v4353_v61 = vsel %vm4245_vm2, %v4352_v55, %v4348_v47  ;;  %v3161_v58 = vadd.f32 %v7620_v10, %v2813_v14  ;;  %v3418_v57 = vadd.f32 %v7906_v37, %v7859_v16  ;;  %v3997_v3 = vadd.f32 %v7641_v29, %v3759_v48  ;;  %v5689_v11 = vpop.f32.mrb[106].mxu1  ;;  %v2817_v20 = vpop.f32.mrb[99].mxu0 }
 0x1b5   :  { %3894 = vadd.xlane.f32.xlu0 %v3679_v44  ;;  %v3160_v51 = vadd.f32 %v7620_v10, %v2808_v5  ;;  %v3545_v15 = vmax.f32 %v3417_v35, 0.0  ;;  %v3996_v6 = vadd.f32 %v7641_v29, %v3757_v59  ;;  %v2823_v26 = vadd.f32 %v5889_v45, %v5689_v11  ;;  %v1728_v13 = vpop.f32.mrb[107].mxu1  ;;  %v7924_v44 = vld [vmem:[%s8505_s4] ss:$0 sm:$0xff]  ;;  %s6151_s4 = smov [#allocation3]  }
 0x1b6   :  { %v7917_v38 = vadd.f32 %v7258_v30, %v3161_v58  ;;  %v3546_v36 = vmax.f32 %v3418_v57, 0.0  ;;  %v4362_v55 = vrot.slane %v3997_v3, %v7668_v0  ;;  %v2818_v47 = vadd.f32 %v2817_v20, %v1728_v13  ;;  %v5892_v16 = vpop.f32.mrb[100].mxu0  ;;  %s4920_s27 = sshll.u32 %s6151_s4, 4  ;;  %s4921_s27 = int_to_ptr.vmem [resolvable:$true] %s4920_s27 }
 0x1b7   :  { %v3288_v14 = vadd.f32 %v3160_v51, %v7266_v17  ;;  %v3680_v10 = vmul.f32 %v7924_v44, %v3545_v15  ;;  %v4357_v45 = vrot.slane %v3996_v6, %v7672_v54  ;;  %v3163_v5 = vadd.f32 %v7628_v32, %v2823_v26  ;;  %v3763_v35 = vpop.xlane.xlu1 %3762  ;;  %v3761_v48 = vpop.xlane.xlu0 %3760  ;;  %s6123_s28 = scalar_lea.vmem %s4921_s27, 128  ;;  %p6128_p1 = scmp.lt.s32.totalorder %s4921_s27, %s4921_s27 }
 0x1b8   :  { %v3681_v59 = vmul.f32 %v7924_v44, %v3546_v36  ;;  %v3162_v58 = vadd.f32 %v7628_v32, %v2818_v47  ;;  %v3419_v57 = vadd.f32 %v7906_v37, %v7880_v25  ;;  %v3420_v3 = vadd.f32 %v7906_v37, %v7875_v18  ;;  %v5692_v11 = vpop.f32.mrb[108].mxu1  ;;  %v2827_v20 = vpop.f32.mrb[101].mxu0  ;;  %p6124_p0 = scmp.ne.s32.totalorder %s4921_s27, %s6123_s28  ;;  %p6129_p2 = scmp.lt.s32.totalorder %s6123_s28, %s6123_s28 }
 0x1b9   :  { %3896 = vadd.xlane.f32.xlu1 %v3680_v10  ;;  %v4358_v51 = vsel %vm4252_vm3, %v4357_v45, %v4353_v61  ;;  %v7937_v15 = vadd.f32 %v7050_v60, %v3163_v5  ;;  %v3999_v6 = vadd.f32 %v7641_v29, %v3763_v35  ;;  %v3998_v26 = vadd.f32 %v7641_v29, %v3761_v48  ;;  %v1738_v13 = vpop.f32.mrb[109].mxu1 }
 0x1ba   :  { %3898 = vadd.xlane.f32.xlu0 %v3681_v59  ;;  %v7942_v36 = vadd.f32 %v3162_v58, %v7060_v33  ;;  %v3547_v25 = vmax.f32 %v3419_v57, 0.0  ;;  %v3548_v47 = vmax.f32 %v3420_v3, 0.0  ;;  %v4363_v18 = vsel %vm4259_vm4, %v4362_v55, %v4358_v51  ;;  %v5895_v17 = vpop.f32.mrb[102].mxu0  ;;  %p6130_p3 = por %p6129_p2, %p6128_p1 }
 0x1bb   :  { %v4372_v10 = vrot.slane %v3999_v6, %v7690_v63  ;;  %v4367_v61 = vrot.slane %v3998_v26, %v7680_v24  ;;  %v2833_v45 = vadd.f32 %v5892_v16, %v5692_v11  ;;  %v2828_v5 = vadd.f32 %v2827_v20, %v1738_v13  ;;  %v3767_v60 = vpop.xlane.xlu1 %3766  ;;  %v3765_v35 = vpop.xlane.xlu0 %3764 }
 0x1bc   :  { %v3682_v48 = vmul.f32 %v7924_v44, %v3547_v25  ;;  %v3683_v59 = vmul.f32 %v7924_v44, %v3548_v47  ;;  %v3421_v58 = vadd.f32 %v7906_v37, %v3286_v27  ;;  %v3422_v57 = vadd.f32 %v7906_v37, %v7897_v43  ;;  %v5695_v3 = vpop.f32.mrb[110].mxu1  ;;  %v2837_v55 = vpop.f32.mrb[103].mxu0  ;;  %p6131_p4 = pnand %p6130_p3, %p6124_p0 }
 0x1bd   :  { %v4368_v51 = vsel %vm4266_vm5, %v4367_v61, %v4363_v18  ;;  %v3165_v6 = vadd.f32 %v7628_v32, %v2833_v45  ;;  %v3164_v16 = vadd.f32 %v7628_v32, %v2828_v5  ;;  %v4001_v11 = vadd.f32 %v7641_v29, %v3767_v60  ;;  %v1748_v20 = vpop.f32.mrb[111].mxu1 }
 0x1be   :  { %3900 = vadd.xlane.f32.xlu1 %v3682_v48  ;;  %3902 = vadd.xlane.f32.xlu0 %v3683_v59  ;;  %v3549_v26 = vmax.f32 %v3421_v58, 0.0  ;;  %v3550_v13 = vmax.f32 %v3422_v57, 0.0  ;;  %v4373_v27 = vsel %vm4273_vm6, %v4372_v10, %v4368_v51  ;;  %v4000_v25 = vadd.f32 %v7641_v29, %v3765_v35  ;;  %v5898_v43 = vpop.f32.mrb[104].mxu0 }
 0x1bf   :  { %v7959_v47 = vadd.f32 %v7076_v40, %v3165_v6  ;;  %v7962_v18 = vadd.f32 %v3164_v16, %v7086_v12  ;;  %v4382_v61 = vrot.slane %v4001_v11, %v7700_v21  ;;  %v2843_v45 = vadd.f32 %v5895_v17, %v5695_v3  ;;  %v3771_v60 = vpop.xlane.xlu1 %3770  ;;  %v3769_v5 = vpop.xlane.xlu0 %3768 }
 0x1c0   :  { %v3684_v48 = vmul.f32 %v7924_v44, %v3549_v26  ;;  %v3685_v59 = vmul.f32 %v7924_v44, %v3550_v13  ;;  %v4377_v10 = vrot.slane %v4000_v25, %v7704_v28  ;;  %v2838_v58 = vadd.f32 %v2837_v55, %v1748_v20  ;;  %v5698_v35 = vpop.f32.mrb[112].mxu1  ;;  %v2847_v57 = vpop.f32.mrb[105].mxu0 }
 0x1c1   :  { %v3167_v51 = vadd.f32 %v7628_v32, %v2843_v45  ;;  %v3423_v6 = vadd.f32 %v7906_v37, %v3288_v14  ;;  %v3424_v16 = vadd.f32 %v7906_v37, %v7917_v38  ;;  %v4003_v17 = vadd.f32 %v7641_v29, %v3771_v60  ;;  %v1758_v3 = vpop.f32.mrb[113].mxu1 }
 0x1c2   :  { %3904 = vadd.xlane.f32.xlu1 %v3684_v48  ;;  %3906 = vadd.xlane.f32.xlu0 %v3685_v59  ;;  %v4378_v11 = vsel %vm4280_vm7, %v4377_v10, %v4373_v27  ;;  %v3166_v26 = vadd.f32 %v7628_v32, %v2838_v58  ;;  %v4002_v55 = vadd.f32 %v7641_v29, %v3769_v5  ;;  %v5901_v20 = vpop.f32.mrb[106].mxu0 }
 0x1c3   :  { %v7977_v13 = vadd.f32 %v7102_v39, %v3167_v51  ;;  %v3551_v25 = vmax.f32 %v3423_v6, 0.0  ;;  %v3552_v14 = vmax.f32 %v3424_v16, 0.0  ;;  %v4392_v45 = vrot.slane %v4003_v17, %v7712_v22  ;;  %v3775_v38 = vpop.xlane.xlu1 %3774  ;;  %v3773_v28 = vpop.xlane.xlu0 %3772 }
 0x1c4   :  { %v3294_v60 = vadd.f32 %v3166_v26, %v7116_v4  ;;  %v4383_v48 = vsel %vm4287_vm8, %v4382_v61, %v4378_v11  ;;  %v4387_v27 = vrot.slane %v4002_v55, %v7722_v9  ;;  %v2853_v59 = vadd.f32 %v5898_v43, %v5698_v35  ;;  %v5701_v10 = vpop.f32.mrb[114].mxu1  ;;  %v2857_v58 = vpop.f32.mrb[107].mxu0 }
 0x1c5   :  { %v3686_v5 = vmul.f32 %v7924_v44, %v3551_v25  ;;  %v3687_v51 = vmul.f32 %v7924_v44, %v3552_v14  ;;  %v2848_v39 = vadd.f32 %v2847_v57, %v1758_v3  ;;  %v3425_v6 = vadd.f32 %v7906_v37, %v7942_v36  ;;  %v1768_v16 = vpop.f32.mrb[115].mxu1 }
 0x1c6   :  { %v4388_v17 = vsel %vm4294_vm9, %v4387_v27, %v4383_v48  ;;  %v3169_v26 = vadd.f32 %v7628_v32, %v2853_v59  ;;  %v3426_v61 = vadd.f32 %v7906_v37, %v7937_v15  ;;  %v4005_v43 = vadd.f32 %v7641_v29, %v3775_v38  ;;  %v5904_v35 = vpop.f32.mrb[108].mxu0 }
 0x1c7   :  { %3908 = vadd.xlane.f32.xlu1 %v3686_v5  ;;  %3910 = vadd.xlane.f32.xlu0 %v3687_v51  ;;  %v3168_v11 = vadd.f32 %v7628_v32, %v2848_v39  ;;  %v3553_v55 = vmax.f32 %v3425_v6, 0.0  ;;  %v4393_v57 = vsel %vm4301_vm10, %v4392_v45, %v4388_v17  ;;  %v4004_v36 = vadd.f32 %v7641_v29, %v3773_v28  ;;  %v3779_v3 = vpop.xlane.xlu1 %3778  ;;  %v3777_v25 = vpop.xlane.xlu0 %3776 }
 0x1c8   :  { %v7996_v14 = vadd.f32 %v7134_v31, %v3169_v26  ;;  %v3554_v48 = vmax.f32 %v3426_v61, 0.0  ;;  %v4402_v15 = vrot.slane %v4005_v43, %v7732_v53  ;;  %v2863_v27 = vadd.f32 %v5901_v20, %v5701_v10  ;;  %v5704_v38 = vpop.f32.mrb[116].mxu1  ;;  %v2867_v59 = vpop.f32.mrb[109].mxu0 }
 0x1c9   :  { %v3296_v5 = vadd.f32 %v3168_v11, %v7148_v42  ;;  %v3688_v39 = vmul.f32 %v7924_v44, %v3553_v55  ;;  %v4397_v51 = vrot.slane %v4004_v36, %v7736_v62  ;;  %v2858_v45 = vadd.f32 %v2857_v58, %v1768_v16  ;;  %v1778_v6 = vpop.f32.mrb[117].mxu1 }
 0x1ca   :  { %v3689_v28 = vmul.f32 %v7924_v44, %v3554_v48  ;;  %v3171_v17 = vadd.f32 %v7628_v32, %v2863_v27  ;;  %v3428_v26 = vadd.f32 %v7906_v37, %v7959_v47  ;;  %v4007_v61 = vadd.f32 %v7641_v29, %v3779_v3  ;;  %v5907_v20 = vpop.f32.mrb[110].mxu0 }
 0x1cb   :  { %3912 = vadd.xlane.f32.xlu1 %v3688_v39  ;;  %v4398_v10 = vsel %vm4308_vm11, %v4397_v51, %v4393_v57  ;;  %v3170_v43 = vadd.f32 %v7628_v32, %v2858_v45  ;;  %v4006_v11 = vadd.f32 %v7641_v29, %v3777_v25  ;;  %v2873_v58 = vadd.f32 %v5904_v35, %v5704_v38  ;;  %v3783_v16 = vpop.xlane.xlu1 %3782  ;;  %v3781_v55 = vpop.xlane.xlu0 %3780 }
 0x1cc   :  { %3914 = vadd.xlane.f32.xlu0 %v3689_v28  ;;  %v8011_v36 = vadd.f32 %v7167_v49, %v3171_v17  ;;  %v3556_v48 = vmax.f32 %v3428_v26, 0.0  ;;  %v4412_v47 = vrot.slane %v4007_v61, %v7744_v7  ;;  %v4403_v3 = vsel %vm4315_vm12, %v4402_v15, %v4398_v10  ;;  %v5707_v27 = vpop.f32.mrb[118].mxu1  ;;  %v2877_v39 = vpop.f32.mrb[111].mxu0 }
 0x1cd   :  { %v3298_v57 = vadd.f32 %v3170_v43, %v7181_v23  ;;  %v4407_v51 = vrot.slane %v4006_v11, %v7754_v2  ;;  %v3173_v25 = vadd.f32 %v7628_v32, %v2873_v58  ;;  %v2868_v35 = vadd.f32 %v2867_v59, %v1778_v6  ;;  %v1788_v38 = vpop.f32.mrb[119].mxu1 }
 0x1ce   :  { %v3691_v45 = vmul.f32 %v7924_v44, %v3556_v48  ;;  %v3429_v28 = vadd.f32 %v7906_v37, %v3294_v60  ;;  %v3427_v17 = vadd.f32 %v7906_v37, %v7962_v18  ;;  %v4009_v26 = vadd.f32 %v7641_v29, %v3783_v16  ;;  %v5910_v15 = vpop.f32.mrb[112].mxu0 }
 0x1cf   :  { %v4408_v61 = vsel %vm4322_vm13, %v4407_v51, %v4403_v3  ;;  %v8025_v10 = vadd.f32 %v7198_v8, %v3173_v25  ;;  %v3172_v43 = vadd.f32 %v7628_v32, %v2868_v35  ;;  %v4008_v59 = vadd.f32 %v7641_v29, %v3781_v55  ;;  %v3787_v6 = vpop.xlane.xlu1 %3786  ;;  %v3785_v11 = vpop.xlane.xlu0 %3784 }
 0x1d0   :  { %3918 = vadd.xlane.f32.xlu0 %v3691_v45  ;;  %v3557_v58 = vmax.f32 %v3429_v28, 0.0  ;;  %v3555_v60 = vmax.f32 %v3427_v17, 0.0  ;;  %v4422_v48 = vrot.slane %v4009_v26, %v7764_v19  ;;  %v4413_v18 = vsel %vm4329_vm14, %v4412_v47, %v4408_v61  ;;  %v5710_v16 = vpop.f32.mrb[120].mxu1  ;;  %v2887_v2 = vpop.f32.mrb[113].mxu0 }
 0x1d1   :  { %v3300_v3 = vadd.f32 %v3172_v43, %v7210_v50  ;;  %v4417_v51 = vrot.slane %v4008_v59, %v7768_v52  ;;  %v2883_v25 = vadd.f32 %v5907_v20, %v5707_v27  ;;  %v2878_v8 = vadd.f32 %v2877_v39, %v1788_v38  ;;  %v1798_v35 = vpop.f32.mrb[121].mxu1 }
 0x1d2   :  { %v3692_v55 = vmul.f32 %v7924_v44, %v3557_v58  ;;  %v3690_v23 = vmul.f32 %v7924_v44, %v3555_v60  ;;  %v3431_v45 = vadd.f32 %v7906_v37, %v3296_v5  ;;  %v3430_v28 = vadd.f32 %v7906_v37, %v7977_v13  ;;  %v5913_v17 = vpop.f32.mrb[114].mxu0 }
 0x1d3   :  { %v4418_v47 = vsel %vm4336_vm15, %v4417_v51, %v4413_v18  ;;  %v3175_v26 = vadd.f32 %v7628_v32, %v2883_v25  ;;  %v3174_v61 = vadd.f32 %v7628_v32, %v2878_v8  ;;  %v4011_v20 = vadd.f32 %v7641_v29, %v3787_v6  ;;  %v3791_v27 = vpop.xlane.xlu1 %3790  ;;  %v3789_v39 = vpop.xlane.xlu0 %3788 }
 0x1d4   :  { %3920 = vadd.xlane.f32.xlu1 %v3692_v55  ;;  %3916 = vadd.xlane.f32.xlu0 %v3690_v23  ;;  %v4423_v38 = vsel %vm4343_vm0, %v4422_v48, %v4418_v47  ;;  %v3559_v43 = vmax.f32 %v3431_v45, 0.0  ;;  %v3558_v5 = vmax.f32 %v3430_v28, 0.0  ;;  %v4010_v59 = vadd.f32 %v7641_v29, %v3785_v11  ;;  %v5713_v13 = vpop.f32.mrb[122].mxu1  ;;  %v2897_v58 = vpop.f32.mrb[115].mxu0 }
 0x1d5   :  { %v8046_v60 = vsel %vm4898_vm1, %v4423_v38, %v7892_v41  ;;  %v8049_v8 = vadd.f32 %v7228_v1, %v3175_v26  ;;  %v8052_v6 = vadd.f32 %v3174_v61, %v7241_v34  ;;  %v4431_v23 = vrot.slane %v4011_v20, %v7647_v56  ;;  %v1808_v18 = vpop.f32.mrb[123].mxu1 }
 0x1d6   :  { %v3694_v48 = vmul.f32 %v7924_v44, %v3559_v43  ;;  %v3693_v51 = vmul.f32 %v7924_v44, %v3558_v5  ;;  %v4427_v11 = vrot.slane %v4010_v59, %v7658_v46  ;;  %v2893_v25 = vadd.f32 %v5910_v15, %v5710_v16  ;;  %v5916_v55 = vpop.f32.mrb[116].mxu0 }
 0x1d7   :  { %v2888_v45 = vadd.f32 %v2887_v2, %v1798_v35  ;;  %v3433_v41 = vadd.f32 %v7906_v37, %v3298_v57  ;;  %v3432_v28 = vadd.f32 %v7906_v37, %v7996_v14  ;;  %v4013_v47 = vadd.f32 %v7641_v29, %v3791_v27  ;;  %v3795_v26 = vpop.xlane.xlu1 %3794  ;;  %v3793_v61 = vpop.xlane.xlu0 %3792 }
 0x1d8   :  { %3924 = vadd.xlane.f32.xlu1 %v3694_v48  ;;  %3922 = vadd.xlane.f32.xlu0 %v3693_v51  ;;  %v4432_v20 = vsel %vm4245_vm2, %v4431_v23, %v4427_v11  ;;  %v3177_v38 = vadd.f32 %v7628_v32, %v2893_v25  ;;  %v4012_v43 = vadd.f32 %v7641_v29, %v3789_v39  ;;  %v5716_v15 = vpop.f32.mrb[124].mxu1  ;;  %v2907_v16 = vpop.f32.mrb[117].mxu0  ;;  %v8536_v11 = vld [vmem:[#allocation11_spill] sm:$0xff]  ;;  %vm4900_vm1 = vcmask 1042434  }
 0x1d9   :  { %v3176_v2 = vadd.f32 %v7628_v32, %v2888_v45  ;;  %v3561_v57 = vmax.f32 %v3433_v41, 0.0  ;;  %v3560_v35 = vmax.f32 %v3432_v28, 0.0  ;;  %v4441_v14 = vrot.slane %v4013_v47, %v7668_v0  ;;  %v1818_v5 = vpop.f32.mrb[125].mxu1  ;;  %v8537_v47 = vld [vmem:[#allocation12_spill] sm:$0xff] }
 0x1da   :  { %v3305_v27 = vadd.f32 %v7258_v30, %v3177_v38  ;;  %v4436_v59 = vrot.slane %v4012_v43, %v7672_v54  ;;  %v2903_v48 = vadd.f32 %v5913_v17, %v5713_v13  ;;  %v2898_v51 = vadd.f32 %v2897_v58, %v1808_v18  ;;  %v5919_v23 = vpop.f32.mrb[118].mxu0 }
 0x1db   :  { %v8070_v25 = vadd.f32 %v3176_v2, %v8536_v11  ;;  %v3696_v39 = vmul.f32 %v7924_v44, %v3561_v57  ;;  %v3695_v46 = vmul.f32 %v7924_v44, %v3560_v35  ;;  %v3435_v32 = vadd.f32 %v7906_v37, %v3300_v3  ;;  %v3799_v45 = vpop.xlane.xlu1 %3798  ;;  %v3797_v41 = vpop.xlane.xlu0 %3796 }
 0x1dc   :  { %v4437_v28 = vsel %vm4252_vm3, %v4436_v59, %v4432_v20  ;;  %v3179_v38 = vadd.f32 %v8537_v47, %v2903_v48  ;;  %v3178_v43 = vadd.f32 %v8537_v47, %v2898_v51  ;;  %v3434_v17 = vadd.f32 %v7906_v37, %v8011_v36  ;;  %v5719_v13 = vpop.f32.mrb[126].mxu1  ;;  %v2917_v58 = vpop.f32.mrb[119].mxu0  ;;  %v8538_v20 = vld [vmem:[#allocation7_spill] sm:$0xff] }
 0x1dd   :  { %3928 = vadd.xlane.f32.xlu1 %v3696_v39  ;;  %3926 = vadd.xlane.f32.xlu0 %v3695_v46  ;;  %v3563_v18 = vmax.f32 %v3435_v32, 0.0  ;;  %v4015_v2 = vadd.f32 %v7641_v29, %v3795_v26  ;;  %v4442_v3 = vsel %vm4259_vm4, %v4441_v14, %v4437_v28  ;;  %v4014_v57 = vadd.f32 %v7641_v29, %v3793_v61  ;;  %v1828_v35 = vpop.f32.mrb[127].mxu1 }
 0x1de   :  { %v8084_v59 = vadd.f32 %v8538_v20, %v3179_v38  ;;  %v8087_v48 = vadd.f32 %v3178_v43, %v7060_v33  ;;  %v3562_v51 = vmax.f32 %v3434_v17, 0.0  ;;  %v2913_v36 = vadd.f32 %v5916_v55, %v5716_v15  ;;  %v5922_v11 = vpop.f32.mrb[120].mxu0 }
 0x1df   :  { %v3698_v39 = vmul.f32 %v7924_v44, %v3563_v18  ;;  %v4451_v46 = vrot.slane %v4015_v2, %v7690_v63  ;;  %v4446_v26 = vrot.slane %v4014_v57, %v7680_v24  ;;  %v2908_v32 = vadd.f32 %v2907_v16, %v1818_v5  ;;  %v3803_v14 = vpop.xlane.xlu1 %3802  ;;  %v3801_v28 = vpop.xlane.xlu0 %3800 }
 0x1e0   :  { %v3697_v61 = vmul.f32 %v7924_v44, %v3562_v51  ;;  %v3181_v38 = vadd.f32 %v8537_v47, %v2913_v36  ;;  %v3437_v33 = vadd.f32 %v7906_v37, %v8052_v6  ;;  %v3436_v55 = vadd.f32 %v7906_v37, %v8025_v10  ;;  %v5722_v15 = vpop.f32.mrb[128].mxu1  ;;  %v2927_v43 = vpop.f32.mrb[121].mxu0 }
 0x1e1   :  { %3932 = vadd.xlane.f32.xlu1 %v3698_v39  ;;  %v4447_v17 = vsel %vm4266_vm5, %v4446_v26, %v4442_v3  ;;  %v3180_v18 = vadd.f32 %v8537_v47, %v2908_v32  ;;  %v4017_v16 = vadd.f32 %v7641_v29, %v3799_v45  ;;  %v4016_v5 = vadd.f32 %v7641_v29, %v3797_v41  ;;  %v1838_v2 = vpop.f32.mrb[129].mxu1  ;;  %v8539_v39 = vld [vmem:[#allocation13_spill] sm:$0xff] }
 0x1e2   :  { %3930 = vadd.xlane.f32.xlu0 %v3697_v61  ;;  %v8103_v57 = vadd.f32 %v7076_v40, %v3181_v38  ;;  %v3565_v6 = vmax.f32 %v3437_v33, 0.0  ;;  %v3564_v20 = vmax.f32 %v3436_v55, 0.0  ;;  %v4452_v10 = vsel %vm4273_vm6, %v4451_v46, %v4447_v17  ;;  %v5925_v51 = vpop.f32.mrb[122].mxu0 }
 0x1e3   :  { %v8107_v36 = vadd.f32 %v3180_v18, %v7086_v12  ;;  %v4461_v3 = vrot.slane %v4017_v16, %v7700_v21  ;;  %v4456_v26 = vrot.slane %v4016_v5, %v8539_v39  ;;  %v2923_v45 = vadd.f32 %v5919_v23, %v5719_v13  ;;  %v3807_v32 = vpop.xlane.xlu1 %3806  ;;  %v3805_v41 = vpop.xlane.xlu0 %3804 }
 0x1e4   :  { %v3700_v61 = vmul.f32 %v7924_v44, %v3565_v6  ;;  %v3699_v40 = vmul.f32 %v7924_v44, %v3564_v20  ;;  %v2918_v38 = vadd.f32 %v2917_v58, %v1828_v35  ;;  %v3440_v33 = vadd.f32 %v7906_v37, %v3305_v27  ;;  %v5725_v55 = vpop.f32.mrb[130].mxu1  ;;  %v2937_v46 = vpop.f32.mrb[123].mxu0  ;;  %v8540_v6 = vld [vmem:[#allocation8_spill] sm:$0xff] }
 0x1e5   :  { %v4457_v17 = vsel %vm4280_vm7, %v4456_v26, %v4452_v10  ;;  %v3183_v12 = vadd.f32 %v8537_v47, %v2923_v45  ;;  %v3438_v18 = vadd.f32 %v7906_v37, %v8049_v8  ;;  %v4019_v23 = vadd.f32 %v7641_v29, %v3803_v14  ;;  %v1848_v13 = vpop.f32.mrb[131].mxu1 }
 0x1e6   :  { %3936 = vadd.xlane.f32.xlu1 %v3700_v61  ;;  %3934 = vadd.xlane.f32.xlu0 %v3699_v40  ;;  %v3182_v16 = vadd.f32 %v8537_v47, %v2918_v38  ;;  %v3568_v5 = vmax.f32 %v3440_v33, 0.0  ;;  %v4462_v58 = vsel %vm4287_vm8, %v4461_v3, %v4457_v17  ;;  %v4018_v27 = vadd.f32 %v7641_v29, %v3801_v28  ;;  %v5928_v35 = vpop.f32.mrb[124].mxu0 }
 0x1e7   :  { %v8123_v20 = vadd.f32 %v8540_v6, %v3183_v12  ;;  %v3566_v10 = vmax.f32 %v3438_v18, 0.0  ;;  %v4471_v26 = vrot.slane %v4019_v23, %v7712_v22  ;;  %v2933_v8 = vadd.f32 %v5922_v11, %v5722_v15  ;;  %v3811_v45 = vpop.xlane.xlu1 %3810  ;;  %v3809_v14 = vpop.xlane.xlu0 %3808 }
 0x1e8   :  { %v8127_v61 = vadd.f32 %v3182_v16, %v7116_v4  ;;  %v3703_v40 = vmul.f32 %v7924_v44, %v3568_v5  ;;  %v4466_v38 = vrot.slane %v4018_v27, %v7722_v9  ;;  %v2928_v3 = vadd.f32 %v2927_v43, %v1838_v2  ;;  %v5728_v33 = vpop.f32.mrb[132].mxu1  ;;  %v2947_v28 = vpop.f32.mrb[125].mxu0 }
 0x1e9   :  { %v3701_v17 = vmul.f32 %v7924_v44, %v3566_v10  ;;  %v3185_v12 = vadd.f32 %v8537_v47, %v2933_v8  ;;  %v3439_v18 = vadd.f32 %v7906_v37, %v8070_v25  ;;  %v3442_v11 = vadd.f32 %v7906_v37, %v8084_v59  ;;  %v1858_v15 = vpop.f32.mrb[133].mxu1 }
 0x1ea   :  { %3942 = vadd.xlane.f32.xlu1 %v3703_v40  ;;  %v4467_v4 = vsel %vm4294_vm9, %v4466_v38, %v4462_v58  ;;  %v3184_v23 = vadd.f32 %v8537_v47, %v2928_v3  ;;  %v4021_v43 = vadd.f32 %v7641_v29, %v3807_v32  ;;  %v4020_v2 = vadd.f32 %v7641_v29, %v3805_v41  ;;  %v8141_v16 = vpop.f32.mrb[126].mxu0 }
 0x1eb   :  { %3938 = vadd.xlane.f32.xlu0 %v3701_v17  ;;  %v8144_v5 = vadd.f32 %v7134_v31, %v3185_v12  ;;  %v3567_v25 = vmax.f32 %v3439_v18, 0.0  ;;  %v3570_v27 = vmax.f32 %v3442_v11, 0.0  ;;  %v4472_v59 = vsel %vm4301_vm10, %v4471_v26, %v4467_v4  ;;  %v3815_v6 = vpop.xlane.xlu1 %3814  ;;  %v3813_v10 = vpop.xlane.xlu0 %3812 }
 0x1ec   :  { %v8148_v58 = vadd.f32 %v3184_v23, %v7148_v42  ;;  %v4481_v8 = vrot.slane %v4021_v43, %v7732_v53  ;;  %v4476_v32 = vrot.slane %v4020_v2, %v7736_v62  ;;  %v2943_v41 = vadd.f32 %v5925_v51, %v5725_v55  ;;  %v5731_v40 = vpop.f32.mrb[134].mxu1  ;;  %v2957_v38 = vpop.f32.mrb[127].mxu0 }
 0x1ed   :  { %v3702_v3 = vmul.f32 %v7924_v44, %v3567_v25  ;;  %v3705_v31 = vmul.f32 %v7924_v44, %v3570_v27  ;;  %v2938_v17 = vadd.f32 %v2937_v46, %v1848_v13  ;;  %v3441_v26 = vadd.f32 %v7906_v37, %v8087_v48  ;;  %v1868_v12 = vpop.f32.mrb[135].mxu1 }
 0x1ee   :  { %v4477_v18 = vsel %vm4308_vm11, %v4476_v32, %v4472_v59  ;;  %v3187_v42 = vadd.f32 %v8537_v47, %v2943_v41  ;;  %v3444_v11 = vadd.f32 %v7906_v37, %v8103_v57  ;;  %v4023_v51 = vadd.f32 %v7641_v29, %v3811_v45  ;;  %v8161_v55 = vpop.f32.mrb[128].mxu0  ;;  %v8541_v32 = vld [vmem:[#allocation9_spill] sm:$0xff] }
 0x1ef   :  { %3940 = vadd.xlane.f32.xlu1 %v3702_v3  ;;  %3946 = vadd.xlane.f32.xlu0 %v3705_v31  ;;  %v3186_v46 = vadd.f32 %v8537_v47, %v2938_v17  ;;  %v3569_v13 = vmax.f32 %v3441_v26, 0.0  ;;  %v4482_v48 = vsel %vm4315_vm12, %v4481_v8, %v4477_v18  ;;  %v4022_v4 = vadd.f32 %v7641_v29, %v3809_v14  ;;  %v3819_v23 = vpop.xlane.xlu1 %3818  ;;  %v3817_v43 = vpop.xlane.xlu0 %3816  ;;  %v8542_v31 = vld [vmem:[#allocation14_spill] sm:$0xff] }
 0x1f0   :  { %v3315_v2 = vadd.f32 %v7167_v49, %v3187_v42  ;;  %v3572_v25 = vmax.f32 %v3444_v11, 0.0  ;;  %v4491_v57 = vrot.slane %v4023_v51, %v7744_v7  ;;  %v2953_v45 = vadd.f32 %v5928_v35, %v5728_v33  ;;  %v5734_v27 = vpop.f32.mrb[136].mxu1  ;;  %v2967_v59 = vpop.f32.mrb[129].mxu0 }
 0x1f1   :  { %v8169_v41 = vadd.f32 %v3186_v46, %v8541_v32  ;;  %v3704_v3 = vmul.f32 %v7924_v44, %v3569_v13  ;;  %v4486_v17 = vrot.slane %v4022_v4, %v8542_v31  ;;  %v2948_v8 = vadd.f32 %v2947_v28, %v1858_v15  ;;  %v1878_v26 = vpop.f32.mrb[137].mxu1  ;;  %v8543_v46 = vld [vmem:[#allocation10_spill] sm:$0xff] }
 0x1f2   :  { %v3707_v14 = vmul.f32 %v7924_v44, %v3572_v25  ;;  %v3189_v18 = vadd.f32 %v8537_v47, %v2953_v45  ;;  %v3443_v49 = vadd.f32 %v7906_v37, %v8107_v36  ;;  %v3446_v35 = vadd.f32 %v7906_v37, %v8123_v20 }
 0x1f3   :  { %3944 = vadd.xlane.f32.xlu1 %v3704_v3  ;;  %v4487_v33 = vsel %vm4322_vm13, %v4486_v17, %v4482_v48  ;;  %v3188_v42 = vadd.f32 %v8537_v47, %v2948_v8  ;;  %v4025_v11 = vadd.f32 %v7641_v29, %v3815_v6  ;;  %v4024_v28 = vadd.f32 %v7641_v29, %v3813_v10  ;;  %v3823_v15 = vpop.xlane.xlu1 %3822  ;;  %v3821_v51 = vpop.xlane.xlu0 %3820 }
 0x1f4   :  { %3950 = vadd.xlane.f32.xlu0 %v3707_v14  ;;  %v3317_v13 = vadd.f32 %v8543_v46, %v3189_v18  ;;  %v3571_v4 = vmax.f32 %v3443_v49, 0.0  ;;  %v3574_v25 = vmax.f32 %v3446_v35, 0.0  ;;  %v4492_v36 = vsel %vm4329_vm14, %v4491_v57, %v4487_v33 }
 0x1f5   :  { %v8186_v20 = vadd.f32 %v3188_v42, %v7210_v50  ;;  %v4501_v48 = vrot.slane %v4025_v11, %v7764_v19  ;;  %v4496_v45 = vrot.slane %v4024_v28, %v7768_v52  ;;  %v2963_v6 = vadd.f32 %v8141_v16, %v5731_v40  ;;  %v8544_v11 = vld [vmem:[#allocation6_spill] sm:$0xff] }
 0x1f6   :  { %v3706_v10 = vmul.f32 %v7924_v44, %v3571_v4  ;;  %v3709_v32 = vmul.f32 %v7924_v44, %v3574_v25  ;;  %v2958_v3 = vadd.f32 %v2957_v38, %v1868_v12  ;;  %v3445_v17 = vadd.f32 %v7906_v37, %v8127_v61 }
 0x1f7   :  { %v4497_v8 = vsel %vm4336_vm15, %v4496_v45, %v4492_v36  ;;  %v3191_v57 = vadd.f32 %v8537_v47, %v2963_v6  ;;  %v3448_v50 = vadd.f32 %v7906_v37, %v8144_v5  ;;  %v4027_v14 = vadd.f32 %v7641_v29, %v3819_v23  ;;  %v3827_v18 = vpop.xlane.xlu1 %3826  ;;  %v3825_v49 = vpop.xlane.xlu0 %3824 }
 0x1f8   :  { %3948 = vadd.xlane.f32.xlu1 %v3706_v10  ;;  %3954 = vadd.xlane.f32.xlu0 %v3709_v32  ;;  %v4502_v16 = vsel %vm4343_vm0, %v4501_v48, %v4497_v8  ;;  %v3190_v40 = vadd.f32 %v8537_v47, %v2958_v3  ;;  %v3573_v38 = vmax.f32 %v3445_v17, 0.0  ;;  %v4026_v61 = vadd.f32 %v7641_v29, %v3817_v43  ;;  %v8545_v3 = vld [vmem:[#allocation11_spill] sm:$0xff] }
 0x1f9   :  { %v8205_v12 = vsel %vm4900_vm1, %v4502_v16, %v8046_v60  ;;  %v3319_v35 = vadd.f32 %v7228_v1, %v3191_v57  ;;  %v3576_v5 = vmax.f32 %v3448_v50, 0.0  ;;  %v4510_v23 = vrot.slane %v4027_v14, %v7647_v56 }
 0x1fa   :  { %v3318_v33 = vadd.f32 %v3190_v40, %v7241_v34  ;;  %v3708_v42 = vmul.f32 %v7924_v44, %v3573_v38  ;;  %v4506_v28 = vrot.slane %v4026_v61, %v8544_v11  ;;  %v2973_v46 = vadd.f32 %v8161_v55, %v5734_v27 }
 0x1fb   :  { %v3711_v4 = vmul.f32 %v7924_v44, %v3576_v5  ;;  %v2968_v43 = vadd.f32 %v2967_v59, %v1878_v26  ;;  %v3447_v60 = vadd.f32 %v7906_v37, %v8148_v58  ;;  %v3450_v25 = vadd.f32 %v7906_v37, %v3315_v2  ;;  %v3831_v1 = vpop.xlane.xlu1 %3830  ;;  %v3829_v36 = vpop.xlane.xlu0 %3828 }
 0x1fc   :  { %3952 = vadd.xlane.f32.xlu1 %v3708_v42  ;;  %v4511_v48 = vsel %vm4245_vm2, %v4510_v23, %v4506_v28  ;;  %v3193_v34 = vadd.f32 %v8537_v47, %v2973_v46  ;;  %v4029_v45 = vadd.f32 %v7641_v29, %v3823_v15  ;;  %v4028_v6 = vadd.f32 %v7641_v29, %v3821_v51 }
 0x1fd   :  { %3958 = vadd.xlane.f32.xlu0 %v3711_v4  ;;  %v3192_v55 = vadd.f32 %v8537_v47, %v2968_v43  ;;  %v3575_v27 = vmax.f32 %v3447_v60, 0.0  ;;  %v3578_v59 = vmax.f32 %v3450_v25, 0.0  ;;  %v3449_v58 = vadd.f32 %v7906_v37, %v8169_v41 }
 0x1fe   :  { %v3321_v2 = vadd.f32 %v7258_v30, %v3193_v34  ;;  %v4520_v26 = vrot.slane %v4029_v45, %v7668_v0  ;;  %v4515_v10 = vrot.slane %v4028_v6, %v7672_v54  ;;  %v3452_v32 = vadd.f32 %v7906_v37, %v3317_v13 }
 0x1ff   :  { %v3320_v15 = vadd.f32 %v3192_v55, %v8545_v3  ;;  %v3710_v51 = vmul.f32 %v7924_v44, %v3575_v27  ;;  %v3713_v17 = vmul.f32 %v7924_v44, %v3578_v59  ;;  %v3577_v47 = vmax.f32 %v3449_v58, 0.0  ;;  %v3835_v8 = vpop.xlane.xlu1 %3834  ;;  %v3833_v57 = vpop.xlane.xlu0 %3832 }
 0x200   :  { %v4516_v50 = vsel %vm4252_vm3, %v4515_v10, %v4511_v48  ;;  %v3580_v41 = vmax.f32 %v3452_v32, 0.0  ;;  %v4031_v30 = vadd.f32 %v7641_v29, %v3827_v18  ;;  %v4030_v14 = vadd.f32 %v7641_v29, %v3825_v49 }
 0x201   :  { %3956 = vadd.xlane.f32.xlu1 %v3710_v51  ;;  %3962 = vadd.xlane.f32.xlu0 %v3713_v17  ;;  %v3712_v13 = vmul.f32 %v7924_v44, %v3577_v47  ;;  %v4521_v16 = vsel %vm4259_vm4, %v4520_v26, %v4516_v50  ;;  %v3451_v40 = vadd.f32 %v7906_v37, %v8186_v20  ;;  %vm4902_vm1 = vcmask 1043459  }
 0x202   :  { %v3715_v38 = vmul.f32 %v7924_v44, %v3580_v41  ;;  %v4530_v61 = vrot.slane %v4031_v30, %v7690_v63  ;;  %v4525_v5 = vrot.slane %v4030_v14, %v7680_v24  ;;  %v3454_v23 = vadd.f32 %v7906_v37, %v3319_v35 }
 0x203   :  { %v3579_v18 = vmax.f32 %v3451_v40, 0.0  ;;  %v4033_v49 = vadd.f32 %v7641_v29, %v3831_v1  ;;  %v4032_v42 = vadd.f32 %v7641_v29, %v3829_v36  ;;  %v3453_v28 = vadd.f32 %v7906_v37, %v3318_v33  ;;  %v3839_v46 = vpop.xlane.xlu1 %3838  ;;  %v3837_v4 = vpop.xlane.xlu0 %3836 }
 0x204   :  { %v4526_v43 = vsel %vm4266_vm5, %v4525_v5, %v4521_v16  ;;  %v3582_v20 = vmax.f32 %v3454_v23, 0.0  ;;  %v3455_v60 = vadd.f32 %v7906_v37, %v3320_v15  ;;  %v4035_v25 = vadd.f32 %v7641_v29, %v3835_v8 }
 0x205   :  { %3960 = vadd.xlane.f32.xlu1 %v3712_v13  ;;  %3966 = vadd.xlane.f32.xlu0 %v3715_v38  ;;  %v4540_v35 = vrot.slane %v4033_v49, %v7700_v21  ;;  %v4531_v48 = vsel %vm4273_vm6, %v4530_v61, %v4526_v43  ;;  %v3714_v1 = vmul.f32 %v7924_v44, %v3579_v18  ;;  %v3581_v45 = vmax.f32 %v3453_v28, 0.0 }
 0x206   :  { %v3717_v36 = vmul.f32 %v7924_v44, %v3582_v20  ;;  %v4535_v33 = vrot.slane %v4032_v42, %v8539_v39  ;;  %v3583_v34 = vmax.f32 %v3455_v60, 0.0  ;;  %v4034_v6 = vadd.f32 %v7641_v29, %v3833_v57 }
 0x207   :  { %v3456_v55 = vadd.f32 %v7906_v37, %v3321_v2  ;;  %v4037_v27 = vadd.f32 %v7641_v29, %v3839_v46  ;;  %v3843_v59 = vpop.xlane.xlu1 %3842  ;;  %v3841_v58 = vpop.xlane.xlu0 %3840  ;;  %v4550_v10 = vrot.slane %v4035_v25, %v7712_v22  ;;  %v4036_v32 = vadd.f32 %v7641_v29, %v3837_v4 }
 0x208   :  { %v4536_v26 = vsel %vm4280_vm7, %v4535_v33, %v4531_v48  ;;  %v4039_v3 = vadd.f32 %v7641_v29, %v3843_v59  ;;  %v3718_v15 = vmul.f32 %v7924_v44, %v3583_v34  ;;  %v4545_v37 = vrot.slane %v4034_v6, %v7722_v9 }
 0x209   :  { %3964 = vadd.xlane.f32.xlu1 %v3714_v1  ;;  %3970 = vadd.xlane.f32.xlu0 %v3717_v36  ;;  %v4541_v51 = vsel %vm4287_vm8, %v4540_v35, %v4536_v26  ;;  %v4560_v2 = vrot.slane %v4037_v27, %v7732_v53  ;;  %v4555_v17 = vrot.slane %v4036_v32, %v7736_v62  ;;  %v3584_v50 = vmax.f32 %v3456_v55, 0.0 }
 0x20a   :  { %v4038_v47 = vadd.f32 %v7641_v29, %v3841_v58  ;;  %v3716_v8 = vmul.f32 %v7924_v44, %v3581_v45  ;;  %v4546_v57 = vsel %vm4294_vm9, %v4545_v37, %v4541_v51  ;;  %v4570_v41 = vrot.slane %v4039_v3, %v7744_v7 }
 0x20b   :  { %v3847_v30 = vpop.xlane.xlu1 %3846  ;;  %v3845_v14 = vpop.xlane.xlu0 %3844  ;;  %v4551_v13 = vsel %vm4301_vm10, %v4550_v10, %v4546_v57  ;;  %v3719_v49 = vmul.f32 %v7924_v44, %v3584_v50 }
 0x20c   :  { %v4565_v16 = vrot.slane %v4038_v47, %v8542_v31  ;;  %v4041_v40 = vadd.f32 %v7641_v29, %v3847_v30  ;;  %v4040_v38 = vadd.f32 %v7641_v29, %v3845_v14  ;;  %v4556_v61 = vsel %vm4308_vm11, %v4555_v17, %v4551_v13 }
 0x20d   :  { %3968 = vadd.xlane.f32.xlu1 %v3716_v8  ;;  %3972 = vadd.xlane.f32.xlu0 %v3718_v15  ;;  %v4561_v5 = vsel %vm4315_vm12, %v4560_v2, %v4556_v61 }
 0x20e   :  { %v4580_v23 = vrot.slane %v4041_v40, %v7764_v19  ;;  %v4575_v18 = vrot.slane %v4040_v38, %v7768_v52  ;;  %v4566_v42 = vsel %vm4322_vm13, %v4565_v16, %v4561_v5 }
 0x20f   :  { %v3851_v28 = vpop.xlane.xlu1 %3850  ;;  %v3849_v46 = vpop.xlane.xlu0 %3848  ;;  %v4571_v4 = vsel %vm4329_vm14, %v4570_v41, %v4566_v42 }
 0x210   :  { %v4043_v43 = vadd.f32 %v7641_v29, %v3851_v28  ;;  %v4042_v20 = vadd.f32 %v7641_v29, %v3849_v46  ;;  %v4576_v60 = vsel %vm4336_vm15, %v4575_v18, %v4571_v4 }
 0x211   :  { %3974 = vadd.xlane.f32.xlu1 %v3719_v49  ;;  %v4581_v25 = vsel %vm4343_vm0, %v4580_v23, %v4576_v60 }
 0x212   :  { %v4589_v35 = vrot.slane %v4043_v43, %v7647_v56  ;;  %v4585_v44 = vrot.slane %v4042_v20, %v8544_v11  ;;  %v4903_v36 = vsel %vm4902_vm1, %v4581_v25, %v8205_v12  ;;  %vm4904_vm1 = vcmask 1044484  }
 0x213   :  { %v3855_v48 = vpop.xlane.xlu1 %3854  ;;  %v3853_v1 = vpop.xlane.xlu0 %3852 }
 0x214   :  { %v4590_v33 = vsel %vm4245_vm2, %v4589_v35, %v4585_v44  ;;  %v4045_v34 = vadd.f32 %v7641_v29, %v3855_v48  ;;  %v4044_v45 = vadd.f32 %v7641_v29, %v3853_v1 }
 0x216   :  { %v4599_v6 = vrot.slane %v4045_v34, %v7668_v0  ;;  %v4594_v55 = vrot.slane %v4044_v45, %v7672_v54 }
 0x217   :  { %v3859_v27 = vpop.xlane.xlu1 %3858  ;;  %v3857_v59 = vpop.xlane.xlu0 %3856 }
 0x218   :  { %v4595_v58 = vsel %vm4252_vm3, %v4594_v55, %v4590_v33  ;;  %v4047_v26 = vadd.f32 %v7641_v29, %v3859_v27  ;;  %v4046_v10 = vadd.f32 %v7641_v29, %v3857_v59 }
 0x219   :  { %v4600_v12 = vsel %vm4259_vm4, %v4599_v6, %v4595_v58 }
 0x21a   :  { %v4609_v32 = vrot.slane %v4047_v26, %v7690_v63  ;;  %v4604_v3 = vrot.slane %v4046_v10, %v7680_v24 }
 0x21b   :  { %v3863_v15 = vpop.xlane.xlu1 %3862  ;;  %v3861_v51 = vpop.xlane.xlu0 %3860 }
 0x21c   :  { %v4605_v37 = vsel %vm4266_vm5, %v4604_v3, %v4600_v12  ;;  %v4049_v2 = vadd.f32 %v7641_v29, %v3863_v15  ;;  %v4048_v17 = vadd.f32 %v7641_v29, %v3861_v51 }
 0x21d   :  { %v4610_v47 = vsel %vm4273_vm6, %v4609_v32, %v4605_v37 }
 0x21e   :  { %v4619_v8 = vrot.slane %v4049_v2, %v7700_v21  ;;  %v4614_v57 = vrot.slane %v4048_v17, %v8539_v39 }
 0x21f   :  { %v3867_v50 = vpop.xlane.xlu1 %3866  ;;  %v3865_v41 = vpop.xlane.xlu0 %3864 }
 0x220   :  { %v4615_v30 = vsel %vm4280_vm7, %v4614_v57, %v4610_v47  ;;  %v4051_v14 = vadd.f32 %v7641_v29, %v3867_v50  ;;  %v4050_v13 = vadd.f32 %v7641_v29, %v3865_v41 }
 0x221   :  { %v4620_v16 = vsel %vm4287_vm8, %v4619_v8, %v4615_v30 }
 0x222   :  { %v4629_v40 = vrot.slane %v4051_v14, %v7712_v22  ;;  %v4624_v38 = vrot.slane %v4050_v13, %v7722_v9 }
 0x223   :  { %v3871_v61 = vpop.xlane.xlu1 %3870 }
 0x224   :  { %v4625_v5 = vsel %vm4294_vm9, %v4624_v38, %v4620_v16  ;;  %v4053_v23 = vadd.f32 %v7641_v29, %v3871_v61  ;;  %v3869_v18 = vpop.xlane.xlu0 %3868 }
 0x225   :  { %v4630_v49 = vsel %vm4301_vm10, %v4629_v40, %v4625_v5  ;;  %v4052_v42 = vadd.f32 %v7641_v29, %v3869_v18 }
 0x226   :  { %v4639_v28 = vrot.slane %v4053_v23, %v7732_v53 }
 0x227   :  { %v4634_v46 = vrot.slane %v4052_v42, %v7736_v62  ;;  %v3875_v4 = vpop.xlane.xlu1 %3874 }
 0x228   :  { %v4055_v43 = vadd.f32 %v7641_v29, %v3875_v4  ;;  %v3873_v20 = vpop.xlane.xlu0 %3872 }
 0x229   :  { %v4635_v60 = vsel %vm4308_vm11, %v4634_v46, %v4630_v49  ;;  %v4054_v25 = vadd.f32 %v7641_v29, %v3873_v20 }
 0x22a   :  { %v4649_v35 = vrot.slane %v4055_v43, %v7744_v7  ;;  %v4640_v44 = vsel %vm4315_vm12, %v4639_v28, %v4635_v60 }
 0x22b   :  { %v4644_v48 = vrot.slane %v4054_v25, %v8542_v31 }
 0x22c   :  { %v3879_v1 = vpop.xlane.xlu1 %3878  ;;  %v3877_v33 = vpop.xlane.xlu0 %3876 }
 0x22d   :  { %v4645_v34 = vsel %vm4322_vm13, %v4644_v48, %v4640_v44  ;;  %v4057_v45 = vadd.f32 %v7641_v29, %v3879_v1  ;;  %v4056_v6 = vadd.f32 %v7641_v29, %v3877_v33 }
 0x22e   :  { %v4650_v55 = vsel %vm4329_vm14, %v4649_v35, %v4645_v34 }
 0x22f   :  { %v4659_v27 = vrot.slane %v4057_v45, %v7764_v19  ;;  %v4654_v59 = vrot.slane %v4056_v6, %v7768_v52 }
 0x230   :  { %v3883_v58 = vpop.xlane.xlu1 %3882 }
 0x231   :  { %v4655_v26 = vsel %vm4336_vm15, %v4654_v59, %v4650_v55  ;;  %v4059_v10 = vadd.f32 %v7641_v29, %v3883_v58 }
 0x232   :  { %v4660_v12 = vsel %vm4343_vm0, %v4659_v27, %v4655_v26 }
 0x233   :  { %v8331_v32 = vsel %vm4904_vm1, %v4660_v12, %v4903_v36  ;;  %v4668_v15 = vrot.slane %v4059_v10, %v7647_v56  ;;  %vm4906_vm1 = vcmask 1045509  }
 0x234   :  { %v3881_v3 = vpop.xlane.xlu0 %3880 }
 0x235   :  { %v4058_v51 = vadd.f32 %v7641_v29, %v3881_v3 }
 0x236   :  { %v3887_v37 = vpop.xlane.xlu1 %3886 }
 0x237   :  { %v4664_v2 = vrot.slane %v4058_v51, %v8544_v11  ;;  %v4061_v17 = vadd.f32 %v7641_v29, %v3887_v37 }
 0x238   :  { %v3885_v47 = vpop.xlane.xlu0 %3884 }
 0x239   :  { %v4669_v8 = vsel %vm4245_vm2, %v4668_v15, %v4664_v2  ;;  %v4060_v57 = vadd.f32 %v7641_v29, %v3885_v47  ;;  %v4678_v50 = vrot.slane %v4061_v17, %v7668_v0 }
 0x23b   :  { %v4673_v36 = vrot.slane %v4060_v57, %v7672_v54 }
 0x23c   :  { %v3889_v41 = vpop.xlane.xlu1 %3888 }
 0x23d   :  { %v4674_v30 = vsel %vm4252_vm3, %v4673_v36, %v4669_v8  ;;  %v4062_v14 = vadd.f32 %v7641_v29, %v3889_v41 }
 0x23e   :  { %v4679_v13 = vsel %vm4259_vm4, %v4678_v50, %v4674_v30  ;;  %v3891_v16 = vpop.xlane.xlu0 %3890 }
 0x23f   :  { %v4683_v40 = vrot.slane %v4062_v14, %v7680_v24  ;;  %v4063_v38 = vadd.f32 %v7641_v29, %v3891_v16 }
 0x240   :  { %v3893_v61 = vpop.xlane.xlu1 %3892 }
 0x241   :  { %v4684_v5 = vsel %vm4266_vm5, %v4683_v40, %v4679_v13  ;;  %v4688_v23 = vrot.slane %v4063_v38, %v7690_v63  ;;  %v4064_v18 = vadd.f32 %v7641_v29, %v3893_v61 }
 0x242   :  { %v3895_v49 = vpop.xlane.xlu0 %3894 }
 0x243   :  { %v4689_v42 = vsel %vm4273_vm6, %v4688_v23, %v4684_v5  ;;  %v4693_v28 = vrot.slane %v4064_v18, %v8539_v39  ;;  %v4065_v46 = vadd.f32 %v7641_v29, %v3895_v49 }
 0x245   :  { %v4694_v4 = vsel %vm4280_vm7, %v4693_v28, %v4689_v42  ;;  %v4698_v43 = vrot.slane %v4065_v46, %v7700_v21 }
 0x246   :  { %v3897_v20 = vpop.xlane.xlu1 %3896 }
 0x247   :  { %v4699_v60 = vsel %vm4287_vm8, %v4698_v43, %v4694_v4  ;;  %v4066_v25 = vadd.f32 %v7641_v29, %v3897_v20  ;;  %v3899_v35 = vpop.xlane.xlu0 %3898 }
 0x248   :  { %v4067_v44 = vadd.f32 %v7641_v29, %v3899_v35 }
 0x249   :  { %v4703_v48 = vrot.slane %v4066_v25, %v7722_v9 }
 0x24a   :  { %v4708_v1 = vrot.slane %v4067_v44, %v7712_v22 }
 0x24b   :  { %v4704_v33 = vsel %vm4294_vm9, %v4703_v48, %v4699_v60  ;;  %v3901_v34 = vpop.xlane.xlu1 %3900  ;;  %v3903_v45 = vpop.xlane.xlu0 %3902 }
 0x24c   :  { %v4709_v6 = vsel %vm4301_vm10, %v4708_v1, %v4704_v33  ;;  %v4068_v55 = vadd.f32 %v7641_v29, %v3901_v34  ;;  %v4069_v27 = vadd.f32 %v7641_v29, %v3903_v45 }
 0x24e   :  { %v4713_v59 = vrot.slane %v4068_v55, %v7736_v62  ;;  %v4718_v58 = vrot.slane %v4069_v27, %v7732_v53 }
 0x24f   :  { %v3905_v26 = vpop.xlane.xlu1 %3904  ;;  %v3907_v10 = vpop.xlane.xlu0 %3906 }
 0x250   :  { %v4714_v12 = vsel %vm4308_vm11, %v4713_v59, %v4709_v6  ;;  %v4070_v3 = vadd.f32 %v7641_v29, %v3905_v26  ;;  %v4071_v15 = vadd.f32 %v7641_v29, %v3907_v10 }
 0x251   :  { %v4719_v51 = vsel %vm4315_vm12, %v4718_v58, %v4714_v12 }
 0x252   :  { %v4723_v37 = vrot.slane %v4070_v3, %v8542_v31  ;;  %v4728_v2 = vrot.slane %v4071_v15, %v7744_v7 }
 0x254   :  { %v4724_v17 = vsel %vm4322_vm13, %v4723_v37, %v4719_v51  ;;  %v3909_v47 = vpop.xlane.xlu1 %3908  ;;  %v3911_v8 = vpop.xlane.xlu0 %3910 }
 0x255   :  { %v4729_v57 = vsel %vm4329_vm14, %v4728_v2, %v4724_v17  ;;  %v4072_v50 = vadd.f32 %v7641_v29, %v3909_v47  ;;  %v4073_v36 = vadd.f32 %v7641_v29, %v3911_v8 }
 0x257   :  { %v4733_v41 = vrot.slane %v4072_v50, %v7768_v52  ;;  %v4738_v30 = vrot.slane %v4073_v36, %v7764_v19 }
 0x258   :  { %v3913_v38 = vpop.xlane.xlu1 %3912 }
 0x259   :  { %v4734_v14 = vsel %vm4336_vm15, %v4733_v41, %v4729_v57  ;;  %v3915_v13 = vpop.xlane.xlu0 %3914 }
 0x25a   :  { %v4739_v16 = vsel %vm4343_vm0, %v4738_v30, %v4734_v14  ;;  %v4075_v35 = vadd.f32 %v7641_v29, %v3915_v13 }
 0x25b   :  { %v8380_v40 = vsel %vm4906_vm1, %v4739_v16, %v8331_v32  ;;  %v4074_v32 = vadd.f32 %v7641_v29, %v3913_v38 }
 0x25c   :  { %v4747_v34 = vrot.slane %v4075_v35, %v7647_v56 }
 0x25d   :  { %v3919_v61 = vpop.xlane.xlu0 %3918  ;;  %v4743_v33 = vrot.slane %v4074_v32, %v8544_v11 }
 0x25e   :  { %v4077_v6 = vadd.f32 %v7641_v29, %v3919_v61 }
 0x25f   :  { %v4748_v27 = vsel %vm4245_vm2, %v4747_v34, %v4743_v33 }
 0x260   :  { %v4757_v12 = vrot.slane %v4077_v6, %v7668_v0 }
 0x261   :  { %v3921_v5 = vpop.xlane.xlu1 %3920  ;;  %v3917_v23 = vpop.xlane.xlu0 %3916 }
 0x262   :  { %v4076_v44 = vadd.f32 %v7641_v29, %v3917_v23  ;;  %v4078_v58 = vadd.f32 %v7641_v29, %v3921_v5 }
 0x264   :  { %v4752_v45 = vrot.slane %v4076_v44, %v7672_v54  ;;  %v4762_v17 = vrot.slane %v4078_v58, %v7680_v24 }
 0x265   :  { %v3925_v18 = vpop.xlane.xlu1 %3924  ;;  %v3923_v49 = vpop.xlane.xlu0 %3922 }
 0x266   :  { %v4753_v26 = vsel %vm4252_vm3, %v4752_v45, %v4748_v27  ;;  %v4079_v3 = vadd.f32 %v7641_v29, %v3923_v49  ;;  %v4080_v47 = vadd.f32 %v7641_v29, %v3925_v18 }
 0x267   :  { %v4758_v51 = vsel %vm4259_vm4, %v4757_v12, %v4753_v26 }
 0x268   :  { %v4767_v50 = vrot.slane %v4079_v3, %v7690_v63  ;;  %v4763_v41 = vsel %vm4266_vm5, %v4762_v17, %v4758_v51  ;;  %v4772_v38 = vrot.slane %v4080_v47, %v8539_v39 }
 0x26a   :  { %v3929_v42 = vpop.xlane.xlu1 %3928  ;;  %v3927_v28 = vpop.xlane.xlu0 %3926  ;;  %v4768_v18 = vsel %vm4273_vm6, %v4767_v50, %v4763_v41 }
 0x26b   :  { %v4081_v36 = vadd.f32 %v7641_v29, %v3927_v28  ;;  %v4082_v61 = vadd.f32 %v7641_v29, %v3929_v42  ;;  %v4773_v44 = vsel %vm4280_vm7, %v4772_v38, %v4768_v18 }
 0x26d   :  { %v4777_v49 = vrot.slane %v4081_v36, %v7700_v21  ;;  %v4782_v42 = vrot.slane %v4082_v61, %v7722_v9 }
 0x26e   :  { %v3933_v46 = vpop.xlane.xlu1 %3932 }
 0x26f   :  { %v3931_v4 = vpop.xlane.xlu0 %3930 }
 0x273   :  { %v8382_v43 = vpop.xlane.xlu1 %3936  ;;  %v3935_v20 = vpop.xlane.xlu0 %3934 }
 0x274   :  { %v4086_v51 = vadd.f32 %v7641_v29, %v8382_v43 }
 0x276   :  { %v4802_v36 = vrot.slane %v4086_v51, %v8542_v31 }
 0x277   :  { %v8384_v60 = vpop.xlane.xlu1 %3942 }
 0x278   :  { %v8386_v25 = vpop.xlane.xlu0 %3938  ;;  %v4089_v38 = vadd.f32 %v7641_v29, %v8384_v60 }
 0x27c   :  { %v8391_v48 = vpop.xlane.xlu1 %3940  ;;  %v3947_v1 = vpop.xlane.xlu0 %3946 }
 0x27d   :  { %v4091_v15 = vadd.f32 %v7641_v29, %v3947_v1  ;;  %v4084_v1 = vadd.f32 %v7641_v29, %v3933_v46  ;;  %v4088_v47 = vadd.f32 %v7641_v29, %v8391_v48 }
 0x27f   :  { %v4826_v30 = vrot.slane %v4091_v15, %v7647_v56  ;;  %v4083_v56 = vadd.f32 %v7641_v29, %v3931_v4  ;;  %v4778_v4 = vsel %vm4287_vm8, %v4777_v49, %v4773_v44  ;;  %v4792_v58 = vrot.slane %v4084_v1, %v7736_v62 }
 0x280   :  { %v3945_v55 = vpop.xlane.xlu1 %3944  ;;  %v4783_v26 = vsel %vm4294_vm9, %v4782_v42, %v4778_v4 }
 0x281   :  { %v3951_v59 = vpop.xlane.xlu0 %3950  ;;  %v4090_v10 = vadd.f32 %v7641_v29, %v3945_v55  ;;  %v4787_v6 = vrot.slane %v4083_v56, %v7712_v22 }
 0x282   :  { %v4093_v14 = vadd.f32 %v7641_v29, %v3951_v59 }
 0x283   :  { %v4822_v8 = vrot.slane %v4090_v10, %v8544_v11  ;;  %v4788_v15 = vsel %vm4301_vm10, %v4787_v6, %v4783_v26 }
 0x284   :  { %v4793_v41 = vsel %vm4308_vm11, %v4792_v58, %v4788_v15 }
 0x285   :  { %v3949_v37 = vpop.xlane.xlu1 %3948  ;;  %v3955_v2 = vpop.xlane.xlu0 %3954  ;;  %v4827_v11 = vsel %vm4245_vm2, %v4826_v30, %v4822_v8  ;;  %vm4908_vm2 = vcmask 1046534  }
 0x286   :  { %v4092_v57 = vadd.f32 %v7641_v29, %v3949_v37  ;;  %v4095_v32 = vadd.f32 %v7641_v29, %v3955_v2 }
 0x288   :  { %v4831_v13 = vrot.slane %v4092_v57, %v7672_v54  ;;  %v4836_v54 = vrot.slane %v4093_v14, %v7668_v0  ;;  %v4846_v27 = vrot.slane %v4095_v32, %v7690_v63  ;;  %v4817_v32 = vrot.slane %v4089_v38, %v7764_v19 }
 0x289   :  { %v3953_v16 = vpop.xlane.xlu1 %3952 }
 0x28a   :  { %v4094_v5 = vadd.f32 %v7641_v29, %v3953_v16  ;;  %v3959_v23 = vpop.xlane.xlu0 %3958  ;;  %v4832_v28 = vsel %vm4252_vm3, %v4831_v13, %v4827_v11  ;;  %v4812_v13 = vrot.slane %v4088_v47, %v7768_v52  ;;  %vm4910_vm3 = vcmask 1047559  }
 0x28b   :  { %v4837_v33 = vsel %vm4259_vm4, %v4836_v54, %v4832_v28  ;;  %v4097_v59 = vadd.f32 %v7641_v29, %v3959_v23 }
 0x28c   :  { %v4841_v35 = vrot.slane %v4094_v5, %v7680_v24  ;;  %v4085_v24 = vadd.f32 %v7641_v29, %v3935_v20 }
 0x28d   :  { %v4856_v2 = vrot.slane %v4097_v59, %v7700_v21 }
 0x28e   :  { %v3957_v34 = vpop.xlane.xlu1 %3956  ;;  %v3963_v45 = vpop.xlane.xlu0 %3962  ;;  %v4842_v0 = vsel %vm4266_vm5, %v4841_v35, %v4837_v33  ;;  %v4797_v37 = vrot.slane %v4085_v24, %v7732_v53 }
 0x28f   :  { %v4096_v55 = vadd.f32 %v7641_v29, %v3957_v34  ;;  %v4847_v10 = vsel %vm4273_vm6, %v4846_v27, %v4842_v0  ;;  %v4099_v17 = vadd.f32 %v7641_v29, %v3963_v45 }
 0x290   :  { %v4798_v21 = vsel %vm4315_vm12, %v4797_v37, %v4793_v41 }
 0x291   :  { %v4851_v46 = vrot.slane %v4096_v55, %v8539_v39  ;;  %v4087_v39 = vadd.f32 %v7641_v29, %v8386_v25  ;;  %v4866_v48 = vrot.slane %v4099_v17, %v7712_v22  ;;  %v4803_v18 = vsel %vm4322_vm13, %v4802_v36, %v4798_v21 }
 0x292   :  { %v3961_v12 = vpop.xlane.xlu1 %3960  ;;  %v3967_v3 = vpop.xlane.xlu0 %3966 }
 0x293   :  { %v4852_v20 = vsel %vm4280_vm7, %v4851_v46, %v4847_v10  ;;  %v4098_v63 = vadd.f32 %v7641_v29, %v3961_v12  ;;  %v4807_v14 = vrot.slane %v4087_v39, %v7744_v7 }
 0x294   :  { %v4857_v43 = vsel %vm4287_vm8, %v4856_v2, %v4852_v20 }
 0x295   :  { %v4861_v8 = vrot.slane %v4098_v63, %v7722_v9  ;;  %v4101_v9 = vadd.f32 %v7641_v29, %v3967_v3  ;;  %v4808_v28 = vsel %vm4329_vm14, %v4807_v14, %v4803_v18 }
 0x296   :  { %v3965_v57 = vpop.xlane.xlu1 %3964  ;;  %v3971_v50 = vpop.xlane.xlu0 %3970  ;;  %v4813_v60 = vsel %vm4336_vm15, %v4812_v13, %v4808_v28 }
 0x297   :  { %v4862_v30 = vsel %vm4294_vm9, %v4861_v8, %v4857_v43  ;;  %v4100_v25 = vadd.f32 %v7641_v29, %v3965_v57  ;;  %v4103_v11 = vadd.f32 %v7641_v29, %v3971_v50  ;;  %v4818_v45 = vsel %vm4343_vm0, %v4817_v32, %v4813_v60 }
 0x298   :  { %v4867_v61 = vsel %vm4301_vm10, %v4866_v48, %v4862_v30  ;;  %v4909_v6 = vsel %vm4908_vm2, %v4818_v45, %v8380_v40 }
 0x299   :  { %v4871_v16 = vrot.slane %v4100_v25, %v7736_v62  ;;  %v4876_v62 = vrot.slane %v4101_v9, %v7732_v53  ;;  %v4886_v35 = vrot.slane %v4103_v11, %v7744_v7 }
 0x29a   :  { %v3969_v5 = vpop.xlane.xlu1 %3968  ;;  %v3973_v23 = vpop.xlane.xlu0 %3972 }
 0x29b   :  { %v4872_v49 = vsel %vm4308_vm11, %v4871_v16, %v4867_v61  ;;  %v4102_v22 = vadd.f32 %v7641_v29, %v3969_v5  ;;  %v4104_v56 = vadd.f32 %v7641_v29, %v3973_v23 }
 0x29c   :  { %v4877_v42 = vsel %vm4315_vm12, %v4876_v62, %v4872_v49 }
 0x29d   :  { %v4881_v54 = vrot.slane %v4102_v22, %v8542_v31  ;;  %v4891_v33 = vrot.slane %v4104_v56, %v7768_v52 }
 0x29e   :  { %v3975_v44 = vpop.xlane.xlu1 %3974 }
 0x29f   :  { %v4882_v1 = vsel %vm4322_vm13, %v4881_v54, %v4877_v42  ;;  %v4105_v34 = vadd.f32 %v7641_v29, %v3975_v44 }
 0x2a0   :  { %v4887_v53 = vsel %vm4329_vm14, %v4886_v35, %v4882_v1 }
 0x2a1   :  { %v4896_v31 = vrot.slane %v4105_v34, %v7764_v19  ;;  %v4892_v7 = vsel %vm4336_vm15, %v4891_v33, %v4887_v53 }
 0x2a3   :  { %v4897_v4 = vsel %vm4343_vm0, %v4896_v31, %v4892_v7 }
 0x2a4   :  { %v4911_v52 = vsel %vm4910_vm3, %v4897_v4, %v4909_v6 }
 0x2a5   :  { %4913 = vst [vmem:[#allocation3] sm:$0xff] %v4911_v52 }
 0x2a6   :  { %6134 = shalt.err (!%p6131_p4)
}
 0x2a7   :  { %s6135_s7 = scalar_lea.hbm %s8507_s6, 128 }
 0x2a8   :  { %p6136_p5 = scmp.ne.s32.totalorder %s8507_s6, %s6135_s7  ;;  %p6139_p6 = scmp.lt.u32.totalorder %s6135_s7, %s8507_s6 }
 0x2aa   :  { %p6141_p7 = pnand %p6139_p6, %p6136_p5 }
 0x2ac   :  { %6144 = shalt.err (!%p6141_p7)
}
 0x2ad   :  { %4923 = dma.vmem_to_hbm [thread:$0]  %s4921_s27, 128, %s8507_s6, [#allocation4]  }
 0x2ae   :  { %6145 = dma.done.wait [#allocation4], 128  }
 0x2af   :  { %6146 = vsyncadd [#allocation4], 4294967168 }
 0x2b0   :  { %4927 = vsyncpa [#allocation4], 1 }

</bundles_post_ra>
